<compile_context>
chip_gen: v7x
topology: tpu7x:2x2x1
jax: 0.10.0
libtpu: 0.0.40
codegen_flags: <defaults>
</compile_context>

<pallas_src>
import math

import jax
import jax.numpy as jnp
from jax.experimental import pallas as pl
from jax.experimental.pallas import tpu as pltpu

_SPEED_OF_LIGHT = 299792458.0


def freq_to_wavelength(freq: float) -> float:
    return _SPEED_OF_LIGHT / freq


def make_beamformer_geometry(n_ants: int = 4, spacing: float = 0.02):
    """Deterministic stand-in for Beamformer(freq, ants_loc, topology):
    uniform linear array; one (dist, angle) per unordered antenna pair."""
    locs = jnp.stack(
        [jnp.arange(n_ants, dtype=jnp.float32) * spacing,
         jnp.zeros(n_ants, dtype=jnp.float32)],
        axis=-1)
    dists, angles = [], []
    for i in range(n_ants):
        for j in range(i + 1, n_ants):
            dx = locs[j, 0] - locs[i, 0]
            dy = locs[j, 1] - locs[i, 1]
            dists.append(jnp.sqrt(dx * dx + dy * dy))
            angles.append(jnp.arctan2(dy, dx))
    return jnp.stack(dists), jnp.stack(angles)


def _round_up(x: int, m: int) -> int:
    return ((x + m - 1) // m) * m


def _phase_manifold_kernel(ph_r, doa_r, c_r, s_r, ph_t, doa_t, c_t, s_t, out_ref):
    """One (TM, TN) tile of exp(-0.5 * psi @ psi.T).

    ph_r   [TM, P]  row block of phases          doa_r [TM, 1]
    c_r/s_r [1, P]  k*d*cos(angles), k*d*sin(angles)   (k = 2*pi/wavelength)
    ph_t   [P, TN]  column block of phases^T     doa_t [1, TN]
    c_t/s_t [P, 1]  transposed copies of c_r / s_r
    out    [TM, TN]
    """
    i = pl.program_id(0)
    j = pl.program_id(1)

    @pl.when(j >= i)
    def _compute():
        # manifold = k*d*cos(doa + angles) = cos(doa)*c - sin(doa)*s   (trig hoist)
        cos_r = jnp.cos(doa_r[...])                                         # [TM, 1]
        sin_r = jnp.sin(doa_r[...])
        psi_r = ph_r[...] - jnp.abs(cos_r * c_r[...] - sin_r * s_r[...])    # [TM, P]

        cos_c = jnp.cos(doa_t[...])                                         # [1, TN]
        sin_c = jnp.sin(doa_t[...])
        psi_c = ph_t[...] - jnp.abs(cos_c * c_t[...] - sin_c * s_t[...])    # [P, TN]

        # MXU: plain [TM,P] @ [P,TN], f32 accumulation, no per-tile transpose.
        gram = jnp.dot(psi_r, psi_c, preferred_element_type=jnp.float32)    # [TM, TN]
        out_ref[...] = jnp.exp(-0.5 * gram)

    @pl.when(j < i)
    def _skip():
        # Lower-triangle tile: filled by mirroring tile (j, i) outside the kernel.
        out_ref[...] = jnp.zeros_like(out_ref)


def phase_manifold_loss(phases, doa, dists, angles, wavelength, *, max_tile: int = 512):
    """phases: [B, P], doa: [B] or [B, 1], dists/angles: [P] -> out [B, B] (float32)."""
    B, P = phases.shape
    scale = 2.0 * math.pi / float(wavelength)

    phases = phases.astype(jnp.float32)
    doa = jnp.asarray(doa, jnp.float32).reshape(B, 1)
    dists = jnp.asarray(dists, jnp.float32).reshape(-1)
    angles = jnp.asarray(angles, jnp.float32).reshape(-1)

    # Trig hoist: fold scale * dists * cos/sin(angles) into two [1, P] constants.
    c = (scale * dists * jnp.cos(angles)).reshape(1, P)
    s = (scale * dists * jnp.sin(angles)).reshape(1, P)

    # Lane-dense square output tiles (multiple of 128, capped at 512 for v5e/v7x VMEM).
    tile = min(max_tile, _round_up(B, 128))
    bp = _round_up(B, tile)
    pad = bp - B

    phases_p = jnp.pad(phases, ((0, pad), (0, 0)))   # [Bp, P]
    doa_p = jnp.pad(doa, ((0, pad), (0, 0)))         # [Bp, 1]
    phases_t = phases_p.T                            # [P, Bp]  column operand, pre-transposed
    doa_t = doa_p.T                                  # [1, Bp]
    c_t = c.T                                        # [P, 1]
    s_t = s.T                                        # [P, 1]

    n_blocks = bp // tile
    grid = (n_blocks, n_blocks)

    cost = pl.CostEstimate(
        flops=2 * bp * bp * P,
        transcendentals=bp * bp + 2 * bp,
        bytes_accessed=4 * (2 * bp * P + bp * bp),
    )

    w = pl.pallas_call(
        _phase_manifold_kernel,
        out_shape=jax.ShapeDtypeStruct((bp, bp), jnp.float32),
        grid=grid,
        in_specs=[
            pl.BlockSpec((tile, P), lambda i, j: (i, 0)),    # phases, row block
            pl.BlockSpec((tile, 1), lambda i, j: (i, 0)),    # doa, row block
            pl.BlockSpec((1, P), lambda i, j: (0, 0)),       # c
            pl.BlockSpec((1, P), lambda i, j: (0, 0)),       # s
            pl.BlockSpec((P, tile), lambda i, j: (0, j)),    # phases^T, column block
            pl.BlockSpec((1, tile), lambda i, j: (0, j)),    # doa^T, column block
            pl.BlockSpec((P, 1), lambda i, j: (0, 0)),       # c^T
            pl.BlockSpec((P, 1), lambda i, j: (0, 0)),       # s^T
        ],
        out_specs=pl.BlockSpec((tile, tile), lambda i, j: (i, j)),
        compiler_params=pltpu.CompilerParams(
            dimension_semantics=("parallel", "parallel")),
        cost_estimate=cost,
    )(phases_p, doa_p, c, s, phases_t, doa_t, c_t, s_t)

    # Mirror computed upper-triangle tiles into the skipped lower-triangle tiles.
    if n_blocks > 1:
        rb = (jnp.arange(bp, dtype=jnp.int32) // tile)[:, None]
        cb = (jnp.arange(bp, dtype=jnp.int32) // tile)[None, :]
        w = jnp.where(cb >= rb, w, w.T)

    return w[:B, :B]


def phase_manifold_loss_ref(phases, doa, dists, angles, wavelength):
    """Pure-JAX reference mirroring the PyTorch forward."""
    doa = doa.reshape(-1, 1)
    manifold = 2.0 * jnp.pi * dists[None, :] * jnp.cos(doa + angles[None, :]) / wavelength
    psi = phases - jnp.abs(manifold)
    return jnp.exp(-0.5 * (psi @ psi.T))


if __name__ == "__main__":
    freq = 2.4e9
    wavelength = freq_to_wavelength(freq)

    n_ants = 4
    P = n_ants * (n_ants - 1) // 2      # 6 antenna pairs
    dists, angles = make_beamformer_geometry(n_ants=n_ants, spacing=0.02)

    k1, k2, k3, k4 = jax.random.split(jax.random.PRNGKey(0), 4)

    # Case 1: module-sized demo problem (single padded 128x128 tile).
    B = 8
    phases = jax.random.normal(k1, (B, P), dtype=jnp.float32)
    doa = jax.random.uniform(k2, (B, 1), dtype=jnp.float32, minval=0.0, maxval=jnp.pi)
    out = jax.block_until_ready(phase_manifold_loss(phases, doa, dists, angles, wavelength))
    ref = phase_manifold_loss_ref(phases, doa, dists, angles, wavelength)
    if not jnp.allclose(out, ref, rtol=1e-4, atol=1e-5):
        raise AssertionError("Pallas kernel mismatch vs. JAX reference (B=8)")

    # Case 2: exercises multi-tile grid (3x3 of 128x128), padding and symmetric mirror.
    B2 = 300
    phases2 = jax.random.normal(k3, (B2, P), dtype=jnp.float32)
    doa2 = jax.random.uniform(k4, (B2, 1), dtype=jnp.float32, minval=0.0, maxval=jnp.pi)
    out2 = jax.block_until_ready(
        phase_manifold_loss(phases2, doa2, dists, angles, wavelength, max_tile=128))
    ref2 = phase_manifold_loss_ref(phases2, doa2, dists, angles, wavelength)
    if not jnp.allclose(out2, ref2, rtol=1e-4, atol=1e-5):
        raise AssertionError("Pallas kernel mismatch vs. JAX reference (B=300)")

    print("KERNEL_OK")
</pallas_src>

<mosaic_0001>
module attributes {stable_mosaic.version = 11 : i64} {
  func.func @_phase_manifold_kernel(%arg0: i32, %arg1: i32, %arg2: memref<128x6xf32, #tpu.memory_space<vmem>>, %arg3: memref<128x1xf32, #tpu.memory_space<vmem>>, %arg4: memref<1x6xf32, #tpu.memory_space<vmem>>, %arg5: memref<1x6xf32, #tpu.memory_space<vmem>>, %arg6: memref<6x128xf32, #tpu.memory_space<vmem>>, %arg7: memref<1x128xf32, #tpu.memory_space<vmem>>, %arg8: memref<6x1xf32, #tpu.memory_space<vmem>>, %arg9: memref<6x1xf32, #tpu.memory_space<vmem>>, %arg10: memref<128x128xf32, #tpu.memory_space<vmem>>) attributes {dimension_semantics = [#tpu.dimension_semantics<parallel>, #tpu.dimension_semantics<parallel>], iteration_bounds = array<i64: 1, 1>, scalar_prefetch = 0 : i64, scratch_operands = 0 : i64, tpu.core_type = #tpu.core_type<tc>, window_params = [{transform_indices = @transform_0, window_bounds = array<i64: 128, 6>}, {transform_indices = @transform_1, window_bounds = array<i64: 128, 1>}, {pipeline_mode = #tpu.pipeline_mode<synchronous>, transform_indices = @transform_2, window_bounds = array<i64: 1, 6>}, {pipeline_mode = #tpu.pipeline_mode<synchronous>, transform_indices = @transform_3, window_bounds = array<i64: 1, 6>}, {transform_indices = @transform_4, window_bounds = array<i64: 6, 128>}, {transform_indices = @transform_5, window_bounds = array<i64: 1, 128>}, {pipeline_mode = #tpu.pipeline_mode<synchronous>, transform_indices = @transform_6, window_bounds = array<i64: 6, 1>}, {pipeline_mode = #tpu.pipeline_mode<synchronous>, transform_indices = @transform_7, window_bounds = array<i64: 6, 1>}, {transform_indices = @transform_8, window_bounds = array<i64: 128, 128>}]} {
    %0 = arith.cmpi sge, %arg1, %arg0 : i32
    %1 = arith.extui %0 : i1 to i32
    %c0_i32 = arith.constant 0 : i32
    %2 = arith.cmpi ne, %1, %c0_i32 : i32
    scf.if %2 {
      %c0 = arith.constant 0 : index
      %c0_1 = arith.constant 0 : index
      %6 = vector.load %arg3[%c0, %c0_1] : memref<128x1xf32, #tpu.memory_space<vmem>>, vector<128x1xf32>
      %7 = math.cos %6 : vector<128x1xf32>
      %c0_2 = arith.constant 0 : index
      %c0_3 = arith.constant 0 : index
      %8 = vector.load %arg3[%c0_2, %c0_3] : memref<128x1xf32, #tpu.memory_space<vmem>>, vector<128x1xf32>
      %9 = math.sin %8 : vector<128x1xf32>
      %c0_4 = arith.constant 0 : index
      %c0_5 = arith.constant 0 : index
      %10 = vector.load %arg2[%c0_4, %c0_5] : memref<128x6xf32, #tpu.memory_space<vmem>>, vector<128x6xf32>
      %c0_6 = arith.constant 0 : index
      %c0_7 = arith.constant 0 : index
      %11 = vector.load %arg4[%c0_6, %c0_7] : memref<1x6xf32, #tpu.memory_space<vmem>>, vector<1x6xf32>
      %12 = vector.broadcast %7 : vector<128x1xf32> to vector<128x6xf32>
      %13 = vector.broadcast %11 : vector<1x6xf32> to vector<128x6xf32>
      %14 = arith.mulf %12, %13 : vector<128x6xf32>
      %c0_8 = arith.constant 0 : index
      %c0_9 = arith.constant 0 : index
      %15 = vector.load %arg5[%c0_8, %c0_9] : memref<1x6xf32, #tpu.memory_space<vmem>>, vector<1x6xf32>
      %16 = vector.broadcast %9 : vector<128x1xf32> to vector<128x6xf32>
      %17 = vector.broadcast %15 : vector<1x6xf32> to vector<128x6xf32>
      %18 = arith.mulf %16, %17 : vector<128x6xf32>
      %19 = arith.subf %14, %18 : vector<128x6xf32>
      %20 = math.absf %19 : vector<128x6xf32>
      %21 = arith.subf %10, %20 : vector<128x6xf32>
      %c0_10 = arith.constant 0 : index
      %c0_11 = arith.constant 0 : index
      %22 = vector.load %arg7[%c0_10, %c0_11] : memref<1x128xf32, #tpu.memory_space<vmem>>, vector<1x128xf32>
      %23 = math.cos %22 : vector<1x128xf32>
      %c0_12 = arith.constant 0 : index
      %c0_13 = arith.constant 0 : index
      %24 = vector.load %arg7[%c0_12, %c0_13] : memref<1x128xf32, #tpu.memory_space<vmem>>, vector<1x128xf32>
      %25 = math.sin %24 : vector<1x128xf32>
      %c0_14 = arith.constant 0 : index
      %c0_15 = arith.constant 0 : index
      %26 = vector.load %arg6[%c0_14, %c0_15] : memref<6x128xf32, #tpu.memory_space<vmem>>, vector<6x128xf32>
      %c0_16 = arith.constant 0 : index
      %c0_17 = arith.constant 0 : index
      %27 = vector.load %arg8[%c0_16, %c0_17] : memref<6x1xf32, #tpu.memory_space<vmem>>, vector<6x1xf32>
      %28 = vector.broadcast %23 : vector<1x128xf32> to vector<6x128xf32>
      %29 = vector.broadcast %27 : vector<6x1xf32> to vector<6x128xf32>
      %30 = arith.mulf %28, %29 : vector<6x128xf32>
      %c0_18 = arith.constant 0 : index
      %c0_19 = arith.constant 0 : index
      %31 = vector.load %arg9[%c0_18, %c0_19] : memref<6x1xf32, #tpu.memory_space<vmem>>, vector<6x1xf32>
      %32 = vector.broadcast %25 : vector<1x128xf32> to vector<6x128xf32>
      %33 = vector.broadcast %31 : vector<6x1xf32> to vector<6x128xf32>
      %34 = arith.mulf %32, %33 : vector<6x128xf32>
      %35 = arith.subf %30, %34 : vector<6x128xf32>
      %36 = math.absf %35 : vector<6x128xf32>
      %37 = arith.subf %26, %36 : vector<6x128xf32>
      %cst = arith.constant dense<0.000000e+00> : vector<128x128xf32>
      %38 = tpu.matmul %21, %37, %cst {dimension_numbers = #tpu.dot_dimension_numbers<[1], [0], [0], [1], [0, 0, 1, 1], [], []>} : vector<128x6xf32>, vector<6x128xf32>, vector<128x128xf32> -> vector<128x128xf32>
      %cst_20 = arith.constant -5.000000e-01 : f32
      %39 = vector.broadcast %cst_20 : f32 to vector<128x128xf32>
      %40 = arith.mulf %39, %38 : vector<128x128xf32>
      %41 = math.exp %40 : vector<128x128xf32>
      %c0_21 = arith.constant 0 : index
      %c0_22 = arith.constant 0 : index
      %42 = vector.load %arg10[%c0_21, %c0_22] : memref<128x128xf32, #tpu.memory_space<vmem>>, vector<128x128xf32>
      tpu.vector_store %arg10[%c0_21, %c0_22], %41 {strides = array<i32>} : memref<128x128xf32, #tpu.memory_space<vmem>>, vector<128x128xf32>,
    } else {
    }
    %3 = arith.cmpi slt, %arg1, %arg0 : i32
    %4 = arith.extui %3 : i1 to i32
    %c0_i32_0 = arith.constant 0 : i32
    %5 = arith.cmpi ne, %4, %c0_i32_0 : i32
    scf.if %5 {
      %cst = arith.constant 0.000000e+00 : f32
      %6 = vector.broadcast %cst : f32 to vector<128x128xf32>
      %c0 = arith.constant 0 : index
      %c0_1 = arith.constant 0 : index
      %7 = vector.load %arg10[%c0, %c0_1] : memref<128x128xf32, #tpu.memory_space<vmem>>, vector<128x128xf32>
      tpu.vector_store %arg10[%c0, %c0_1], %6 {strides = array<i32>} : memref<128x128xf32, #tpu.memory_space<vmem>>, vector<128x128xf32>,
    } else {
    }
    return
  }
  func.func @transform_0(%arg0: i32, %arg1: i32) -> (i32, i32) {
    %c0_i32 = arith.constant 0 : i32
    %c0_i32_0 = arith.constant 0 : i32
    return %arg0, %c0_i32 : i32, i32
  }
  func.func @transform_1(%arg0: i32, %arg1: i32) -> (i32, i32) {
    %c0_i32 = arith.constant 0 : i32
    %c0_i32_0 = arith.constant 0 : i32
    return %arg0, %c0_i32 : i32, i32
  }
  func.func @transform_2(%arg0: i32, %arg1: i32) -> (i32, i32) {
    %c0_i32 = arith.constant 0 : i32
    %c0_i32_0 = arith.constant 0 : i32
    %c0_i32_1 = arith.constant 0 : i32
    return %c0_i32, %c0_i32_0 : i32, i32
  }
  func.func @transform_3(%arg0: i32, %arg1: i32) -> (i32, i32) {
    %c0_i32 = arith.constant 0 : i32
    %c0_i32_0 = arith.constant 0 : i32
    %c0_i32_1 = arith.constant 0 : i32
    return %c0_i32, %c0_i32_0 : i32, i32
  }
  func.func @transform_4(%arg0: i32, %arg1: i32) -> (i32, i32) {
    %c0_i32 = arith.constant 0 : i32
    %c0_i32_0 = arith.constant 0 : i32
    return %c0_i32, %arg1 : i32, i32
  }
  func.func @transform_5(%arg0: i32, %arg1: i32) -> (i32, i32) {
    %c0_i32 = arith.constant 0 : i32
    %c0_i32_0 = arith.constant 0 : i32
    return %c0_i32, %arg1 : i32, i32
  }
  func.func @transform_6(%arg0: i32, %arg1: i32) -> (i32, i32) {
    %c0_i32 = arith.constant 0 : i32
    %c0_i32_0 = arith.constant 0 : i32
    %c0_i32_1 = arith.constant 0 : i32
    return %c0_i32, %c0_i32_0 : i32, i32
  }
  func.func @transform_7(%arg0: i32, %arg1: i32) -> (i32, i32) {
    %c0_i32 = arith.constant 0 : i32
    %c0_i32_0 = arith.constant 0 : i32
    %c0_i32_1 = arith.constant 0 : i32
    return %c0_i32, %c0_i32_0 : i32, i32
  }
  func.func @transform_8(%arg0: i32, %arg1: i32) -> (i32, i32) {
    %c0_i32 = arith.constant 0 : i32
    return %arg0, %arg1 : i32, i32
  }
}

</mosaic_0001>

<bundles_post_ra>
// kernel: tpu_custom_call.1
= control target key start
LH: loop header
LB: loop body
LE: loop exit
PB: predicated region body
PF: predicated region fallthrough
CT: control target
= control target key end

     0   :  { %v4572_v2 = vmov 0   ;;  %s6435_s0 = inlined_call_operand.vmem [shape: f32[128,6], index: 0, kind: input, shape index: {}]   ;;  %s6436_s1 = inlined_call_operand.vmem [shape: f32[128,1], index: 1, kind: input, shape index: {}]   ;;  %s6437_s2 = inlined_call_operand.vmem [shape: f32[1,6], index: 2, kind: input, shape index: {}]   ;;  %s6438_s3 = inlined_call_operand.vmem [shape: f32[1,6], index: 3, kind: input, shape index: {}]   ;;  %s6439_s4 = inlined_call_operand.vmem [shape: f32[6,128], index: 4, kind: input, shape index: {}]   ;;  %s6440_s5 = inlined_call_operand.vmem [shape: f32[1,128], index: 5, kind: input, shape index: {}]   ;;  %s6441_s6 = inlined_call_operand.vmem [shape: f32[6,1], index: 6, kind: input, shape index: {}]   ;;  %s6442_s7 = inlined_call_operand.vmem [shape: f32[6,1], index: 7, kind: input, shape index: {}]   ;;  %s6443_s8 = inlined_call_operand.hbm [shape: f32[128,128], index: 8, kind: output, shape index: {}]  }
   0x1   :  { %v3841_v0 = vld [vmem:[%s6441_s6] sm:$0x3f]  ;;  %4446 = vset.pattern.permute.xlu0 %v4572_v2  ;;  %4447 = vset.pattern.permute.xlu1 %v4572_v2  ;;  %v4643_v7 = vld [vmem:[%s6436_s1 + $0x8] sm:$0xff] }
   0x2   :  { %v4633_v1 = vld [vmem:[%s6436_s1] sm:$0xff]  ;;  %3850 = vperm.xlu0 %4446, %v3841_v0   ;;  %v153_v9 = vand.u32 2147483647, %v4643_v7  ;;  %v156_v11 = vand.u32 2139095040, %v4643_v7 }
   0x3   :  { %v50_v3 = vand.u32 2147483647, %v4633_v1  ;;  %v53_v4 = vand.u32 2139095040, %v4633_v1  ;;  %v3854_v5 = vld [vmem:[%s6442_s7] sm:$0x3f] }
   0x4   :  { %v4652_v12 = vld [vmem:[%s6436_s1 + $0x40] sm:$0xff]  ;;  %v160_v13 = vand.u32 8388607, %v153_v9  ;;  %v157_v15 = vshrl.u32 %v156_v11, 23 }
   0x5   :  { %v54_v6 = vshrl.u32 %v53_v4, 23  ;;  %v57_v8 = vand.u32 8388607, %v50_v3  ;;  %v877_v18 = vand.u32 2139095040, %v4652_v12 }
   0x6   :  { %3863 = vperm.xlu0 %4446, %v3854_v5   ;;  %v161_v17 = vor.u32 8388608, %v160_v13  ;;  %v4172_v19 = vadd.s32 4294967169, %v157_v15 }
   0x7   :  { %v4168_v10 = vadd.s32 4294967169, %v54_v6  ;;  %v58_v16 = vor.u32 8388608, %v57_v8  ;;  %v878_v21 = vshrl.u32 %v877_v18, 23 }
   0x9   :  { %v60_v14 = vadd.s32 1, %v4168_v10 }
   0xb   :  { %vm61_vm0 = vcmp.gt.s32.totalorder %v60_v14, 0 }
   0xc   :  { %v62_v20 = vsel %vm61_vm0, %v60_v14, 0 }
   0xd   :  { %13 = vsyncpa [#allocation3], 0  ;;  %v63_v22 = vshrl.u32 %v62_v20, 5  ;;  %v64_v23 = vand.u32 31, %v62_v20  ;;  %v4657_v24 = vshll.u32 %v58_v16, 8  ;;  %v163_v25 = vadd.s32 1, %v4172_v19 }
   0xe   :  { %v4659_v26 = vshll.u32 %v161_v17, 8  ;;  %v874_v27 = vand.u32 2147483647, %v4652_v12  ;;  %v4573_v29 = vmov 683565275   ;;  %v4200_v39 = vadd.s32 4294967169, %v878_v21 }
   0xf   :  { %v65_v28 = vsub.s32 32, %v64_v23  ;;  %v67_v30 = vshll.u32 %v4573_v29, %v64_v23  ;;  %v4574_v31 = vmov 2475754826   ;;  %v4575_v33 = vmov 2131351028  }
  0x10   :  { %v70_v32 = vshll.u32 %v4574_v31, %v64_v23  ;;  %v73_v34 = vshll.u32 %v4575_v33, %v64_v23  ;;  %v4576_v35 = vmov 2102212464   ;;  %v4577_v37 = vmov 920167782  }
  0x11   :  { %v76_v36 = vshll.u32 %v4576_v35, %v64_v23  ;;  %v79_v38 = vshll.u32 %v4577_v37, %v64_v23  ;;  %vm82_vm1 = vcmp.lt.s32.totalorder %v63_v22, 1  ;;  %v66_v40 = vshrl.u32 %v4573_v29, %v65_v28 }
  0x12   :  { %v68_v41 = vshrl.u32 %v4574_v31, %v65_v28  ;;  %v71_v42 = vshrl.u32 %v4575_v33, %v65_v28  ;;  %v74_v43 = vshrl.u32 %v4576_v35, %v65_v28  ;;  %v77_v44 = vshrl.u32 %v4577_v37, %v65_v28 }
  0x13   :  { %v4578_v45 = vmov 1326507024   ;;  %vm83_vm2 = vcmp.lt.s32.totalorder %v63_v22, 2  ;;  %vm85_vm3 = vcmp.lt.s32.totalorder %v63_v22, 4  ;;  %vm164_vm4 = vcmp.gt.s32.totalorder %v163_v25, 0 }
  0x14   :  { %v80_v46 = vshrl.u32 %v4578_v45, %v65_v28  ;;  %v69_v47 = vor.u32 %v68_v41, %v67_v30  ;;  %v72_v48 = vor.u32 %v71_v42, %v70_v32  ;;  %v75_v49 = vor.u32 %v74_v43, %v73_v34 }
  0x15   :  { %v78_v50 = vor.u32 %v77_v44, %v76_v36  ;;  %vm84_vm5 = vcmp.lt.s32.totalorder %v63_v22, 3  ;;  %v165_v52 = vsel %vm164_vm4, %v163_v25, 0  ;;  %v884_v6 = vadd.s32 1, %v4200_v39 }
  0x16   :  { %v81_v51 = vor.u32 %v80_v46, %v79_v38  ;;  %v86_v53 = vsel %vm82_vm1, %v66_v40, %v69_v47  ;;  %v87_v54 = vsel %vm85_vm3, %v75_v49, 2102212464  ;;  %v90_v55 = vsel %vm82_vm1, %v69_v47, %v72_v48 }
  0x17   :  { %v94_v56 = vsel %vm82_vm1, %v72_v48, %v75_v49  ;;  %v88_v57 = vsel %vm84_vm5, %v72_v48, %v87_v54  ;;  %v91_v58 = vsel %vm85_vm3, %v78_v50, 920167782  ;;  %v166_v60 = vshrl.u32 %v165_v52, 5 }
  0x18   :  { %v95_v59 = vsel %vm85_vm3, %v81_v51, 1326507024  ;;  %v89_v61 = vsel %vm83_vm2, %v86_v53, %v88_v57  ;;  %v92_v62 = vsel %vm84_vm5, %v75_v49, %v91_v58  ;;  %v167_v0 = vand.u32 31, %v165_v52 }
  0x19   :  { %v96_v63 = vsel %vm84_vm5, %v78_v50, %v95_v59  ;;  %v93_v2 = vsel %vm83_vm2, %v90_v55, %v92_v62  ;;  %v105_v5 = vmul.u32 %v4657_v24, %v89_v61  ;;  %vm185_vm6 = vcmp.lt.s32.totalorder %v166_v60, 1 }
  0x1a   :  { %v97_v4 = vsel %vm83_vm2, %v94_v56, %v96_v63  ;;  %v4685_v11 = vmul.u32.u64.low %v4657_v24, %v93_v2  ;;  %v4686_v13 = vmul.u32.u64.high %v4657_v24, %v93_v2, %v4685_v11  ;;  %v168_v14 = vsub.s32 32, %v167_v0 }
  0x1b   :  { %v4681_v8 = vmul.u32.u64.low %v4657_v24, %v97_v4  ;;  %v4682_v10 = vmul.u32.u64.high %v4657_v24, %v97_v4, %v4681_v8  ;;  %v170_v15 = vshll.u32 %v4573_v29, %v167_v0  ;;  %v173_v16 = vshll.u32 %v4574_v31, %v167_v0 }
  0x1c   :  { %v176_v17 = vshll.u32 %v4575_v33, %v167_v0  ;;  %v179_v18 = vshll.u32 %v4576_v35, %v167_v0  ;;  %v182_v19 = vshll.u32 %v4577_v37, %v167_v0  ;;  %vm186_vm7 = vcmp.lt.s32.totalorder %v166_v60, 2 }
  0x1d   :  { %v169_v20 = vshrl.u32 %v4573_v29, %v168_v14  ;;  %v171_v21 = vshrl.u32 %v4574_v31, %v168_v14  ;;  %v174_v22 = vshrl.u32 %v4575_v33, %v168_v14  ;;  %v177_v23 = vshrl.u32 %v4576_v35, %v168_v14 }
  0x1e   :  { %vm107_vm8 = vc.u32 %v4682_v10, %v4685_v11  ;;  %v108_v24 = vadd.s32 1, %v4686_v13  ;;  %v180_v25 = vshrl.u32 %v4577_v37, %v168_v14  ;;  %vm187_vm9 = vcmp.lt.s32.totalorder %v166_v60, 3 }
  0x1f   :  { %v172_v28 = vor.u32 %v171_v21, %v170_v15  ;;  %v175_v30 = vor.u32 %v174_v22, %v173_v16  ;;  %v178_v32 = vor.u32 %v177_v23, %v176_v17  ;;  %v183_v34 = vshrl.u32 %v4578_v45, %v168_v14 }
  0x20   :  { %v109_v36 = vsel %vm107_vm8, %v108_v24, %v4686_v13  ;;  %v181_v38 = vor.u32 %v180_v25, %v179_v18  ;;  %vm188_vm10 = vcmp.lt.s32.totalorder %v166_v60, 4  ;;  %vm885_vm11 = vcmp.gt.s32.totalorder %v884_v6, 0 }
  0x21   :  { %v110_v39 = vadd.s32 %v109_v36, %v105_v5  ;;  %v184_v40 = vor.u32 %v183_v34, %v182_v19  ;;  %v189_v41 = vsel %vm185_vm6, %v169_v20, %v172_v28  ;;  %v190_v42 = vsel %vm188_vm10, %v178_v32, 2102212464 }
  0x22   :  { %v191_v43 = vsel %vm187_vm9, %v175_v30, %v190_v42  ;;  %v193_v44 = vsel %vm185_vm6, %v172_v28, %v175_v30  ;;  %v194_v46 = vsel %vm188_vm10, %v181_v38, 920167782  ;;  %v197_v47 = vsel %vm185_vm6, %v175_v30, %v178_v32 }
  0x23   :  { %v111_v48 = vadd.s32 536870912, %v110_v39  ;;  %v195_v49 = vsel %vm187_vm9, %v178_v32, %v194_v46  ;;  %v198_v50 = vsel %vm188_vm10, %v184_v40, 1326507024  ;;  %v881_v51 = vand.u32 8388607, %v874_v27 }
  0x24   :  { %v192_v52 = vsel %vm186_vm7, %v189_v41, %v191_v43  ;;  %v196_v53 = vsel %vm186_vm7, %v193_v44, %v195_v49  ;;  %v199_v54 = vsel %vm187_vm9, %v181_v38, %v198_v50  ;;  %v886_v55 = vsel %vm885_vm11, %v884_v6, 0 }
  0x25   :  { %v4715_v56 = vshrl.u32 %v111_v48, 30  ;;  %v200_v57 = vsel %vm186_vm7, %v197_v47, %v199_v54  ;;  %v4719_v58 = vmul.u32.u64.low %v4659_v26, %v196_v53  ;;  %v4720_v59 = vmul.u32.u64.high %v4659_v26, %v196_v53, %v4719_v58 }
  0x26   :  { %v4724_v61 = vmul.u32.u64.low %v4659_v26, %v200_v57  ;;  %v4725_v62 = vmul.u32.u64.high %v4659_v26, %v200_v57, %v4724_v61  ;;  %v888_v63 = vand.u32 31, %v886_v55  ;;  %v208_v2 = vmul.u32 %v4659_v26, %v192_v52  ;;  %v4739_v26 = vld [vmem:[%s6436_s1 + $0x10] sm:$0xff] }
  0x27   :  { %v113_v0 = vshll.u32 %v4715_v56, 30  ;;  %v211_v5 = vadd.s32 1, %v4720_v59  ;;  %v882_v6 = vor.u32 8388608, %v881_v51  ;;  %v887_v30 = vshrl.u32 %v886_v55, 5 }
  0x28   :  { %vm210_vm12 = vc.u32 %v4725_v62, %v4719_v58  ;;  %v889_v60 = vsub.s32 32, %v888_v63  ;;  %v891_v16 = vshll.u32 %v4573_v29, %v888_v63  ;;  %v894_v20 = vshll.u32 %v4574_v31, %v888_v63 }
  0x29   :  { %v114_v4 = vsub.s32 %v110_v39, %v113_v0  ;;  %v212_v13 = vsel %vm210_vm12, %v211_v5, %v4720_v59  ;;  %v4734_v17 = vshll.u32 %v882_v6, 8  ;;  %v897_v21 = vshll.u32 %v4575_v33, %v888_v63 }
  0x2a   :  { %v213_v14 = vadd.s32 %v212_v13, %v208_v2  ;;  %v892_v19 = vshrl.u32 %v4574_v31, %v889_v60  ;;  %v895_v23 = vshrl.u32 %v4575_v33, %v889_v60  ;;  %v898_v24 = vshrl.u32 %v4576_v35, %v889_v60 }
  0x2b   :  { %v116_v8 = vsub.s32 0, %v114_v4  ;;  %v900_v25 = vshll.u32 %v4576_v35, %v888_v63  ;;  %v901_v32 = vshrl.u32 %v4577_v37, %v889_v60  ;;  %v259_v34 = vand.u32 2139095040, %v4739_v26 }
  0x2c   :  { %v214_v18 = vadd.s32 536870912, %v213_v14  ;;  %vm52_vm13 = vcmp.lt.s32.totalorder %v4633_v1, 0  ;;  %v106_v36 = vadd.s32 %v4685_v11, %v4682_v10  ;;  %v136_v39 = vsub.s32 4, %v4715_v56 }
  0x2d   :  { %v4169_v15 = vmin.u32 %v116_v8, %v114_v4  ;;  %v890_v40 = vshrl.u32 %v4573_v29, %v889_v60  ;;  %v893_v42 = vor.u32 %v892_v19, %v891_v16  ;;  %v903_v43 = vshll.u32 %v4577_v37, %v888_v63 }
  0x2e   :  { %v4747_v28 = vshrl.u32 %v214_v18, 30  ;;  %v904_v44 = vshrl.u32 %v4578_v45, %v889_v60  ;;  %v896_v46 = vor.u32 %v895_v23, %v894_v20  ;;  %v899_v47 = vor.u32 %v898_v24, %v897_v21 }
  0x2f   :  { %v118_v22 = vclz %v4169_v15  ;;  %v902_v48 = vor.u32 %v901_v32, %v900_v25  ;;  %vm906_vm15 = vcmp.lt.s32.totalorder %v887_v30, 1  ;;  %vm909_vm0 = vcmp.lt.s32.totalorder %v887_v30, 4 }
  0x30   :  { %v216_v41 = vshll.u32 %v4747_v28, 30  ;;  %vm4763_vm1 = vcmp.le.f32.partialorder %v50_v3, 0.7853982  ;;  %v911_v53 = vsel %vm909_vm0, %v899_v47, 2102212464  ;;  %v905_v55 = vor.u32 %v904_v44, %v903_v43 }
  0x31   :  { %v4170_v38 = vadd.s32 4294967294, %v118_v22  ;;  %vm907_vm2 = vcmp.lt.s32.totalorder %v887_v30, 2  ;;  %vm908_vm3 = vcmp.lt.s32.totalorder %v887_v30, 3  ;;  %v914_v61 = vsel %vm906_vm15, %v893_v42, %v896_v46 }
  0x32   :  { %v4759_v50 = vsub.s32 %v213_v14, %v216_v41  ;;  %v915_v63 = vsel %vm909_vm0, %v902_v48, 920167782  ;;  %v910_v0 = vsel %vm906_vm15, %v890_v40, %v893_v42  ;;  %v912_v2 = vsel %vm908_vm3, %v896_v46, %v911_v53 }
  0x33   :  { %vm4171_vm14 = vcmp.lt.s32.totalorder %v4170_v38, 0  ;;  %v916_v60 = vsel %vm908_vm3, %v899_v47, %v915_v63  ;;  %v918_v8 = vsel %vm906_vm15, %v896_v46, %v899_v47  ;;  %v137_v13 = vsel %vm52_vm13, %v136_v39, %v4715_v56 }
  0x34   :  { %v121_v49 = vsel %vm4171_vm14, 0, %v4170_v38  ;;  %v219_v54 = vsub.s32 0, %v4759_v50  ;;  %vm155_vm4 = vcmp.lt.s32.totalorder %v4643_v7, 0  ;;  %v917_v15 = vsel %vm907_vm2, %v914_v61, %v916_v60 }
  0x35   :  { %v122_v11 = vsub.s32 32, %v121_v49  ;;  %v123_v51 = vshll.u32 %v114_v4, %v121_v49  ;;  %v126_v52 = vsub.s32 4294967266, %v121_v49  ;;  %v260_v4 = vshrl.u32 %v259_v34, 23 }
  0x36   :  { %v4173_v3 = vmin.u32 %v219_v54, %v4759_v50  ;;  %v919_v16 = vsel %vm909_vm0, %v905_v55, 1326507024  ;;  %v913_v20 = vsel %vm907_vm2, %v910_v0, %v912_v2  ;;  %vm4792_vm5 = vcmp.le.f32.partialorder %v153_v9, 0.7853982 }
  0x37   :  { %v124_v57 = vshrl.u32 %v106_v36, %v122_v11  ;;  %v127_v59 = vadd.s32 127, %v126_v52  ;;  %v920_v21 = vsel %vm908_vm3, %v902_v48, %v919_v16  ;;  %v256_v38 = vand.u32 2147483647, %v4739_v26  ;;  %v4842_v16 = vld [vmem:[%s6436_s1 + $0x48] sm:$0xff] }
  0x38   :  { %v221_v14 = vclz %v4173_v3  ;;  %v921_v23 = vsel %vm907_vm2, %v918_v8, %v920_v21  ;;  %v4786_v24 = vmul.u32.u64.low %v4734_v17, %v917_v15  ;;  %v4787_v25 = vmul.u32.u64.high %v4734_v17, %v917_v15, %v4786_v24 }
  0x39   :  { %v125_v5 = vor.u32 %v124_v57, %v123_v51  ;;  %v128_v6 = vshll.u32 %v127_v59, 23  ;;  %v4797_v34 = vmul.u32.u64.low %v4734_v17, %v921_v23  ;;  %v4798_v36 = vmul.u32.u64.high %v4734_v17, %v921_v23, %v4797_v34 }
  0x3a   :  { %v4174_v22 = vadd.s32 4294967294, %v221_v14  ;;  %v139_v30 = vsel %vm4763_vm1, 0, %v137_v13  ;;  %v209_v39 = vadd.s32 %v4719_v58, %v4725_v62  ;;  %v4176_v40 = vadd.s32 4294967169, %v260_v4 }
  0x3b   :  { %v129_v18 = vor.u32 4788187, %v128_v6  ;;  %v132_v19 = vcvt.s32.f32 %v125_v5  ;;  %v239_v9 = vsub.s32 4, %v4747_v28  ;;  %v929_v43 = vmul.u32 %v4734_v17, %v913_v20 }
  0x3c   :  { %vm4175_vm6 = vcmp.lt.s32.totalorder %v4174_v22, 0  ;;  %v932_v48 = vadd.s32 1, %v4787_v25  ;;  %v1791_v11 = vadd.s32 3, %v139_v30  ;;  %vm931_vm7 = vc.u32 %v4798_v36, %v4786_v24 }
  0x3d   :  { %v130_v56 = vand.u32 2147483647, %v129_v18  ;;  %v224_v42 = vsel %vm4175_vm6, 0, %v4174_v22  ;;  %v263_v58 = vand.u32 8388607, %v256_v38  ;;  %v266_v53 = vadd.s32 1, %v4176_v40 }
  0x3e   :  { %v225_v44 = vsub.s32 32, %v224_v42  ;;  %v226_v46 = vshll.u32 %v4759_v50, %v224_v42  ;;  %v229_v47 = vsub.s32 4294967266, %v224_v42  ;;  %v933_v52 = vsel %vm931_vm7, %v932_v48, %v4787_v25 }
  0x3f   :  { %v133_v41 = vmul.f32 %v132_v19, %v130_v56  ;;  %v4816_v50 = vand.u32 3, %v139_v30  ;;  %v240_v54 = vsel %vm155_vm4, %v239_v9, %v4747_v28  ;;  %v934_v55 = vadd.s32 %v933_v52, %v929_v43 }
  0x40   :  { %v227_v62 = vshrl.u32 %v209_v39, %v225_v44  ;;  %v230_v51 = vadd.s32 127, %v229_v47  ;;  %vm267_vm8 = vcmp.gt.s32.totalorder %v266_v53, 0  ;;  %v4824_v63 = vand.u32 3, %v1791_v11 }
  0x41   :  { %v134_v49 = vxor.u32 2147483648, %v133_v41  ;;  %v935_v3 = vadd.s32 536870912, %v934_v55  ;;  %v268_v0 = vsel %vm267_vm8, %v266_v53, 0  ;;  %v242_v5 = vsel %vm4792_vm5, 0, %v240_v54 }
  0x42   :  { %v228_v59 = vor.u32 %v227_v62, %v226_v46  ;;  %v231_v61 = vshll.u32 %v230_v51, 23  ;;  %v1895_v6 = vadd.s32 3, %v242_v5  ;;  %v264_v60 = vor.u32 8388608, %v263_v58 }
  0x43   :  { %v135_v17 = vsel %vm52_vm13, %v134_v49, %v133_v41  ;;  %v4828_v28 = vshrl.u32 %v935_v3, 30  ;;  %v4830_v10 = vand.u32 31, %v268_v0  ;;  %vm145_vm9 = vcmp.eq.s32.totalorder %v4816_v50, 0 }
  0x44   :  { %v138_v57 = vsel %vm4763_vm1, %v4633_v1, %v135_v17  ;;  %v232_v2 = vor.u32 4788187, %v231_v61  ;;  %v235_v4 = vcvt.s32.f32 %v228_v59  ;;  %vm144_vm10 = vcmp.lt.s32.totalorder %v4816_v50, 2 }
  0x45   :  { %4448 = vcosq.f32 %v138_v57  ;;  %vm148_vm11 = vcmp.eq.s32.totalorder %v4816_v50, 2  ;;  %v937_v13 = vshll.u32 %v4828_v28, 30  ;;  %v4836_v14 = vshrl.u32 %v268_v0, 5 }
  0x46   :  { %4450 = vsinq.f32 %v138_v57  ;;  %v233_v8 = vand.u32 2147483647, %v232_v2  ;;  %v271_v15 = vsub.s32 32, %v4830_v10  ;;  %vm142_vm12 = vweird.f32 %v4633_v1 }
  0x47   :  { %vm1793_vm13 = vcmp.lt.s32.totalorder %v4824_v63, 2  ;;  %vm1794_vm14 = vcmp.eq.s32.totalorder %v4824_v63, 0  ;;  %vm1797_vm15 = vcmp.eq.s32.totalorder %v4824_v63, 2  ;;  %v4848_v19 = vand.u32 3, %v242_v5 }
  0x48   :  { %v236_v18 = vmul.f32 %v235_v4, %v233_v8  ;;  %v4850_v20 = vsub.s32 %v934_v55, %v937_v13  ;;  %v4852_v21 = vand.u32 3, %v1895_v6  ;;  %v4854_v22 = vshll.u32 %v264_v60, 8 }
  0x49   :  { %v4858_v25 = vadd.s32 %v4786_v24, %v4798_v36  ;;  %v977_v56 = vand.u32 2147483647, %v4842_v16  ;;  %v980_v34 = vand.u32 2139095040, %v4842_v16  ;;  %v273_v39 = vshll.u32 %v4573_v29, %v4830_v10 }
  0x4a   :  { %v237_v23 = vxor.u32 2147483648, %v236_v18  ;;  %v940_v30 = vsub.s32 0, %v4850_v20  ;;  %v274_v40 = vshrl.u32 %v4574_v31, %v271_v15  ;;  %v276_v41 = vshll.u32 %v4574_v31, %v4830_v10 }
  0x4b   :  { %vm288_vm0 = vcmp.lt.s32.totalorder %v4836_v14, 1  ;;  %v277_v36 = vshrl.u32 %v4575_v33, %v271_v15  ;;  %v279_v42 = vshll.u32 %v4575_v33, %v4830_v10  ;;  %v280_v9 = vshrl.u32 %v4576_v35, %v271_v15 }
  0x4c   :  { %v238_v24 = vsel %vm155_vm4, %v237_v23, %v236_v18  ;;  %vm290_vm1 = vcmp.lt.s32.totalorder %v4836_v14, 3  ;;  %vm876_vm2 = vcmp.lt.s32.totalorder %v4652_v12, 0  ;;  %v4201_v46 = vmin.u32 %v940_v30, %v4850_v20 }
  0x4d   :  { %v241_v44 = vsel %vm4792_vm5, %v4643_v7, %v238_v24  ;;  %v282_v47 = vshll.u32 %v4576_v35, %v4830_v10  ;;  %v283_v48 = vshrl.u32 %v4577_v37, %v271_v15  ;;  %vm289_vm3 = vcmp.lt.s32.totalorder %v4836_v14, 2 }
  0x4e   :  { %4452 = vcosq.f32 %v241_v44  ;;  %v960_v58 = vsub.s32 4, %v4828_v28  ;;  %v272_v62 = vshrl.u32 %v4573_v29, %v271_v15  ;;  %v942_v51 = vclz %v4201_v46 }
  0x4f   :  { %v4449_v43 = vpop.eup %4448  ;;  %4454 = vsinq.f32 %v241_v44  ;;  %v275_v52 = vor.u32 %v274_v40, %v273_v39  ;;  %vm251_vm4 = vcmp.eq.s32.totalorder %v4848_v19, 2  ;;  %vm1901_vm5 = vcmp.eq.s32.totalorder %v4852_v21, 2 }
  0x50   :  { %v4451_v49 = vpop.eup %4450  ;;  %v149_v11 = vxor.u32 2147483648, %v4449_v43  ;;  %v278_v54 = vor.u32 %v277_v36, %v276_v41  ;;  %v281_v55 = vor.u32 %v280_v9, %v279_v42  ;;  %vm248_vm6 = vcmp.eq.s32.totalorder %v4848_v19, 0 }
  0x51   :  { %v146_v32 = vxor.u32 2147483648, %v4451_v49  ;;  %v4202_v61 = vadd.s32 4294967294, %v942_v51  ;;  %vm1898_vm7 = vcmp.eq.s32.totalorder %v4852_v21, 0  ;;  %v284_v3 = vor.u32 %v283_v48, %v282_v47 }
  0x52   :  { %v1799_v53 = vsel %vm1797_vm15, %v149_v11, %v4451_v49  ;;  %v150_v17 = vsel %vm148_vm11, %v149_v11, %v4451_v49  ;;  %vm247_vm8 = vcmp.lt.s32.totalorder %v4848_v19, 2  ;;  %vm1897_vm11 = vcmp.lt.s32.totalorder %v4852_v21, 2 }
  0x53   :  { %v1796_v57 = vsel %vm1794_vm14, %v4449_v43, %v146_v32  ;;  %v147_v59 = vsel %vm145_vm9, %v4449_v43, %v146_v32  ;;  %v285_v4 = vshll.u32 %v4577_v37, %v4830_v10  ;;  %v286_v5 = vshrl.u32 %v4578_v45, %v271_v15 }
  0x54   :  { %v1800_v0 = vsel %vm1793_vm13, %v1796_v57, %v1799_v53  ;;  %v151_v2 = vsel %vm144_vm10, %v147_v59, %v150_v17  ;;  %vm245_vm9 = vweird.f32 %v4643_v7  ;;  %vm4203_vm13 = vcmp.lt.s32.totalorder %v4202_v61, 0 }
  0x55   :  { %v1801_v6 = vsel %vm142_vm12, nan, %v1800_v0  ;;  %v152_v60 = vsel %vm142_vm12, nan, %v151_v2  ;;  %vm291_vm10 = vcmp.lt.s32.totalorder %v4836_v14, 4  ;;  %v945_v50 = vsel %vm4203_vm13, 0, %v4202_v61 }
  0x56   :  { %3484 = vperm.xlu0 %4446, %v1801_v6   ;;  %3381 = vperm.xlu1 %4447, %v152_v60   ;;  %v287_v63 = vor.u32 %v286_v5, %v285_v4  ;;  %v292_v10 = vsel %vm288_vm0, %v272_v62, %v275_v52  ;;  %v293_v8 = vsel %vm291_vm10, %v281_v55, 2102212464  ;;  %v946_v13 = vsub.s32 32, %v945_v50 }
  0x57   :  { %v947_v15 = vshll.u32 %v4850_v20, %v945_v50  ;;  %v950_v1 = vsub.s32 4294967266, %v945_v50  ;;  %v294_v18 = vsel %vm290_vm1, %v278_v54, %v293_v8  ;;  %v961_v23 = vsel %vm876_vm2, %v960_v58, %v4828_v28 }
  0x58   :  { %v296_v30 = vsel %vm288_vm0, %v275_v52, %v278_v54  ;;  %v297_v39 = vsel %vm291_vm10, %v284_v3, 920167782  ;;  %v300_v40 = vsel %vm288_vm0, %v278_v54, %v281_v55  ;;  %v948_v41 = vshrl.u32 %v4858_v25, %v946_v13  ;;  %v4453_v42 = vpop.eup %4452 }
  0x59   :  { %v951_v20 = vadd.s32 127, %v950_v1  ;;  %v298_v24 = vsel %vm290_vm1, %v281_v55, %v297_v39  ;;  %v301_v36 = vsel %vm291_vm10, %v287_v63, 1326507024  ;;  %v295_v28 = vsel %vm289_vm3, %v292_v10, %v294_v18  ;;  %v4455_v44 = vpop.eup %4454  ;;  %v4987_v63 = vld [vmem:[%s6436_s1 + $0x18] sm:$0xff] }
  0x5a   :  { %v299_v9 = vsel %vm289_vm3, %v296_v30, %v298_v24  ;;  %v302_v43 = vsel %vm290_vm1, %v284_v3, %v301_v36  ;;  %v981_v25 = vshrl.u32 %v980_v34, 23  ;;  %v252_v46 = vxor.u32 2147483648, %v4453_v42 }
  0x5b   :  { %v949_v47 = vor.u32 %v948_v41, %v947_v15  ;;  %v952_v48 = vshll.u32 %v951_v20, 23  ;;  %v303_v49 = vsel %vm289_vm3, %v300_v40, %v302_v43  ;;  %v249_v11 = vxor.u32 2147483648, %v4455_v44 }
  0x5c   :  { %v4946_v58 = vmul.u32.u64.low %v4854_v22, %v303_v49  ;;  %v4947_v62 = vmul.u32.u64.high %v4854_v22, %v303_v49, %v4946_v58  ;;  %v4204_v32 = vadd.s32 4294967169, %v981_v25  ;;  %v253_v51 = vsel %vm251_vm4, %v252_v46, %v4455_v44 }
  0x5d   :  { %v953_v52 = vor.u32 4788187, %v952_v48  ;;  %v956_v53 = vcvt.s32.f32 %v949_v47  ;;  %v1903_v34 = vsel %vm1901_vm5, %v252_v46, %v4455_v44  ;;  %v250_v17 = vsel %vm248_vm6, %v4453_v42, %v249_v11 }
  0x5e   :  { %v1900_v14 = vsel %vm1898_vm7, %v4453_v42, %v249_v11  ;;  %v4958_v54 = vmul.u32.u64.low %v4854_v22, %v299_v9  ;;  %v4959_v55 = vmul.u32.u64.high %v4854_v22, %v299_v9, %v4958_v54  ;;  %v254_v57 = vsel %vm247_vm8, %v250_v17, %v253_v51 }
  0x5f   :  { %vm4966_vm12 = vcmp.le.f32.partialorder %v874_v27, 0.7853982  ;;  %v954_v61 = vand.u32 2147483647, %v953_v52  ;;  %v1904_v3 = vsel %vm1897_vm11, %v1900_v14, %v1903_v34  ;;  %v255_v0 = vsel %vm245_vm9, nan, %v254_v57 }
  0x60   :  { %v963_v2 = vsel %vm4966_vm12, 0, %v961_v23  ;;  %3386 = vperm.xlu0 %4446, %v255_v0   ;;  %v311_v19 = vmul.u32 %v4854_v22, %v295_v28  ;;  %vm313_vm14 = vc.u32 %v4947_v62, %v4958_v54  ;;  %v987_v27 = vadd.s32 1, %v4204_v32 }
  0x61   :  { %v957_v4 = vmul.f32 %v956_v53, %v954_v61  ;;  %v1905_v5 = vsel %vm245_vm9, nan, %v1904_v3  ;;  %v2623_v6 = vadd.s32 3, %v963_v2  ;;  %v314_v21 = vadd.s32 1, %v4959_v55 }
  0x62   :  { %v984_v60 = vand.u32 8388607, %v977_v56  ;;  %vm988_vm15 = vcmp.gt.s32.totalorder %v987_v27, 0  ;;  %v4992_v8 = vand.u32 3, %v963_v2  ;;  %v362_v30 = vand.u32 2139095040, %v4987_v63 }
  0x63   :  { %v958_v50 = vxor.u32 2147483648, %v957_v4  ;;  %v315_v22 = vsel %vm313_vm14, %v314_v21, %v4959_v55  ;;  %v989_v10 = vsel %vm988_vm15, %v987_v27, 0  ;;  %v4997_v18 = vand.u32 3, %v2623_v6 }
  0x64   :  { %3489 = vperm.xlu0 %4446, %v1905_v5   ;;  %v316_v13 = vadd.s32 %v315_v22, %v311_v19  ;;  %v991_v15 = vand.u32 31, %v989_v10  ;;  %v985_v23 = vor.u32 8388608, %v984_v60  ;;  %v990_v28 = vshrl.u32 %v989_v10, 5 }
  0x65   :  { %v959_v7 = vsel %vm876_vm2, %v958_v50, %v957_v4  ;;  %vm969_vm0 = vcmp.eq.s32.totalorder %v4992_v8, 0  ;;  %vm968_vm1 = vcmp.lt.s32.totalorder %v4992_v8, 2  ;;  %vm972_vm2 = vcmp.eq.s32.totalorder %v4992_v8, 2 }
  0x66   :  { %v962_v1 = vsel %vm4966_vm12, %v4652_v12, %v959_v7  ;;  %v317_v39 = vadd.s32 536870912, %v316_v13  ;;  %v992_v40 = vsub.s32 32, %v991_v15  ;;  %v994_v41 = vshll.u32 %v4573_v29, %v991_v15 }
  0x67   :  { %4456 = vcosq.f32 %v962_v1  ;;  %v997_v20 = vshll.u32 %v4574_v31, %v991_v15  ;;  %v1000_v24 = vshll.u32 %v4575_v33, %v991_v15  ;;  %v1003_v36 = vshll.u32 %v4576_v35, %v991_v15 }
  0x68   :  { %4458 = vsinq.f32 %v962_v1  ;;  %v5004_v42 = vshrl.u32 %v317_v39, 30  ;;  %v995_v9 = vshrl.u32 %v4574_v31, %v992_v40  ;;  %v998_v43 = vshrl.u32 %v4575_v33, %v992_v40 }
  0x69   :  { %v1001_v25 = vshrl.u32 %v4576_v35, %v992_v40  ;;  %v1004_v44 = vshrl.u32 %v4577_v37, %v992_v40  ;;  %v1006_v46 = vshll.u32 %v4577_v37, %v991_v15  ;;  %v1007_v47 = vshrl.u32 %v4578_v45, %v992_v40 }
  0x6a   :  { %vm2625_vm3 = vcmp.lt.s32.totalorder %v4997_v18, 2  ;;  %v319_v48 = vshll.u32 %v5004_v42, 30  ;;  %v996_v49 = vor.u32 %v995_v9, %v994_v41  ;;  %vm966_vm4 = vweird.f32 %v4652_v12 }
  0x6b   :  { %v999_v11 = vor.u32 %v998_v43, %v997_v20  ;;  %v1002_v58 = vor.u32 %v1001_v25, %v1000_v24  ;;  %v1005_v32 = vor.u32 %v1004_v44, %v1003_v36  ;;  %v1008_v51 = vor.u32 %v1007_v47, %v1006_v46 }
  0x6c   :  { %v5018_v52 = vsub.s32 %v316_v13, %v319_v48  ;;  %vm1009_vm5 = vcmp.lt.s32.totalorder %v990_v28, 1  ;;  %vm1011_vm6 = vcmp.lt.s32.totalorder %v990_v28, 3  ;;  %v363_v53 = vshrl.u32 %v362_v30, 23 }
  0x6d   :  { %vm2626_vm7 = vcmp.eq.s32.totalorder %v4997_v18, 0  ;;  %v993_v34 = vshrl.u32 %v4573_v29, %v992_v40  ;;  %vm1012_vm8 = vcmp.lt.s32.totalorder %v990_v28, 4  ;;  %v1025_v17 = vshll.u32 %v985_v23, 8 }
  0x6e   :  { %vm258_vm11 = vcmp.lt.s32.totalorder %v4739_v26, 0  ;;  %v322_v14 = vsub.s32 0, %v5018_v52  ;;  %vm1010_vm9 = vcmp.lt.s32.totalorder %v990_v28, 2  ;;  %v1014_v55 = vsel %vm1012_vm8, %v1002_v58, 2102212464 }
  0x6f   :  { %v1018_v57 = vsel %vm1012_vm8, %v1005_v32, 920167782  ;;  %v1017_v59 = vsel %vm1009_vm5, %v996_v49, %v999_v11  ;;  %v1021_v3 = vsel %vm1009_vm5, %v999_v11, %v1002_v58  ;;  %v1022_v0 = vsel %vm1012_vm8, %v1008_v51, 1326507024 }
  0x70   :  { %v1019_v61 = vsel %vm1011_vm6, %v1002_v58, %v1018_v57  ;;  %vm2629_vm13 = vcmp.eq.s32.totalorder %v4997_v18, 2  ;;  %v4177_v4 = vmin.u32 %v322_v14, %v5018_v52  ;;  %v342_v19 = vsub.s32 4, %v5004_v42 }
  0x71   :  { %v4457_v2 = vpop.eup %4456  ;;  %v4180_v27 = vadd.s32 4294967169, %v363_v53  ;;  %v1013_v21 = vsel %vm1009_vm5, %v993_v34, %v996_v49  ;;  %v1015_v60 = vsel %vm1011_vm6, %v999_v11, %v1014_v55  ;;  %v1023_v50 = vsel %vm1011_vm6, %v1005_v32, %v1022_v0  ;;  %v5081_v55 = vld [vmem:[%s6436_s1 + $0x50] sm:$0xff] }
  0x72   :  { %v4459_v5 = vpop.eup %4458  ;;  %v973_v6 = vxor.u32 2147483648, %v4457_v2  ;;  %v324_v10 = vclz %v4177_v4  ;;  %v1020_v7 = vsel %vm1010_vm9, %v1017_v59, %v1019_v61  ;;  %v1024_v13 = vsel %vm1010_vm9, %v1021_v3, %v1023_v50 }
  0x73   :  { %v970_v22 = vxor.u32 2147483648, %v4459_v5  ;;  %v5037_v23 = vmul.u32.u64.low %v1025_v17, %v1024_v13  ;;  %v5038_v30 = vmul.u32.u64.high %v1025_v17, %v1024_v13, %v5037_v23  ;;  %v1016_v20 = vsel %vm1010_vm9, %v1013_v21, %v1015_v60 }
  0x74   :  { %v974_v15 = vsel %vm972_vm2, %v973_v6, %v4459_v5  ;;  %v2631_v1 = vsel %vm2629_vm13, %v973_v6, %v4459_v5  ;;  %v4178_v41 = vadd.s32 4294967294, %v324_v10  ;;  %v312_v44 = vadd.s32 %v4958_v54, %v4947_v62 }
  0x75   :  { %v971_v39 = vsel %vm969_vm0, %v4457_v2, %v970_v22  ;;  %v2628_v40 = vsel %vm2626_vm7, %v4457_v2, %v970_v22  ;;  %v5049_v9 = vmul.u32.u64.low %v1025_v17, %v1020_v7  ;;  %v5050_v43 = vmul.u32.u64.high %v1025_v17, %v1020_v7, %v5049_v9 }
  0x76   :  { %v975_v24 = vsel %vm968_vm1, %v971_v39, %v974_v15  ;;  %v2632_v36 = vsel %vm2625_vm3, %v2628_v40, %v2631_v1  ;;  %vm4179_vm10 = vcmp.lt.s32.totalorder %v4178_v41, 0  ;;  %v359_v28 = vand.u32 2147483647, %v4987_v63 }
  0x77   :  { %v976_v25 = vsel %vm966_vm4, nan, %v975_v24  ;;  %v2633_v8 = vsel %vm966_vm4, nan, %v2632_v36  ;;  %v327_v46 = vsel %vm4179_vm10, 0, %v4178_v41  ;;  %v343_v18 = vsel %vm258_vm11, %v342_v19, %v5004_v42 }
  0x78   :  { %3421 = vperm.xlu1 %4447, %v976_v25   ;;  %v1032_v47 = vmul.u32 %v1025_v17, %v1016_v20  ;;  %v328_v48 = vsub.s32 32, %v327_v46  ;;  %v329_v49 = vshll.u32 %v5018_v52, %v327_v46  ;;  %v332_v11 = vsub.s32 4294967266, %v327_v46 }
  0x79   :  { %vm1034_vm12 = vc.u32 %v5038_v30, %v5049_v9  ;;  %v1035_v62 = vadd.s32 1, %v5050_v43  ;;  %v369_v54 = vadd.s32 1, %v4180_v27  ;;  %vm5069_vm14 = vcmp.le.f32.partialorder %v256_v38, 0.7853982 }
  0x7a   :  { %v330_v58 = vshrl.u32 %v312_v44, %v328_v48  ;;  %v333_v32 = vadd.s32 127, %v332_v11  ;;  %v345_v42 = vsel %vm5069_vm14, 0, %v343_v18  ;;  %v366_v52 = vand.u32 8388607, %v359_v28 }
  0x7b   :  { %v1036_v51 = vsel %vm1034_vm12, %v1035_v62, %v5050_v43  ;;  %vm370_vm15 = vcmp.gt.s32.totalorder %v369_v54, 0  ;;  %v5083_v3 = vand.u32 3, %v345_v42  ;;  %v1080_v2 = vand.u32 2147483647, %v5081_v55 }
  0x7c   :  { %3524 = vperm.xlu1 %4447, %v2633_v8   ;;  %v331_v53 = vor.u32 %v330_v58, %v329_v49  ;;  %v334_v34 = vshll.u32 %v333_v32, 23  ;;  %v1037_v17 = vadd.s32 %v1036_v51, %v1032_v47  ;;  %v371_v14 = vsel %vm370_vm15, %v369_v54, 0 }
  0x7d   :  { %v373_v38 = vand.u32 31, %v371_v14  ;;  %v367_v27 = vor.u32 8388608, %v366_v52  ;;  %v1083_v5 = vand.u32 2139095040, %v5081_v55  ;;  %v1999_v15 = vadd.s32 3, %v345_v42 }
  0x7e   :  { %v335_v57 = vor.u32 4788187, %v334_v34  ;;  %v338_v59 = vcvt.s32.f32 %v331_v53  ;;  %v1038_v61 = vadd.s32 536870912, %v1037_v17  ;;  %v372_v1 = vshrl.u32 %v371_v14, 5 }
  0x7f   :  { %v374_v0 = vsub.s32 32, %v373_v38  ;;  %v376_v6 = vshll.u32 %v4573_v29, %v373_v38  ;;  %v379_v60 = vshll.u32 %v4574_v31, %v373_v38  ;;  %v385_v50 = vshll.u32 %v4576_v35, %v373_v38 }
  0x80   :  { %v336_v4 = vand.u32 2147483647, %v335_v57  ;;  %v5086_v19 = vshrl.u32 %v1038_v61, 30  ;;  %v382_v23 = vshll.u32 %v4575_v33, %v373_v38  ;;  %v388_v20 = vshll.u32 %v4577_v37, %v373_v38 }
  0x81   :  { %v377_v21 = vshrl.u32 %v4574_v31, %v374_v0  ;;  %v380_v7 = vshrl.u32 %v4575_v33, %v374_v0  ;;  %v386_v13 = vshrl.u32 %v4577_v37, %v374_v0  ;;  %v383_v39 = vshrl.u32 %v4576_v35, %v374_v0 }
  0x82   :  { %v339_v22 = vmul.f32 %v338_v59, %v336_v4  ;;  %v1040_v10 = vshll.u32 %v5086_v19, 30  ;;  %v389_v24 = vshrl.u32 %v4578_v45, %v374_v0  ;;  %v375_v36 = vshrl.u32 %v4573_v29, %v374_v0 }
  0x83   :  { %v378_v43 = vor.u32 %v377_v21, %v376_v6  ;;  %v5103_v25 = vshll.u32 %v367_v27, 8  ;;  %v1084_v44 = vshrl.u32 %v1083_v5, 23  ;;  %v381_v18 = vor.u32 %v380_v7, %v379_v60 }
  0x84   :  { %v340_v40 = vxor.u32 2147483648, %v339_v22  ;;  %v5098_v41 = vsub.s32 %v1037_v17, %v1040_v10  ;;  %v387_v47 = vor.u32 %v386_v13, %v385_v50  ;;  %v384_v49 = vor.u32 %v383_v39, %v382_v23 }
  0x85   :  { %vm391_vm0 = vcmp.lt.s32.totalorder %v372_v1, 1  ;;  %vm394_vm1 = vcmp.lt.s32.totalorder %v372_v1, 4  ;;  %v390_v62 = vor.u32 %v389_v24, %v388_v20  ;;  %vm392_vm2 = vcmp.lt.s32.totalorder %v372_v1, 2 }
  0x86   :  { %v341_v8 = vsel %vm258_vm11, %v340_v40, %v339_v22  ;;  %v1043_v46 = vsub.s32 0, %v5098_v41  ;;  %vm393_vm3 = vcmp.lt.s32.totalorder %v372_v1, 3  ;;  %v395_v54 = vsel %vm391_vm0, %v375_v36, %v378_v43 }
  0x87   :  { %v344_v48 = vsel %vm5069_vm14, %v4739_v26, %v341_v8  ;;  %v396_v58 = vsel %vm394_vm1, %v384_v49, 2102212464  ;;  %vm979_vm4 = vcmp.lt.s32.totalorder %v4842_v16, 0  ;;  %v399_v42 = vsel %vm391_vm0, %v378_v43, %v381_v18 }
  0x88   :  { %4460 = vcosq.f32 %v344_v48  ;;  %v4205_v11 = vmin.u32 %v1043_v46, %v5098_v41  ;;  %v397_v12 = vsel %vm393_vm3, %v381_v18, %v396_v58  ;;  %v400_v51 = vsel %vm394_vm1, %v387_v47, 920167782 }
  0x89   :  { %4462 = vsinq.f32 %v344_v48  ;;  %vm351_vm5 = vcmp.eq.s32.totalorder %v5083_v3, 0  ;;  %vm354_vm6 = vcmp.eq.s32.totalorder %v5083_v3, 2  ;;  %v1033_v52 = vadd.s32 %v5049_v9, %v5038_v30 }
  0x8a   :  { %v1045_v32 = vclz %v4205_v11  ;;  %v1063_v53 = vsub.s32 4, %v5086_v19  ;;  %v2000_v34 = vand.u32 3, %v1999_v15  ;;  %vm350_vm7 = vcmp.lt.s32.totalorder %v5083_v3, 2 }
  0x8b   :  { %v401_v14 = vsel %vm393_vm3, %v384_v49, %v400_v51  ;;  %v403_v38 = vsel %vm391_vm0, %v381_v18, %v384_v49  ;;  %v404_v57 = vsel %vm394_vm1, %v390_v62, 1326507024  ;;  %vm348_vm8 = vweird.f32 %v4739_v26 }
  0x8c   :  { %v4206_v17 = vadd.s32 4294967294, %v1045_v32  ;;  %v398_v59 = vsel %vm392_vm2, %v395_v54, %v397_v12  ;;  %v402_v61 = vsel %vm392_vm2, %v399_v42, %v401_v14  ;;  %v405_v30 = vsel %vm393_vm3, %v387_v47, %v404_v57 }
  0x8d   :  { %v4208_v9 = vadd.s32 4294967169, %v1084_v44  ;;  %v406_v0 = vsel %vm392_vm2, %v403_v38, %v405_v30  ;;  %v5133_v4 = vmul.u32.u64.low %v5103_v25, %v402_v61  ;;  %v5134_v27 = vmul.u32.u64.high %v5103_v25, %v402_v61, %v5133_v4 }
  0x8e   :  { %vm4207_vm11 = vcmp.lt.s32.totalorder %v4206_v17, 0  ;;  %vm5139_vm9 = vcmp.le.f32.partialorder %v977_v56, 0.7853982  ;;  %v5144_v21 = vmul.u32.u64.low %v5103_v25, %v406_v0  ;;  %v5145_v60 = vmul.u32.u64.high %v5103_v25, %v406_v0, %v5144_v21 }
  0x8f   :  { %v1048_v6 = vsel %vm4207_vm11, 0, %v4206_v17  ;;  %v1090_v50 = vadd.s32 1, %v4208_v9  ;;  %vm2001_vm13 = vcmp.lt.s32.totalorder %v2000_v34, 2  ;;  %vm2002_vm10 = vcmp.eq.s32.totalorder %v2000_v34, 0 }
  0x90   :  { %v1049_v22 = vsub.s32 32, %v1048_v6  ;;  %v1050_v10 = vshll.u32 %v5098_v41, %v1048_v6  ;;  %v1053_v7 = vsub.s32 4294967266, %v1048_v6  ;;  %vm2005_vm12 = vcmp.eq.s32.totalorder %v2000_v34, 2 }
  0x91   :  { %v414_v13 = vmul.u32 %v5103_v25, %v398_v59  ;;  %vm1091_vm14 = vcmp.gt.s32.totalorder %v1090_v50, 0  ;;  %v417_v23 = vadd.s32 1, %v5134_v27  ;;  %v1064_v24 = vsel %vm979_vm4, %v1063_v53, %v5086_v19 }
  0x92   :  { %v4461_v56 = vpop.eup %4460  ;;  %v1051_v15 = vshrl.u32 %v1033_v52, %v1049_v22  ;;  %v1054_v1 = vadd.s32 127, %v1053_v7  ;;  %v1092_v39 = vsel %vm1091_vm14, %v1090_v50, 0  ;;  %vm416_vm15 = vc.u32 %v5145_v60, %v5133_v4 }
  0x93   :  { %v4463_v40 = vpop.eup %4462  ;;  %v355_v20 = vxor.u32 2147483648, %v4461_v56  ;;  %v5157_v41 = vand.u32 8388607, %v1080_v2  ;;  %v418_v44 = vsel %vm416_vm15, %v417_v23, %v5134_v27  ;;  %v1094_v47 = vand.u32 31, %v1092_v39 }
  0x94   :  { %v352_v36 = vxor.u32 2147483648, %v4463_v40  ;;  %v1052_v43 = vor.u32 %v1051_v15, %v1050_v10  ;;  %v1055_v25 = vshll.u32 %v1054_v1, 23  ;;  %v419_v18 = vadd.s32 %v418_v44, %v414_v13 }
  0x95   :  { %v356_v8 = vsel %vm354_vm6, %v355_v20, %v4463_v40  ;;  %v2007_v46 = vsel %vm2005_vm12, %v355_v20, %v4463_v40  ;;  %v1095_v32 = vsub.s32 32, %v1094_v47  ;;  %v1066_v51 = vsel %vm5139_vm9, 0, %v1064_v24 }
  0x96   :  { %v353_v19 = vsel %vm351_vm5, %v4461_v56, %v352_v36  ;;  %v1056_v48 = vor.u32 4788187, %v1055_v25  ;;  %v1059_v49 = vcvt.s32.f32 %v1052_v43  ;;  %v2004_v11 = vsel %vm2002_vm10, %v4461_v56, %v352_v36 }
  0x97   :  { %v357_v62 = vsel %vm350_vm7, %v353_v19, %v356_v8  ;;  %v2008_v54 = vsel %vm2001_vm13, %v2004_v11, %v2007_v46  ;;  %v420_v58 = vadd.s32 536870912, %v419_v18  ;;  %v1097_v3 = vshll.u32 %v4573_v29, %v1094_v47 }
  0x98   :  { %v358_v12 = vsel %vm348_vm8, nan, %v357_v62  ;;  %v1057_v42 = vand.u32 2147483647, %v1056_v48  ;;  %v2009_v52 = vsel %vm348_vm8, nan, %v2008_v54  ;;  %v1098_v34 = vshrl.u32 %v4574_v31, %v1095_v32 }
  0x99   :  { %3391 = vperm.xlu0 %4446, %v358_v12   ;;  %v5175_v53 = vshrl.u32 %v420_v58, 30  ;;  %v1100_v17 = vshll.u32 %v4574_v31, %v1094_v47  ;;  %v1101_v38 = vshrl.u32 %v4575_v33, %v1095_v32  ;;  %v1103_v57 = vshll.u32 %v4575_v33, %v1094_v47 }
  0x9a   :  { %v1060_v14 = vmul.f32 %v1059_v49, %v1057_v42  ;;  %v1104_v59 = vshrl.u32 %v4576_v35, %v1095_v32  ;;  %v1093_v26 = vshrl.u32 %v1092_v39, 5  ;;  %v1106_v30 = vshll.u32 %v4576_v35, %v1094_v47 }
  0x9b   :  { %v422_v61 = vshll.u32 %v5175_v53, 30  ;;  %v5185_v0 = vand.u32 3, %v1066_v51  ;;  %v1088_v27 = vor.u32 8388608, %v5157_v41  ;;  %v1107_v6 = vshrl.u32 %v4577_v37, %v1095_v32  ;;  %v5204_v41 = vld [vmem:[%s6436_s1 + $0x20] sm:$0xff] }
  0x9c   :  { %v1061_v9 = vxor.u32 2147483648, %v1060_v14  ;;  %v2727_v21 = vadd.s32 3, %v1066_v51  ;;  %v1109_v22 = vshll.u32 %v4577_v37, %v1094_v47  ;;  %v1110_v10 = vshrl.u32 %v4578_v45, %v1095_v32 }
  0x9d   :  { %3494 = vperm.xlu0 %4446, %v2009_v52   ;;  %v5189_v50 = vsub.s32 %v419_v18, %v422_v61  ;;  %v1099_v13 = vor.u32 %v1098_v34, %v1097_v3  ;;  %v1102_v56 = vor.u32 %v1101_v38, %v1100_v17  ;;  %v1105_v15 = vor.u32 %v1104_v59, %v1103_v57 }
  0x9e   :  { %v1062_v7 = vsel %vm979_vm4, %v1061_v9, %v1060_v14  ;;  %v1108_v39 = vor.u32 %v1107_v6, %v1106_v30  ;;  %vm1112_vm0 = vcmp.lt.s32.totalorder %v1093_v26, 1  ;;  %v1096_v40 = vshrl.u32 %v4573_v29, %v1095_v32 }
  0x9f   :  { %v1065_v1 = vsel %vm5139_vm9, %v4842_v16, %v1062_v7  ;;  %v425_v23 = vsub.s32 0, %v5189_v50  ;;  %v1111_v20 = vor.u32 %v1110_v10, %v1109_v22  ;;  %vm1115_vm1 = vcmp.lt.s32.totalorder %v1093_v26, 4 }
  0xa0   :  { %4464 = vcosq.f32 %v1065_v1  ;;  %vm1114_vm2 = vcmp.lt.s32.totalorder %v1093_v26, 3  ;;  %vm361_vm3 = vcmp.lt.s32.totalorder %v4987_v63, 0  ;;  %vm1113_vm4 = vcmp.lt.s32.totalorder %v1093_v26, 2 }
  0xa1   :  { %4466 = vsinq.f32 %v1065_v1  ;;  %v4181_v24 = vmin.u32 %v425_v23, %v5189_v50  ;;  %v1117_v5 = vsel %vm1115_vm1, %v1105_v15, 2102212464  ;;  %v1120_v36 = vsel %vm1112_vm0, %v1099_v13, %v1102_v56 }
  0xa2   :  { %v1128_v43 = vshll.u32 %v1088_v27, 8  ;;  %v2728_v25 = vand.u32 3, %v2727_v21  ;;  %v1121_v8 = vsel %vm1115_vm1, %v1108_v39, 920167782  ;;  %v1124_v46 = vsel %vm1112_vm0, %v1102_v56, %v1105_v15 }
  0xa3   :  { %v427_v44 = vclz %v4181_v24  ;;  %vm1071_vm5 = vcmp.lt.s32.totalorder %v5185_v0, 2  ;;  %v1116_v18 = vsel %vm1112_vm0, %v1096_v40, %v1099_v13  ;;  %v1122_v47 = vsel %vm1114_vm2, %v1105_v15, %v1121_v8 }
  0xa4   :  { %v1125_v19 = vsel %vm1115_vm1, %v1111_v20, 1326507024  ;;  %v465_v48 = vand.u32 2139095040, %v5204_v41  ;;  %vm1069_vm6 = vweird.f32 %v4842_v16  ;;  %v1118_v11 = vsel %vm1114_vm2, %v1102_v56, %v1117_v5 }
  0xa5   :  { %v4182_v49 = vadd.s32 4294967294, %v427_v44  ;;  %v1123_v62 = vsel %vm1113_vm4, %v1120_v36, %v1122_v47  ;;  %v1126_v54 = vsel %vm1114_vm2, %v1108_v39, %v1125_v19  ;;  %v415_v58 = vadd.s32 %v5133_v4, %v5145_v60 }
  0xa6   :  { %v1127_v32 = vsel %vm1113_vm4, %v1124_v46, %v1126_v54  ;;  %v5223_v12 = vmul.u32.u64.low %v1128_v43, %v1123_v62  ;;  %v5224_v42 = vmul.u32.u64.high %v1128_v43, %v1123_v62, %v5223_v12  ;;  %vm5229_vm7 = vcmp.le.f32.partialorder %v359_v28, 0.7853982 }
  0xa7   :  { %vm4183_vm8 = vcmp.lt.s32.totalorder %v4182_v49, 0  ;;  %v445_v52 = vsub.s32 4, %v5175_v53  ;;  %v5234_v3 = vmul.u32.u64.low %v1128_v43, %v1127_v32  ;;  %v5235_v34 = vmul.u32.u64.high %v1128_v43, %v1127_v32, %v5234_v3 }
  0xa8   :  { %vm1072_vm11 = vcmp.eq.s32.totalorder %v5185_v0, 0  ;;  %vm1075_vm9 = vcmp.eq.s32.totalorder %v5185_v0, 2  ;;  %v430_v4 = vsel %vm4183_vm8, 0, %v4182_v49  ;;  %v1119_v60 = vsel %vm1113_vm4, %v1116_v18, %v1118_v11 }
  0xa9   :  { %v431_v17 = vsub.s32 32, %v430_v4  ;;  %v432_v14 = vshll.u32 %v5189_v50, %v430_v4  ;;  %v435_v28 = vsub.s32 4294967266, %v430_v4  ;;  %v466_v38 = vshrl.u32 %v465_v48, 23 }
  0xaa   :  { %v4465_v57 = vpop.eup %4464  ;;  %vm2729_vm13 = vcmp.lt.s32.totalorder %v2728_v25, 2  ;;  %vm2730_vm10 = vcmp.eq.s32.totalorder %v2728_v25, 0  ;;  %vm2733_vm12 = vcmp.eq.s32.totalorder %v2728_v25, 2  ;;  %v1138_v59 = vadd.s32 1, %v5224_v42 }
  0xab   :  { %v4467_v61 = vpop.eup %4466  ;;  %v1076_v30 = vxor.u32 2147483648, %v4465_v57  ;;  %v433_v9 = vshrl.u32 %v415_v58, %v431_v17  ;;  %v436_v27 = vadd.s32 127, %v435_v28  ;;  %v446_v26 = vsel %vm361_vm3, %v445_v52, %v5175_v53 }
  0xac   :  { %v1073_v6 = vxor.u32 2147483648, %v4467_v61  ;;  %v1135_v21 = vmul.u32 %v1128_v43, %v1119_v60  ;;  %vm1137_vm14 = vc.u32 %v5235_v34, %v5223_v12  ;;  %v4184_v50 = vadd.s32 4294967169, %v466_v38 }
  0xad   :  { %v1077_v22 = vsel %vm1075_vm9, %v1076_v30, %v4467_v61  ;;  %v2735_v10 = vsel %vm2733_vm12, %v1076_v30, %v4467_v61  ;;  %v434_v7 = vor.u32 %v433_v9, %v432_v14  ;;  %v437_v13 = vshll.u32 %v436_v27, 23  ;;  %v5293_v9 = vld [vmem:[%s6436_s1 + $0x58] sm:$0xff] }
  0xae   :  { %v1074_v56 = vsel %vm1072_vm11, %v4465_v57, %v1073_v6  ;;  %v2732_v15 = vsel %vm2730_vm10, %v4465_v57, %v1073_v6  ;;  %v1139_v1 = vsel %vm1137_vm14, %v1138_v59, %v5224_v42  ;;  %v472_v53 = vadd.s32 1, %v4184_v50 }
  0xaf   :  { %v1078_v23 = vsel %vm1071_vm5, %v1074_v56, %v1077_v22  ;;  %v2736_v39 = vsel %vm2729_vm13, %v2732_v15, %v2735_v10  ;;  %v438_v40 = vor.u32 4788187, %v437_v13  ;;  %v441_v20 = vcvt.s32.f32 %v434_v7 }
  0xb0   :  { %v1079_v24 = vsel %vm1069_vm6, nan, %v1078_v23  ;;  %v448_v5 = vsel %vm5229_vm7, 0, %v446_v26  ;;  %v1140_v36 = vadd.s32 %v1139_v1, %v1135_v21  ;;  %vm473_vm15 = vcmp.gt.s32.totalorder %v472_v53, 0 }
  0xb1   :  { %3426 = vperm.xlu1 %4447, %v1079_v24   ;;  %v439_v43 = vand.u32 2147483647, %v438_v40  ;;  %v2103_v44 = vadd.s32 3, %v448_v5  ;;  %v462_v8 = vand.u32 2147483647, %v5204_v41  ;;  %v474_v46 = vsel %vm473_vm15, %v472_v53, 0 }
  0xb2   :  { %v2737_v0 = vsel %vm1069_vm6, nan, %v2736_v39  ;;  %v1141_v25 = vadd.s32 536870912, %v1140_v36  ;;  %v476_v18 = vand.u32 31, %v474_v46  ;;  %v5263_v19 = vand.u32 3, %v448_v5 }
  0xb3   :  { %v442_v47 = vmul.f32 %v441_v20, %v439_v43  ;;  %v5267_v62 = vand.u32 3, %v2103_v44  ;;  %v469_v54 = vand.u32 8388607, %v462_v8  ;;  %v475_v58 = vshrl.u32 %v474_v46, 5 }
  0xb4   :  { %v5265_v48 = vshrl.u32 %v1141_v25, 30  ;;  %v477_v49 = vsub.s32 32, %v476_v18  ;;  %v479_v16 = vshll.u32 %v4573_v29, %v476_v18  ;;  %v482_v42 = vshll.u32 %v4574_v31, %v476_v18 }
  0xb5   :  { %3529 = vperm.xlu1 %4447, %v2737_v0   ;;  %v443_v11 = vxor.u32 2147483648, %v442_v47  ;;  %v485_v52 = vshll.u32 %v4575_v33, %v476_v18  ;;  %v488_v17 = vshll.u32 %v4576_v35, %v476_v18  ;;  %v491_v59 = vshll.u32 %v4577_v37, %v476_v18 }
  0xb6   :  { %v1143_v32 = vshll.u32 %v5265_v48, 30  ;;  %v480_v4 = vshrl.u32 %v4574_v31, %v477_v49  ;;  %v483_v60 = vshrl.u32 %v4575_v33, %v477_v49  ;;  %v486_v38 = vshrl.u32 %v4576_v35, %v477_v49 }
  0xb7   :  { %v444_v3 = vsel %vm361_vm3, %v443_v11, %v442_v47  ;;  %v489_v57 = vshrl.u32 %v4577_v37, %v477_v49  ;;  %v478_v30 = vshrl.u32 %v4573_v29, %v477_v49  ;;  %vm457_vm0 = vcmp.eq.s32.totalorder %v5263_v19, 2 }
  0xb8   :  { %v447_v14 = vsel %vm5229_vm7, %v4987_v63, %v444_v3  ;;  %v5283_v28 = vsub.s32 %v1140_v36, %v1143_v32  ;;  %vm2109_vm1 = vcmp.eq.s32.totalorder %v5267_v62, 2  ;;  %v470_v51 = vor.u32 8388608, %v469_v54 }
  0xb9   :  { %4468 = vcosq.f32 %v447_v14  ;;  %v481_v27 = vor.u32 %v480_v4, %v479_v16  ;;  %v484_v26 = vor.u32 %v483_v60, %v482_v42  ;;  %v492_v6 = vshrl.u32 %v4578_v45, %v477_v49 }
  0xba   :  { %4470 = vsinq.f32 %v447_v14  ;;  %v1146_v61 = vsub.s32 0, %v5283_v28  ;;  %vm454_vm2 = vcmp.eq.s32.totalorder %v5263_v19, 0  ;;  %vm2106_vm3 = vcmp.eq.s32.totalorder %v5267_v62, 0 }
  0xbb   :  { %v487_v50 = vor.u32 %v486_v38, %v485_v52  ;;  %v490_v22 = vor.u32 %v489_v57, %v488_v17  ;;  %vm494_vm4 = vcmp.lt.s32.totalorder %v475_v58, 1  ;;  %vm453_vm5 = vcmp.lt.s32.totalorder %v5263_v19, 2 }
  0xbc   :  { %v4209_v21 = vmin.u32 %v1146_v61, %v5283_v28  ;;  %v1136_v10 = vadd.s32 %v5223_v12, %v5235_v34  ;;  %vm2105_vm6 = vcmp.lt.s32.totalorder %v5267_v62, 2  ;;  %v493_v7 = vor.u32 %v492_v6, %v491_v59 }
  0xbd   :  { %vm497_vm7 = vcmp.lt.s32.totalorder %v475_v58, 4  ;;  %v1186_v13 = vand.u32 2139095040, %v5293_v9  ;;  %vm451_vm8 = vweird.f32 %v4987_v63  ;;  %vm496_vm11 = vcmp.lt.s32.totalorder %v475_v58, 3 }
  0xbe   :  { %v1148_v56 = vclz %v4209_v21  ;;  %v498_v15 = vsel %vm494_vm4, %v478_v30, %v481_v27  ;;  %v499_v1 = vsel %vm497_vm7, %v487_v50, 2102212464  ;;  %vm495_vm9 = vcmp.lt.s32.totalorder %v475_v58, 2 }
  0xbf   :  { %v500_v53 = vsel %vm496_vm11, %v484_v26, %v499_v1  ;;  %v502_v23 = vsel %vm494_vm4, %v481_v27, %v484_v26  ;;  %v510_v12 = vshll.u32 %v470_v51, 8  ;;  %v503_v40 = vsel %vm497_vm7, %v490_v22, 920167782 }
  0xc0   :  { %v4210_v34 = vadd.s32 4294967294, %v1148_v56  ;;  %v501_v39 = vsel %vm495_vm9, %v498_v15, %v500_v53  ;;  %v506_v20 = vsel %vm494_vm4, %v484_v26, %v487_v50  ;;  %v1166_v24 = vsub.s32 4, %v5265_v48 }
  0xc1   :  { %v504_v5 = vsel %vm496_vm11, %v487_v50, %v503_v40  ;;  %v507_v36 = vsel %vm497_vm7, %v493_v7, 1326507024  ;;  %v1187_v43 = vshrl.u32 %v1186_v13, 23  ;;  %v517_v0 = vmul.u32 %v510_v12, %v501_v39 }
  0xc2   :  { %vm4211_vm13 = vcmp.lt.s32.totalorder %v4210_v34, 0  ;;  %v505_v44 = vsel %vm495_vm9, %v502_v23, %v504_v5  ;;  %v508_v46 = vsel %vm496_vm11, %v490_v22, %v507_v36  ;;  %vm1082_vm10 = vcmp.lt.s32.totalorder %v5081_v55, 0 }
  0xc3   :  { %v4469_v25 = vpop.eup %4468  ;;  %v1151_v18 = vsel %vm4211_vm13, 0, %v4210_v34  ;;  %v509_v47 = vsel %vm495_vm9, %v506_v20, %v508_v46  ;;  %v5320_v49 = vmul.u32.u64.low %v510_v12, %v505_v44  ;;  %v5321_v11 = vmul.u32.u64.high %v510_v12, %v505_v44, %v5320_v49 }
  0xc4   :  { %v4471_v54 = vpop.eup %4470  ;;  %v458_v32 = vxor.u32 2147483648, %v4469_v25  ;;  %v1152_v16 = vsub.s32 32, %v1151_v18  ;;  %v1153_v42 = vshll.u32 %v5283_v28, %v1151_v18  ;;  %v1156_v52 = vsub.s32 4294967266, %v1151_v18 }
  0xc5   :  { %v455_v3 = vxor.u32 2147483648, %v4471_v54  ;;  %v5325_v4 = vmul.u32.u64.low %v510_v12, %v509_v47  ;;  %v5326_v60 = vmul.u32.u64.high %v510_v12, %v509_v47, %v5325_v4  ;;  %v4212_v17 = vadd.s32 4294967169, %v1187_v43 }
  0xc6   :  { %v459_v14 = vsel %vm457_vm0, %v458_v32, %v4471_v54  ;;  %v1154_v58 = vshrl.u32 %v1136_v10, %v1152_v16  ;;  %v1157_v38 = vadd.s32 127, %v1156_v52  ;;  %v2111_v57 = vsel %vm2109_vm1, %v458_v32, %v4471_v54 }
  0xc7   :  { %v456_v59 = vsel %vm454_vm2, %v4469_v25, %v455_v3  ;;  %v2108_v28 = vsel %vm2106_vm3, %v4469_v25, %v455_v3  ;;  %v520_v61 = vadd.s32 1, %v5321_v11  ;;  %v1193_v30 = vadd.s32 1, %v4212_v17 }
  0xc8   :  { %v460_v51 = vsel %vm453_vm5, %v456_v59, %v459_v14  ;;  %v1155_v27 = vor.u32 %v1154_v58, %v1153_v42  ;;  %v1158_v26 = vshll.u32 %v1157_v38, 23  ;;  %v2112_v6 = vsel %vm2105_vm6, %v2108_v28, %v2111_v57  ;;  %v5390_v58 = vld [vmem:[%s6436_s1 + $0x28] sm:$0xff] }
  0xc9   :  { %v461_v21 = vsel %vm451_vm8, nan, %v460_v51  ;;  %vm519_vm12 = vc.u32 %v5326_v60, %v5320_v49  ;;  %v1183_v50 = vand.u32 2147483647, %v5293_v9  ;;  %vm1194_vm14 = vcmp.gt.s32.totalorder %v1193_v30, 0 }
  0xca   :  { %3396 = vperm.xlu0 %4446, %v461_v21   ;;  %v1159_v22 = vor.u32 4788187, %v1158_v26  ;;  %v1162_v10 = vcvt.s32.f32 %v1155_v27  ;;  %v521_v19 = vsel %vm519_vm12, %v520_v61, %v5321_v11  ;;  %v1167_v62 = vsel %vm1082_vm10, %v1166_v24, %v5265_v48 }
  0xcb   :  { %v2113_v7 = vsel %vm451_vm8, nan, %v2112_v6  ;;  %v522_v13 = vadd.s32 %v521_v19, %v517_v0  ;;  %v1195_v56 = vsel %vm1194_vm14, %v1193_v30, 0  ;;  %vm5355_vm15 = vcmp.le.f32.partialorder %v1080_v2, 0.7853982 }
  0xcc   :  { %v1160_v15 = vand.u32 2147483647, %v1159_v22  ;;  %v1197_v1 = vand.u32 31, %v1195_v56  ;;  %v1190_v12 = vand.u32 8388607, %v1183_v50  ;;  %v1169_v48 = vsel %vm5355_vm15, 0, %v1167_v62 }
  0xcd   :  { %v523_v23 = vadd.s32 536870912, %v522_v13  ;;  %v5363_v63 = vshrl.u32 %v1195_v56, 5  ;;  %v5379_v11 = vand.u32 3, %v1169_v48  ;;  %v2831_v54 = vadd.s32 3, %v1169_v48 }
  0xce   :  { %v1163_v34 = vmul.f32 %v1162_v10, %v1160_v15  ;;  %3499 = vperm.xlu0 %4446, %v2113_v7   ;;  %v1198_v39 = vsub.s32 32, %v1197_v1  ;;  %v1200_v20 = vshll.u32 %v4573_v29, %v1197_v1  ;;  %v1203_v2 = vshll.u32 %v4574_v31, %v1197_v1 }
  0xcf   :  { %v5365_v40 = vshrl.u32 %v523_v23, 30  ;;  %v1206_v24 = vshll.u32 %v4575_v33, %v1197_v1  ;;  %v1209_v44 = vshll.u32 %v4576_v35, %v1197_v1  ;;  %v1212_v18 = vshll.u32 %v4577_v37, %v1197_v1 }
  0xd0   :  { %v1164_v5 = vxor.u32 2147483648, %v1163_v34  ;;  %v1201_v36 = vshrl.u32 %v4574_v31, %v1198_v39  ;;  %v1204_v43 = vshrl.u32 %v4575_v33, %v1198_v39  ;;  %v1207_v0 = vshrl.u32 %v4576_v35, %v1198_v39 }
  0xd1   :  { %v525_v46 = vshll.u32 %v5365_v40, 30  ;;  %v1210_v25 = vshrl.u32 %v4577_v37, %v1198_v39  ;;  %v1213_v32 = vshrl.u32 %v4578_v45, %v1198_v39  ;;  %v1191_v52 = vor.u32 8388608, %v1190_v12 }
  0xd2   :  { %v1165_v47 = vsel %vm1082_vm10, %v1164_v5, %v1163_v34  ;;  %v1202_v3 = vor.u32 %v1201_v36, %v1200_v20  ;;  %v1205_v4 = vor.u32 %v1204_v43, %v1203_v2  ;;  %v1208_v17 = vor.u32 %v1207_v0, %v1206_v24 }
  0xd3   :  { %v1168_v16 = vsel %vm5355_vm15, %v5081_v55, %v1165_v47  ;;  %v5385_v42 = vsub.s32 %v522_v13, %v525_v46  ;;  %v1211_v14 = vor.u32 %v1210_v25, %v1209_v44  ;;  %vm464_vm0 = vcmp.lt.s32.totalorder %v5204_v41, 0 }
  0xd4   :  { %4472 = vcosq.f32 %v1168_v16  ;;  %v1214_v57 = vor.u32 %v1213_v32, %v1212_v18  ;;  %vm1215_vm1 = vcmp.lt.s32.totalorder %v5363_v63, 1  ;;  %v2832_v59 = vand.u32 3, %v2831_v54 }
  0xd5   :  { %4474 = vsinq.f32 %v1168_v16  ;;  %v528_v38 = vsub.s32 0, %v5385_v42  ;;  %v1199_v28 = vshrl.u32 %v4573_v29, %v1198_v39  ;;  %vm1217_vm2 = vcmp.lt.s32.totalorder %v5363_v63, 3 }
  0xd6   :  { %vm1218_vm3 = vcmp.lt.s32.totalorder %v5363_v63, 4  ;;  %vm1175_vm4 = vcmp.eq.s32.totalorder %v5379_v11, 0  ;;  %vm1216_vm5 = vcmp.lt.s32.totalorder %v5363_v63, 2  ;;  %v1231_v30 = vshll.u32 %v1191_v52, 8 }
  0xd7   :  { %v4185_v61 = vmin.u32 %v528_v38, %v5385_v42  ;;  %v568_v51 = vand.u32 2139095040, %v5390_v58  ;;  %vm1174_vm6 = vcmp.lt.s32.totalorder %v5379_v11, 2  ;;  %v1220_v27 = vsel %vm1218_vm3, %v1208_v17, 2102212464 }
  0xd8   :  { %v1223_v26 = vsel %vm1215_vm1, %v1202_v3, %v1205_v4  ;;  %v1224_v6 = vsel %vm1218_vm3, %v1211_v14, 920167782  ;;  %v1227_v21 = vsel %vm1215_vm1, %v1205_v4, %v1208_v17  ;;  %vm1172_vm7 = vweird.f32 %v5081_v55 }
  0xd9   :  { %v530_v22 = vclz %v4185_v61  ;;  %v548_v10 = vsub.s32 4, %v5365_v40  ;;  %v1225_v19 = vsel %vm1217_vm2, %v1208_v17, %v1224_v6  ;;  %v1228_v62 = vsel %vm1218_vm3, %v1214_v57, 1326507024 }
  0xda   :  { %v1219_v7 = vsel %vm1215_vm1, %v1199_v28, %v1202_v3  ;;  %v1221_v13 = vsel %vm1217_vm2, %v1205_v4, %v1220_v27  ;;  %v1226_v56 = vsel %vm1216_vm5, %v1223_v26, %v1225_v19  ;;  %v1229_v15 = vsel %vm1217_vm2, %v1211_v14, %v1228_v62 }
  0xdb   :  { %v4186_v1 = vadd.s32 4294967294, %v530_v22  ;;  %v1230_v53 = vsel %vm1216_vm5, %v1227_v21, %v1229_v15  ;;  %v5421_v23 = vmul.u32.u64.low %v1231_v30, %v1226_v56  ;;  %v5422_v12 = vmul.u32.u64.high %v1231_v30, %v1226_v56, %v5421_v23 }
  0xdc   :  { %vm1178_vm8 = vcmp.eq.s32.totalorder %v5379_v11, 2  ;;  %vm2833_vm11 = vcmp.lt.s32.totalorder %v2832_v59, 2  ;;  %v5426_v34 = vmul.u32.u64.low %v1231_v30, %v1230_v53  ;;  %v5427_v48 = vmul.u32.u64.high %v1231_v30, %v1230_v53, %v5426_v34 }
  0xdd   :  { %vm2834_vm9 = vcmp.eq.s32.totalorder %v2832_v59, 0  ;;  %v518_v39 = vadd.s32 %v5320_v49, %v5326_v60  ;;  %vm4187_vm13 = vcmp.lt.s32.totalorder %v4186_v1, 0  ;;  %v1222_v20 = vsel %vm1216_vm5, %v1219_v7, %v1221_v13 }
  0xde   :  { %v4473_v2 = vpop.eup %4472  ;;  %vm2837_vm10 = vcmp.eq.s32.totalorder %v2832_v59, 2  ;;  %v533_v24 = vsel %vm4187_vm13, 0, %v4186_v1  ;;  %v549_v5 = vsel %vm464_vm0, %v548_v10, %v5365_v40  ;;  %v569_v36 = vshrl.u32 %v568_v51, 23 }
  0xdf   :  { %v4475_v43 = vpop.eup %4474  ;;  %v1179_v44 = vxor.u32 2147483648, %v4473_v2  ;;  %v534_v46 = vsub.s32 32, %v533_v24  ;;  %v535_v0 = vshll.u32 %v5385_v42, %v533_v24  ;;  %v538_v25 = vsub.s32 4294967266, %v533_v24 }
  0xe0   :  { %v1176_v18 = vxor.u32 2147483648, %v4475_v43  ;;  %v1238_v49 = vmul.u32 %v1231_v30, %v1222_v20  ;;  %vm1240_vm12 = vc.u32 %v5427_v48, %v5421_v23  ;;  %v1241_v60 = vadd.s32 1, %v5422_v12 }
  0xe1   :  { %v1180_v63 = vsel %vm1178_vm8, %v1179_v44, %v4475_v43  ;;  %v2839_v47 = vsel %vm2837_vm10, %v1179_v44, %v4475_v43  ;;  %v536_v54 = vshrl.u32 %v518_v39, %v534_v46  ;;  %v539_v40 = vadd.s32 127, %v538_v25  ;;  %v5479_v39 = vld [vmem:[%s6436_s1 + $0x60] sm:$0xff] }
  0xe2   :  { %v1177_v32 = vsel %vm1175_vm4, %v4473_v2, %v1176_v18  ;;  %v2836_v16 = vsel %vm2834_vm9, %v4473_v2, %v1176_v18  ;;  %v1242_v42 = vsel %vm1240_vm12, %v1241_v60, %v5422_v12  ;;  %v4188_v52 = vadd.s32 4294967169, %v569_v36 }
  0xe3   :  { %v1181_v3 = vsel %vm1174_vm6, %v1177_v32, %v1180_v63  ;;  %v2840_v4 = vsel %vm2833_vm11, %v2836_v16, %v2839_v47  ;;  %v537_v17 = vor.u32 %v536_v54, %v535_v0  ;;  %v540_v14 = vshll.u32 %v539_v40, 23 }
  0xe4   :  { %v1182_v38 = vsel %vm1172_vm7, nan, %v1181_v3  ;;  %v1243_v57 = vadd.s32 %v1242_v42, %v1238_v49  ;;  %v565_v28 = vand.u32 2147483647, %v5390_v58  ;;  %v575_v61 = vadd.s32 1, %v4188_v52 }
  0xe5   :  { %3431 = vperm.xlu1 %4447, %v1182_v38   ;;  %vm5454_vm14 = vcmp.le.f32.partialorder %v462_v8, 0.7853982  ;;  %v541_v11 = vor.u32 4788187, %v540_v14  ;;  %v544_v51 = vcvt.s32.f32 %v537_v17  ;;  %v2841_v59 = vsel %vm1172_vm7, nan, %v2840_v4 }
  0xe6   :  { %v551_v27 = vsel %vm5454_vm14, 0, %v549_v5  ;;  %v1244_v26 = vadd.s32 536870912, %v1243_v57  ;;  %vm576_vm15 = vcmp.gt.s32.totalorder %v575_v61, 0  ;;  %v572_v8 = vand.u32 8388607, %v565_v28 }
  0xe7   :  { %v542_v6 = vand.u32 2147483647, %v541_v11  ;;  %v2207_v21 = vadd.s32 3, %v551_v27  ;;  %v577_v22 = vsel %vm576_vm15, %v575_v61, 0  ;;  %v5467_v56 = vand.u32 3, %v551_v27 }
  0xe8   :  { %v5462_v10 = vshrl.u32 %v1244_v26, 30  ;;  %v579_v19 = vand.u32 31, %v577_v22  ;;  %v573_v53 = vor.u32 8388608, %v572_v8  ;;  %v5473_v12 = vshrl.u32 %v577_v22, 5 }
  0xe9   :  { %3534 = vperm.xlu1 %4447, %v2841_v59   ;;  %v545_v62 = vmul.f32 %v544_v51, %v542_v6  ;;  %v5469_v15 = vand.u32 3, %v2207_v21  ;;  %v1239_v0 = vadd.s32 %v5421_v23, %v5427_v48  ;;  %v1289_v18 = vand.u32 2139095040, %v5479_v39 }
  0xea   :  { %v1246_v7 = vshll.u32 %v5462_v10, 30  ;;  %v580_v55 = vsub.s32 32, %v579_v19  ;;  %v582_v34 = vshll.u32 %v4573_v29, %v579_v19  ;;  %v585_v24 = vshll.u32 %v4574_v31, %v579_v19 }
  0xeb   :  { %v546_v13 = vxor.u32 2147483648, %v545_v62  ;;  %v588_v44 = vshll.u32 %v4575_v33, %v579_v19  ;;  %v591_v25 = vshll.u32 %v4576_v35, %v579_v19  ;;  %v5499_v63 = vshll.u32 %v573_v53, 8 }
  0xec   :  { %v5471_v1 = vsub.s32 %v1243_v57, %v1246_v7  ;;  %v583_v2 = vshrl.u32 %v4574_v31, %v580_v55  ;;  %v586_v5 = vshrl.u32 %v4575_v33, %v580_v55  ;;  %v589_v46 = vshrl.u32 %v4576_v35, %v580_v55 }
  0xed   :  { %v547_v20 = vsel %vm464_vm0, %v546_v13, %v545_v62  ;;  %vm1185_vm0 = vcmp.lt.s32.totalorder %v5293_v9, 0  ;;  %v581_v60 = vshrl.u32 %v4573_v29, %v580_v55  ;;  %vm560_vm1 = vcmp.eq.s32.totalorder %v5467_v56, 2 }
  0xee   :  { %v550_v36 = vsel %vm5454_vm14, %v5204_v41, %v547_v20  ;;  %v1249_v43 = vsub.s32 0, %v5471_v1  ;;  %vm2213_vm2 = vcmp.eq.s32.totalorder %v5469_v15, 2  ;;  %v584_v47 = vor.u32 %v583_v2, %v582_v34 }
  0xef   :  { %4476 = vcosq.f32 %v550_v36  ;;  %v587_v54 = vor.u32 %v586_v5, %v585_v24  ;;  %v592_v23 = vshrl.u32 %v4577_v37, %v580_v55  ;;  %v594_v48 = vshll.u32 %v4577_v37, %v579_v19 }
  0xf0   :  { %4478 = vsinq.f32 %v550_v36  ;;  %v4213_v49 = vmin.u32 %v1249_v43, %v5471_v1  ;;  %vm557_vm3 = vcmp.eq.s32.totalorder %v5467_v56, 0  ;;  %vm2210_vm4 = vcmp.eq.s32.totalorder %v5469_v15, 0 }
  0xf1   :  { %v590_v32 = vor.u32 %v589_v46, %v588_v44  ;;  %v595_v16 = vshrl.u32 %v4578_v45, %v580_v55  ;;  %vm597_vm5 = vcmp.lt.s32.totalorder %v5473_v12, 1  ;;  %vm556_vm6 = vcmp.lt.s32.totalorder %v5467_v56, 2 }
  0xf2   :  { %v1251_v40 = vclz %v4213_v49  ;;  %v1269_v42 = vsub.s32 4, %v5462_v10  ;;  %vm2209_vm7 = vcmp.lt.s32.totalorder %v5469_v15, 2  ;;  %v593_v52 = vor.u32 %v592_v23, %v591_v25 }
  0xf3   :  { %vm598_vm8 = vcmp.lt.s32.totalorder %v5473_v12, 2  ;;  %v1290_v3 = vshrl.u32 %v1289_v18, 23  ;;  %vm554_vm11 = vweird.f32 %v5204_v41  ;;  %v596_v17 = vor.u32 %v595_v16, %v594_v48 }
  0xf4   :  { %v4214_v4 = vadd.s32 4294967294, %v1251_v40  ;;  %vm599_vm9 = vcmp.lt.s32.totalorder %v5473_v12, 3  ;;  %vm600_vm13 = vcmp.lt.s32.totalorder %v5473_v12, 4  ;;  %v601_v14 = vsel %vm597_vm5, %v581_v60, %v584_v47 }
  0xf5   :  { %v602_v38 = vsel %vm600_vm13, %v590_v32, 2102212464  ;;  %v605_v57 = vsel %vm597_vm5, %v584_v47, %v587_v54  ;;  %v606_v61 = vsel %vm600_vm13, %v593_v52, 920167782  ;;  %v609_v51 = vsel %vm597_vm5, %v587_v54, %v590_v32 }
  0xf6   :  { %vm4215_vm10 = vcmp.lt.s32.totalorder %v4214_v4, 0  ;;  %v603_v30 = vsel %vm599_vm9, %v587_v54, %v602_v38  ;;  %v607_v11 = vsel %vm599_vm9, %v590_v32, %v606_v61  ;;  %v610_v6 = vsel %vm600_vm13, %v596_v17, 1326507024 }
  0xf7   :  { %v1254_v59 = vsel %vm4215_vm10, 0, %v4214_v4  ;;  %v604_v27 = vsel %vm598_vm8, %v601_v14, %v603_v30  ;;  %v608_v26 = vsel %vm598_vm8, %v605_v57, %v607_v11  ;;  %v611_v19 = vsel %vm599_vm9, %v593_v52, %v610_v6 }
  0xf8   :  { %v1255_v21 = vsub.s32 32, %v1254_v59  ;;  %v1256_v22 = vshll.u32 %v5471_v1, %v1254_v59  ;;  %v1259_v8 = vsub.s32 4294967266, %v1254_v59  ;;  %v1270_v7 = vsel %vm1185_vm0, %v1269_v42, %v5462_v10 }
  0xf9   :  { %v4477_v62 = vpop.eup %4476  ;;  %v612_v55 = vsel %vm598_vm8, %v609_v51, %v611_v19  ;;  %v5539_v13 = vmul.u32.u64.low %v5499_v63, %v608_v26  ;;  %v5540_v53 = vmul.u32.u64.high %v5499_v63, %v608_v26, %v5539_v13  ;;  %v4216_v24 = vadd.s32 4294967169, %v1290_v3 }
  0xfa   :  { %v4479_v34 = vpop.eup %4478  ;;  %v561_v20 = vxor.u32 2147483648, %v4477_v62  ;;  %v1257_v1 = vshrl.u32 %v1239_v0, %v1255_v21  ;;  %v1260_v2 = vadd.s32 127, %v1259_v8  ;;  %v620_v10 = vmul.u32 %v5499_v63, %v604_v27 }
  0xfb   :  { %v558_v5 = vxor.u32 2147483648, %v4479_v34  ;;  %v5544_v36 = vmul.u32.u64.low %v5499_v63, %v612_v55  ;;  %v5545_v43 = vmul.u32.u64.high %v5499_v63, %v612_v55, %v5544_v36  ;;  %v623_v49 = vadd.s32 1, %v5540_v53 }
  0xfc   :  { %v562_v12 = vsel %vm560_vm1, %v561_v20, %v4479_v34  ;;  %v1258_v44 = vor.u32 %v1257_v1, %v1256_v22  ;;  %v1261_v46 = vshll.u32 %v1260_v2, 23  ;;  %v2215_v25 = vsel %vm2213_vm2, %v561_v20, %v4479_v34  ;;  %v5603_v34 = vld [vmem:[%s6436_s1 + $0x30] sm:$0xff] }
  0xfd   :  { %v559_v0 = vsel %vm557_vm3, %v4477_v62, %v558_v5  ;;  %v2212_v18 = vsel %vm2210_vm4, %v4477_v62, %v558_v5  ;;  %v1296_v60 = vadd.s32 1, %v4216_v24  ;;  %vm622_vm12 = vc.u32 %v5545_v43, %v5539_v13 }
  0xfe   :  { %v563_v63 = vsel %vm556_vm6, %v559_v0, %v562_v12  ;;  %v1262_v47 = vor.u32 4788187, %v1261_v46  ;;  %v1265_v54 = vcvt.s32.f32 %v1258_v44  ;;  %v2216_v23 = vsel %vm2209_vm7, %v2212_v18, %v2215_v25 }
  0xff   :  { %v564_v48 = vsel %vm554_vm11, nan, %v563_v63  ;;  %v1286_v40 = vand.u32 2147483647, %v5479_v39  ;;  %vm5568_vm14 = vcmp.le.f32.partialorder %v1183_v50, 0.7853982  ;;  %v624_v16 = vsel %vm622_vm12, %v623_v49, %v5540_v53 }
 0x100   :  { %3401 = vperm.xlu0 %4446, %v564_v48   ;;  %v1263_v56 = vand.u32 2147483647, %v1262_v47  ;;  %vm1297_vm15 = vcmp.gt.s32.totalorder %v1296_v60, 0  ;;  %v1272_v15 = vsel %vm5568_vm14, 0, %v1270_v7  ;;  %v2217_v42 = vsel %vm554_vm11, nan, %v2216_v23 }
 0x101   :  { %v625_v52 = vadd.s32 %v624_v16, %v620_v10  ;;  %v1298_v3 = vsel %vm1297_vm15, %v1296_v60, 0  ;;  %v1293_v50 = vand.u32 8388607, %v1286_v40  ;;  %v5579_v57 = vand.u32 3, %v1272_v15 }
 0x102   :  { %v1266_v4 = vmul.f32 %v1265_v54, %v1263_v56  ;;  %v1300_v17 = vand.u32 31, %v1298_v3  ;;  %v5581_v61 = vshrl.u32 %v1298_v3, 5  ;;  %v2935_v8 = vadd.s32 3, %v1272_v15 }
 0x103   :  { %v626_v14 = vadd.s32 536870912, %v625_v52  ;;  %v1294_v7 = vor.u32 8388608, %v1293_v50  ;;  %vm1278_vm1 = vcmp.eq.s32.totalorder %v5579_v57, 0  ;;  %vm1281_vm2 = vcmp.eq.s32.totalorder %v5579_v57, 2 }
 0x104   :  { %v1267_v38 = vxor.u32 2147483648, %v1266_v4  ;;  %3504 = vperm.xlu0 %4446, %v2217_v42   ;;  %v1301_v30 = vsub.s32 32, %v1300_v17  ;;  %v1303_v41 = vshll.u32 %v4573_v29, %v1300_v17  ;;  %v1306_v51 = vshll.u32 %v4574_v31, %v1300_v17 }
 0x105   :  { %v5583_v11 = vshrl.u32 %v626_v14, 30  ;;  %v1309_v59 = vshll.u32 %v4575_v33, %v1300_v17  ;;  %v1312_v21 = vshll.u32 %v4576_v35, %v1300_v17  ;;  %v1315_v53 = vshll.u32 %v4577_v37, %v1300_v17 }
 0x106   :  { %v1268_v27 = vsel %vm1185_vm0, %v1267_v38, %v1266_v4  ;;  %v1304_v26 = vshrl.u32 %v4574_v31, %v1301_v30  ;;  %v1307_v6 = vshrl.u32 %v4575_v33, %v1301_v30  ;;  %v1310_v62 = vshrl.u32 %v4576_v35, %v1301_v30 }
 0x107   :  { %v1271_v22 = vsel %vm5568_vm14, %v5293_v9, %v1268_v27  ;;  %v628_v19 = vshll.u32 %v5583_v11, 30  ;;  %v1313_v55 = vshrl.u32 %v4577_v37, %v1301_v30  ;;  %v1316_v36 = vshrl.u32 %v4578_v45, %v1301_v30 }
 0x108   :  { %4480 = vcosq.f32 %v1271_v22  ;;  %v1305_v1 = vor.u32 %v1304_v26, %v1303_v41  ;;  %v1308_v2 = vor.u32 %v1307_v6, %v1306_v51  ;;  %v1311_v24 = vor.u32 %v1310_v62, %v1309_v59 }
 0x109   :  { %4482 = vsinq.f32 %v1271_v22  ;;  %v5605_v20 = vsub.s32 %v625_v52, %v628_v19  ;;  %v1314_v5 = vor.u32 %v1313_v55, %v1312_v21  ;;  %vm1318_vm0 = vcmp.lt.s32.totalorder %v5581_v61, 1 }
 0x10a   :  { %v2936_v10 = vand.u32 3, %v2935_v8  ;;  %v671_v44 = vand.u32 2139095040, %v5603_v34  ;;  %vm1277_vm3 = vcmp.lt.s32.totalorder %v5579_v57, 2  ;;  %v1302_v46 = vshrl.u32 %v4573_v29, %v1301_v30 }
 0x10b   :  { %v631_v12 = vsub.s32 0, %v5605_v20  ;;  %v1317_v25 = vor.u32 %v1316_v36, %v1315_v53  ;;  %vm1320_vm4 = vcmp.lt.s32.totalorder %v5581_v61, 3  ;;  %vm1321_vm5 = vcmp.lt.s32.totalorder %v5581_v61, 4 }
 0x10c   :  { %vm1275_vm6 = vweird.f32 %v5293_v9  ;;  %vm1319_vm7 = vcmp.lt.s32.totalorder %v5581_v61, 2  ;;  %v1326_v18 = vsel %vm1318_vm0, %v1305_v1, %v1308_v2  ;;  %v1334_v49 = vshll.u32 %v1294_v7, 8 }
 0x10d   :  { %v4189_v0 = vmin.u32 %v631_v12, %v5605_v20  ;;  %v1323_v60 = vsel %vm1321_vm5, %v1311_v24, 2102212464  ;;  %v1327_v63 = vsel %vm1321_vm5, %v1314_v5, 920167782  ;;  %v1330_v47 = vsel %vm1318_vm0, %v1308_v2, %v1311_v24 }
 0x10e   :  { %v1331_v54 = vsel %vm1321_vm5, %v1317_v25, 1326507024  ;;  %vm567_vm8 = vcmp.lt.s32.totalorder %v5390_v58, 0  ;;  %v1328_v48 = vsel %vm1320_vm4, %v1311_v24, %v1327_v63  ;;  %v672_v56 = vshrl.u32 %v671_v44, 23 }
 0x10f   :  { %v633_v23 = vclz %v4189_v0  ;;  %v1332_v32 = vsel %vm1320_vm4, %v1314_v5, %v1331_v54  ;;  %v1322_v16 = vsel %vm1318_vm0, %v1302_v46, %v1305_v1  ;;  %v1324_v15 = vsel %vm1320_vm4, %v1308_v2, %v1323_v60 }
 0x110   :  { %v1329_v42 = vsel %vm1319_vm7, %v1326_v18, %v1328_v48  ;;  %v1333_v52 = vsel %vm1319_vm7, %v1330_v47, %v1332_v32  ;;  %vm2937_vm11 = vcmp.lt.s32.totalorder %v2936_v10, 2  ;;  %vm2938_vm9 = vcmp.eq.s32.totalorder %v2936_v10, 0  ;;  %v5681_v47 = vld [vmem:[%s6436_s1 + $0x68] sm:$0xff] }
 0x111   :  { %v4190_v3 = vadd.s32 4294967294, %v633_v23  ;;  %v5637_v4 = vmul.u32.u64.low %v1334_v49, %v1333_v52  ;;  %v5638_v17 = vmul.u32.u64.high %v1334_v49, %v1333_v52, %v5637_v4  ;;  %vm2941_vm13 = vcmp.eq.s32.totalorder %v2936_v10, 2 }
 0x112   :  { %v4481_v14 = vpop.eup %4480  ;;  %v5640_v50 = vmul.u32.u64.low %v1334_v49, %v1329_v42  ;;  %v5641_v38 = vmul.u32.u64.high %v1334_v49, %v1329_v42, %v5640_v50  ;;  %v621_v51 = vadd.s32 %v5539_v13, %v5545_v43  ;;  %v1325_v59 = vsel %vm1319_vm7, %v1322_v16, %v1324_v15 }
 0x113   :  { %v4483_v30 = vpop.eup %4482  ;;  %v1282_v41 = vxor.u32 2147483648, %v4481_v14  ;;  %vm4191_vm10 = vcmp.lt.s32.totalorder %v4190_v3, 0  ;;  %v651_v6 = vsub.s32 4, %v5583_v11  ;;  %v4192_v21 = vadd.s32 4294967169, %v672_v56 }
 0x114   :  { %v1279_v27 = vxor.u32 2147483648, %v4483_v30  ;;  %v636_v26 = vsel %vm4191_vm10, 0, %v4190_v3  ;;  %v1341_v61 = vmul.u32 %v1334_v49, %v1325_v59  ;;  %vm1343_vm12 = vc.u32 %v5638_v17, %v5640_v50 }
 0x115   :  { %v1283_v22 = vsel %vm1281_vm2, %v1282_v41, %v4483_v30  ;;  %v2943_v8 = vsel %vm2941_vm13, %v1282_v41, %v4483_v30  ;;  %v637_v19 = vsub.s32 32, %v636_v26  ;;  %v638_v62 = vshll.u32 %v5605_v20, %v636_v26 }
 0x116   :  { %v1280_v7 = vsel %vm1278_vm1, %v4481_v14, %v1279_v27  ;;  %v2940_v13 = vsel %vm2938_vm9, %v4481_v14, %v1279_v27  ;;  %v641_v43 = vsub.s32 4294967266, %v636_v26  ;;  %v652_v24 = vsel %vm567_vm8, %v651_v6, %v5583_v11 }
 0x117   :  { %v1284_v55 = vsel %vm1277_vm3, %v1280_v7, %v1283_v22  ;;  %v2944_v53 = vsel %vm2937_vm11, %v2940_v13, %v2943_v8  ;;  %v639_v1 = vshrl.u32 %v621_v51, %v637_v19  ;;  %v1344_v5 = vadd.s32 1, %v5641_v38 }
 0x118   :  { %v1285_v2 = vsel %vm1275_vm6, nan, %v1284_v55  ;;  %v642_v20 = vadd.s32 127, %v641_v43  ;;  %v678_v57 = vadd.s32 1, %v4192_v21  ;;  %v2945_v10 = vsel %vm1275_vm6, nan, %v2944_v53 }
 0x119   :  { %3436 = vperm.xlu1 %4447, %v1285_v2   ;;  %v640_v36 = vor.u32 %v639_v1, %v638_v62  ;;  %vm5670_vm14 = vcmp.le.f32.partialorder %v565_v28, 0.7853982  ;;  %v1345_v46 = vsel %vm1343_vm12, %v1344_v5, %v5641_v38  ;;  %v668_v0 = vand.u32 2147483647, %v5603_v34 }
 0x11a   :  { %v643_v44 = vshll.u32 %v642_v20, 23  ;;  %v654_v11 = vsel %vm5670_vm14, 0, %v652_v24  ;;  %v1346_v25 = vadd.s32 %v1345_v46, %v1341_v61  ;;  %vm679_vm15 = vcmp.gt.s32.totalorder %v678_v57, 0 }
 0x11b   :  { %v647_v49 = vcvt.s32.f32 %v640_v36  ;;  %v2311_v9 = vadd.s32 3, %v654_v11  ;;  %v680_v60 = vsel %vm679_vm15, %v678_v57, 0  ;;  %v675_v48 = vand.u32 8388607, %v668_v0 }
 0x11c   :  { %v644_v18 = vor.u32 4788187, %v643_v44  ;;  %v1347_v63 = vadd.s32 536870912, %v1346_v25  ;;  %v682_v28 = vand.u32 31, %v680_v60  ;;  %v1389_v56 = vand.u32 2147483647, %v5681_v47 }
 0x11d   :  { %3539 = vperm.xlu1 %4447, %v2945_v10   ;;  %v5688_v15 = vand.u32 3, %v654_v11  ;;  %v5690_v42 = vand.u32 3, %v2311_v9  ;;  %v1392_v52 = vand.u32 2139095040, %v5681_v47  ;;  %v681_v26 = vshrl.u32 %v680_v60, 5 }
 0x11e   :  { %v645_v54 = vand.u32 2147483647, %v644_v18  ;;  %v5683_v23 = vshrl.u32 %v1347_v63, 30  ;;  %v683_v32 = vsub.s32 32, %v682_v28  ;;  %v685_v4 = vshll.u32 %v4573_v29, %v682_v28 }
 0x11f   :  { %v688_v14 = vshll.u32 %v4574_v31, %v682_v28  ;;  %v691_v38 = vshll.u32 %v4575_v33, %v682_v28  ;;  %v694_v6 = vshll.u32 %v4576_v35, %v682_v28  ;;  %v697_v8 = vshll.u32 %v4577_v37, %v682_v28 }
 0x120   :  { %v648_v16 = vmul.f32 %v647_v49, %v645_v54  ;;  %v1349_v3 = vshll.u32 %v5683_v23, 30  ;;  %v686_v41 = vshrl.u32 %v4574_v31, %v683_v32  ;;  %v689_v51 = vshrl.u32 %v4575_v33, %v683_v32 }
 0x121   :  { %v692_v59 = vshrl.u32 %v4576_v35, %v683_v32  ;;  %v695_v21 = vshrl.u32 %v4577_v37, %v683_v32  ;;  %v698_v19 = vshrl.u32 %v4578_v45, %v683_v32  ;;  %v1393_v62 = vshrl.u32 %v1392_v52, 23 }
 0x122   :  { %v649_v30 = vxor.u32 2147483648, %v648_v16  ;;  %v5700_v27 = vsub.s32 %v1346_v25, %v1349_v3  ;;  %v676_v43 = vor.u32 8388608, %v675_v48  ;;  %v684_v61 = vshrl.u32 %v4573_v29, %v683_v32 }
 0x123   :  { %v687_v55 = vor.u32 %v686_v41, %v685_v4  ;;  %v690_v53 = vor.u32 %v689_v51, %v688_v14  ;;  %v693_v1 = vor.u32 %v692_v59, %v691_v38  ;;  %v696_v20 = vor.u32 %v695_v21, %v694_v6 }
 0x124   :  { %v650_v22 = vsel %vm567_vm8, %v649_v30, %v648_v16  ;;  %v1352_v13 = vsub.s32 0, %v5700_v27  ;;  %vm700_vm0 = vcmp.lt.s32.totalorder %v681_v26, 1  ;;  %vm663_vm1 = vcmp.eq.s32.totalorder %v5688_v15, 2 }
 0x125   :  { %v653_v7 = vsel %vm5670_vm14, %v5390_v58, %v650_v22  ;;  %v1342_v24 = vadd.s32 %v5640_v50, %v5638_v17  ;;  %v699_v5 = vor.u32 %v698_v19, %v697_v8  ;;  %v4220_v36 = vadd.s32 4294967169, %v1393_v62 }
 0x126   :  { %4484 = vcosq.f32 %v653_v7  ;;  %v4217_v2 = vmin.u32 %v1352_v13, %v5700_v27  ;;  %vm660_vm2 = vcmp.eq.s32.totalorder %v5688_v15, 0  ;;  %vm2314_vm3 = vcmp.eq.s32.totalorder %v5690_v42, 0 }
 0x127   :  { %4486 = vsinq.f32 %v653_v7  ;;  %vm702_vm4 = vcmp.lt.s32.totalorder %v681_v26, 3  ;;  %vm703_vm5 = vcmp.lt.s32.totalorder %v681_v26, 4  ;;  %v5719_v10 = vshll.u32 %v676_v43, 8 }
 0x128   :  { %v1354_v57 = vclz %v4217_v2  ;;  %vm659_vm6 = vcmp.lt.s32.totalorder %v5688_v15, 2  ;;  %vm2313_vm7 = vcmp.lt.s32.totalorder %v5690_v42, 2  ;;  %vm701_vm8 = vcmp.lt.s32.totalorder %v681_v26, 2 }
 0x129   :  { %v704_v12 = vsel %vm700_vm0, %v684_v61, %v687_v55  ;;  %v705_v17 = vsel %vm703_vm5, %v693_v1, 2102212464  ;;  %v708_v50 = vsel %vm700_vm0, %v687_v55, %v690_v53  ;;  %vm657_vm11 = vweird.f32 %v5390_v58 }
 0x12a   :  { %vm1288_vm9 = vcmp.lt.s32.totalorder %v5479_v39, 0  ;;  %v4218_v44 = vadd.s32 4294967294, %v1354_v57  ;;  %v706_v46 = vsel %vm702_vm4, %v690_v53, %v705_v17  ;;  %v709_v11 = vsel %vm703_vm5, %v696_v20, 920167782 }
 0x12b   :  { %v712_v25 = vsel %vm700_vm0, %v690_v53, %v693_v1  ;;  %vm2317_vm13 = vcmp.eq.s32.totalorder %v5690_v42, 2  ;;  %v710_v18 = vsel %vm702_vm4, %v693_v1, %v709_v11  ;;  %v713_v49 = vsel %vm703_vm5, %v699_v5, 1326507024 }
 0x12c   :  { %v1399_v9 = vadd.s32 1, %v4220_v36  ;;  %vm4219_vm10 = vcmp.lt.s32.totalorder %v4218_v44, 0  ;;  %v707_v60 = vsel %vm701_vm8, %v704_v12, %v706_v46  ;;  %v711_v63 = vsel %vm701_vm8, %v708_v50, %v710_v18 }
 0x12d   :  { %v714_v28 = vsel %vm702_vm4, %v696_v20, %v713_v49  ;;  %v1357_v54 = vsel %vm4219_vm10, 0, %v4218_v44  ;;  %v5739_v32 = vmul.u32.u64.low %v5719_v10, %v711_v63  ;;  %v5740_v16 = vmul.u32.u64.high %v5719_v10, %v711_v63, %v5739_v32 }
 0x12e   :  { %v715_v48 = vsel %vm701_vm8, %v712_v25, %v714_v28  ;;  %v1358_v52 = vsub.s32 32, %v1357_v54  ;;  %v1359_v3 = vshll.u32 %v5700_v27, %v1357_v54  ;;  %v1362_v4 = vsub.s32 4294967266, %v1357_v54 }
 0x12f   :  { %vm1400_vm12 = vcmp.gt.s32.totalorder %v1399_v9, 0  ;;  %v1372_v38 = vsub.s32 4, %v5683_v23  ;;  %v5746_v30 = vmul.u32.u64.low %v5719_v10, %v715_v48  ;;  %v5747_v41 = vmul.u32.u64.high %v5719_v10, %v715_v48, %v5746_v30 }
 0x130   :  { %v4485_v14 = vpop.eup %4484  ;;  %v1401_v51 = vsel %vm1400_vm12, %v1399_v9, 0  ;;  %vm5751_vm14 = vcmp.le.f32.partialorder %v1286_v40, 0.7853982  ;;  %v1360_v21 = vshrl.u32 %v1342_v24, %v1358_v52  ;;  %v1363_v27 = vadd.s32 127, %v1362_v4 }
 0x131   :  { %v4487_v59 = vpop.eup %4486  ;;  %v664_v26 = vxor.u32 2147483648, %v4485_v14  ;;  %v1396_v22 = vand.u32 8388607, %v1389_v56  ;;  %v723_v19 = vmul.u32 %v5719_v10, %v707_v60  ;;  %v726_v62 = vadd.s32 1, %v5740_v16 }
 0x132   :  { %v661_v8 = vxor.u32 2147483648, %v4487_v59  ;;  %v1403_v7 = vand.u32 31, %v1401_v51  ;;  %v1361_v43 = vor.u32 %v1360_v21, %v1359_v3  ;;  %v1364_v61 = vshll.u32 %v1363_v27, 23 }
 0x133   :  { %v665_v13 = vsel %vm663_vm1, %v664_v26, %v4487_v59  ;;  %v2319_v40 = vsel %vm2317_vm13, %v664_v26, %v4487_v59  ;;  %v1373_v53 = vsel %vm1288_vm9, %v1372_v38, %v5683_v23  ;;  %vm725_vm15 = vc.u32 %v5747_v41, %v5739_v32 }
 0x134   :  { %v662_v55 = vsel %vm660_vm2, %v4485_v14, %v661_v8  ;;  %v2316_v1 = vsel %vm2314_vm3, %v4485_v14, %v661_v8  ;;  %v1365_v20 = vor.u32 4788187, %v1364_v61  ;;  %v1368_v24 = vcvt.s32.f32 %v1361_v43 }
 0x135   :  { %v666_v2 = vsel %vm659_vm6, %v662_v55, %v665_v13  ;;  %v2320_v5 = vsel %vm2313_vm7, %v2316_v1, %v2319_v40  ;;  %v727_v57 = vsel %vm725_vm15, %v726_v62, %v5740_v16  ;;  %v5779_v23 = vshrl.u32 %v1401_v51, 5  ;;  %v5820_v55 = vld [vmem:[%s6436_s1 + $0x38] sm:$0xff] }
 0x136   :  { %v667_v36 = vsel %vm657_vm11, nan, %v666_v2  ;;  %v1404_v10 = vsub.s32 32, %v1403_v7  ;;  %v1366_v12 = vand.u32 2147483647, %v1365_v20  ;;  %v728_v17 = vadd.s32 %v727_v57, %v723_v19 }
 0x137   :  { %3406 = vperm.xlu0 %4446, %v667_v36   ;;  %v1406_v50 = vshll.u32 %v4573_v29, %v1403_v7  ;;  %v1409_v15 = vshll.u32 %v4574_v31, %v1403_v7  ;;  %v2321_v44 = vsel %vm657_vm11, nan, %v2320_v5  ;;  %v1412_v11 = vshll.u32 %v4575_v33, %v1403_v7 }
 0x138   :  { %v1407_v42 = vshrl.u32 %v4574_v31, %v1404_v10  ;;  %v1410_v46 = vshrl.u32 %v4575_v33, %v1404_v10  ;;  %v1369_v25 = vmul.f32 %v1368_v24, %v1366_v12  ;;  %v729_v18 = vadd.s32 536870912, %v728_v17 }
 0x139   :  { %v1413_v49 = vshrl.u32 %v4576_v35, %v1404_v10  ;;  %v1415_v9 = vshll.u32 %v4576_v35, %v1403_v7  ;;  %v1375_v60 = vsel %vm5751_vm14, 0, %v1373_v53  ;;  %v1416_v28 = vshrl.u32 %v4577_v37, %v1404_v10 }
 0x13a   :  { %v1408_v63 = vor.u32 %v1407_v42, %v1406_v50  ;;  %v1418_v58 = vshll.u32 %v4577_v37, %v1403_v7  ;;  %v1370_v54 = vxor.u32 2147483648, %v1369_v25  ;;  %v730_v48 = vshrl.u32 %v729_v18, 30 }
 0x13b   :  { %3509 = vperm.xlu0 %4446, %v2321_v44   ;;  %v1411_v16 = vor.u32 %v1410_v46, %v1409_v15  ;;  %v1419_v52 = vshrl.u32 %v4578_v45, %v1404_v10  ;;  %v3039_v3 = vadd.s32 3, %v1375_v60  ;;  %v1397_v4 = vor.u32 8388608, %v1396_v22 }
 0x13c   :  { %v1417_v14 = vor.u32 %v1416_v28, %v1415_v9  ;;  %vm1421_vm0 = vcmp.lt.s32.totalorder %v5779_v23, 1  ;;  %v1371_v38 = vsel %vm1288_vm9, %v1370_v54, %v1369_v25  ;;  %v731_v30 = vshll.u32 %v730_v48, 30 }
 0x13d   :  { %v1405_v51 = vshrl.u32 %v4573_v29, %v1404_v10  ;;  %v1414_v59 = vor.u32 %v1413_v49, %v1412_v11  ;;  %v1374_v26 = vsel %vm5751_vm14, %v5479_v39, %v1371_v38  ;;  %v1420_v21 = vor.u32 %v1419_v52, %v1418_v58 }
 0x13e   :  { %vm1423_vm1 = vcmp.lt.s32.totalorder %v5779_v23, 3  ;;  %vm1424_vm2 = vcmp.lt.s32.totalorder %v5779_v23, 4  ;;  %4488 = vcosq.f32 %v1374_v26  ;;  %v5804_v27 = vsub.s32 %v728_v17, %v731_v30 }
 0x13f   :  { %vm1422_vm3 = vcmp.lt.s32.totalorder %v5779_v23, 2  ;;  %v1429_v22 = vsel %vm1421_vm0, %v1408_v63, %v1411_v16  ;;  %4490 = vsinq.f32 %v1374_v26  ;;  %v1430_v8 = vsel %vm1424_vm2, %v1417_v14, 920167782 }
 0x140   :  { %v1437_v19 = vshll.u32 %v1397_v4, 8  ;;  %vm670_vm4 = vcmp.lt.s32.totalorder %v5603_v34, 0  ;;  %v734_v6 = vsub.s32 0, %v5804_v27  ;;  %v1426_v62 = vsel %vm1424_vm2, %v1414_v59, 2102212464 }
 0x141   :  { %v1431_v7 = vsel %vm1423_vm1, %v1414_v59, %v1430_v8  ;;  %v1379_v13 = vand.u32 3, %v1375_v60  ;;  %v1433_v61 = vsel %vm1421_vm0, %v1411_v16, %v1414_v59  ;;  %v1434_v40 = vsel %vm1424_vm2, %v1420_v21, 1326507024 }
 0x142   :  { %v1432_v43 = vsel %vm1422_vm3, %v1429_v22, %v1431_v7  ;;  %v3040_v53 = vand.u32 3, %v3039_v3  ;;  %v4193_v1 = vmin.u32 %v734_v6, %v5804_v27  ;;  %v1425_v2 = vsel %vm1421_vm0, %v1405_v51, %v1408_v63 }
 0x143   :  { %v771_v20 = vand.u32 2147483647, %v5820_v55  ;;  %vm1378_vm5 = vweird.f32 %v5479_v39  ;;  %v1427_v24 = vsel %vm1423_vm1, %v1411_v16, %v1426_v62  ;;  %v1435_v5 = vsel %vm1423_vm1, %v1417_v14, %v1434_v40  ;;  %v5882_v39 = vld [vmem:[%s6436_s1 + $0x70] sm:$0xff] }
 0x144   :  { %v5831_v36 = vmul.u32.u64.low %v1437_v19, %v1432_v43  ;;  %v5832_v57 = vmul.u32.u64.high %v1437_v19, %v1432_v43, %v5831_v36  ;;  %v736_v10 = vclz %v4193_v1  ;;  %v754_v12 = vsub.s32 4, %v730_v48 }
 0x145   :  { %v1436_v17 = vsel %vm1422_vm3, %v1433_v61, %v1435_v5  ;;  %v774_v50 = vand.u32 2139095040, %v5820_v55  ;;  %vm1380_vm6 = vcmp.lt.s32.totalorder %v1379_v13, 2  ;;  %vm1381_vm7 = vcmp.eq.s32.totalorder %v1379_v13, 0 }
 0x146   :  { %vm5840_vm8 = vcmp.le.f32.partialorder %v668_v0, 0.7853982  ;;  %v5844_v44 = vmul.u32.u64.low %v1437_v19, %v1436_v17  ;;  %v5845_v42 = vmul.u32.u64.high %v1437_v19, %v1436_v17, %v5844_v44  ;;  %vm1384_vm11 = vcmp.eq.s32.totalorder %v1379_v13, 2 }
 0x147   :  { %v4194_v46 = vadd.s32 4294967294, %v736_v10  ;;  %v1428_v11 = vsel %vm1422_vm3, %v1425_v2, %v1427_v24  ;;  %v775_v25 = vshrl.u32 %v774_v50, 23  ;;  %vm3041_vm9 = vcmp.lt.s32.totalorder %v3040_v53, 2 }
 0x148   :  { %vm3042_vm13 = vcmp.eq.s32.totalorder %v3040_v53, 0  ;;  %vm3045_vm10 = vcmp.eq.s32.totalorder %v3040_v53, 2  ;;  %v1447_v18 = vadd.s32 1, %v5832_v57  ;;  %v4489_v49 = vpop.eup %4488  ;;  %v724_v0 = vadd.s32 %v5739_v32, %v5747_v41 }
 0x149   :  { %vm4195_vm12 = vcmp.lt.s32.totalorder %v4194_v46, 0  ;;  %v755_v9 = vsel %vm670_vm4, %v754_v12, %v730_v48  ;;  %v4196_v60 = vadd.s32 4294967169, %v775_v25  ;;  %v4491_v63 = vpop.eup %4490  ;;  %v1385_v28 = vxor.u32 2147483648, %v4489_v49 }
 0x14a   :  { %v739_v58 = vsel %vm4195_vm12, 0, %v4194_v46  ;;  %v1444_v23 = vmul.u32 %v1437_v19, %v1428_v11  ;;  %vm1446_vm14 = vc.u32 %v5845_v42, %v5831_v36  ;;  %v1382_v54 = vxor.u32 2147483648, %v4491_v63 }
 0x14b   :  { %v740_v16 = vsub.s32 32, %v739_v58  ;;  %v741_v52 = vshll.u32 %v5804_v27, %v739_v58  ;;  %v744_v3 = vsub.s32 4294967266, %v739_v58  ;;  %v1386_v4 = vsel %vm1384_vm11, %v1385_v28, %v4491_v63 }
 0x14c   :  { %v3047_v32 = vsel %vm3045_vm10, %v1385_v28, %v4491_v63  ;;  %v1448_v41 = vsel %vm1446_vm14, %v1447_v18, %v5832_v57  ;;  %v781_v48 = vadd.s32 1, %v4196_v60  ;;  %v1383_v14 = vsel %vm1381_vm7, %v4489_v49, %v1382_v54 }
 0x14d   :  { %v3044_v38 = vsel %vm3042_vm13, %v4489_v49, %v1382_v54  ;;  %v742_v30 = vshrl.u32 %v724_v0, %v740_v16  ;;  %v745_v51 = vadd.s32 127, %v744_v3  ;;  %v1387_v59 = vsel %vm1380_vm6, %v1383_v14, %v1386_v4 }
 0x14e   :  { %v3048_v26 = vsel %vm3041_vm9, %v3044_v38, %v3047_v32  ;;  %v1449_v21 = vadd.s32 %v1448_v41, %v1444_v23  ;;  %vm782_vm15 = vcmp.gt.s32.totalorder %v781_v48, 0  ;;  %v1388_v27 = vsel %vm1378_vm5, nan, %v1387_v59 }
 0x14f   :  { %v743_v22 = vor.u32 %v742_v30, %v741_v52  ;;  %v746_v8 = vshll.u32 %v745_v51, 23  ;;  %v757_v19 = vsel %vm5840_vm8, 0, %v755_v9  ;;  %3441 = vperm.xlu1 %4447, %v1388_v27   ;;  %v778_v7 = vand.u32 8388607, %v771_v20 }
 0x150   :  { %v1450_v6 = vadd.s32 536870912, %v1449_v21  ;;  %v2415_v62 = vadd.s32 3, %v757_v19  ;;  %v783_v13 = vsel %vm782_vm15, %v781_v48, 0  ;;  %v3049_v43 = vsel %vm1378_vm5, nan, %v3048_v26 }
 0x151   :  { %v747_v61 = vor.u32 4788187, %v746_v8  ;;  %v750_v40 = vcvt.s32.f32 %v743_v22  ;;  %v785_v53 = vand.u32 31, %v783_v13  ;;  %v5874_v5 = vand.u32 3, %v757_v19 }
 0x152   :  { %v5872_v1 = vshrl.u32 %v1450_v6, 30  ;;  %v5877_v10 = vand.u32 3, %v2415_v62  ;;  %v779_v12 = vor.u32 8388608, %v778_v7  ;;  %v1492_v46 = vand.u32 2147483647, %v5882_v39 }
 0x153   :  { %v748_v2 = vand.u32 2147483647, %v747_v61  ;;  %v786_v24 = vsub.s32 32, %v785_v53  ;;  %3544 = vperm.xlu1 %4447, %v3049_v43   ;;  %v788_v50 = vshll.u32 %v4573_v29, %v785_v53  ;;  %v791_v44 = vshll.u32 %v4574_v31, %v785_v53 }
 0x154   :  { %v1452_v57 = vshll.u32 %v5872_v1, 30  ;;  %v794_v49 = vshll.u32 %v4575_v33, %v785_v53  ;;  %v797_v60 = vshll.u32 %v4576_v35, %v785_v53  ;;  %vm1391_vm0 = vcmp.lt.s32.totalorder %v5681_v47, 0 }
 0x155   :  { %v751_v17 = vmul.f32 %v750_v40, %v748_v2  ;;  %v789_v25 = vshrl.u32 %v4574_v31, %v786_v24  ;;  %v792_v18 = vshrl.u32 %v4575_v33, %v786_v24  ;;  %v795_v9 = vshrl.u32 %v4576_v35, %v786_v24 }
 0x156   :  { %v5887_v11 = vsub.s32 %v1449_v21, %v1452_v57  ;;  %v798_v63 = vshrl.u32 %v4577_v37, %v786_v24  ;;  %v784_v58 = vshrl.u32 %v783_v13, 5  ;;  %v5897_v23 = vshll.u32 %v779_v12, 8 }
 0x157   :  { %v752_v0 = vxor.u32 2147483648, %v751_v17  ;;  %v1495_v54 = vand.u32 2139095040, %v5882_v39  ;;  %v787_v52 = vshrl.u32 %v4573_v29, %v786_v24  ;;  %v800_v3 = vshll.u32 %v4577_v37, %v785_v53 }
 0x158   :  { %v1455_v28 = vsub.s32 0, %v5887_v11  ;;  %v801_v4 = vshrl.u32 %v4578_v45, %v786_v24  ;;  %v790_v48 = vor.u32 %v789_v25, %v788_v50  ;;  %v793_v14 = vor.u32 %v792_v18, %v791_v44 }
 0x159   :  { %v753_v16 = vsel %vm670_vm4, %v752_v0, %v751_v17  ;;  %v796_v38 = vor.u32 %v795_v9, %v794_v49  ;;  %v799_v30 = vor.u32 %v798_v63, %v797_v60  ;;  %vm5911_vm1 = vcmp.le.f32.partialorder %v1389_v56, 0.7853982 }
 0x15a   :  { %v756_v32 = vsel %vm5840_vm8, %v5603_v34, %v753_v16  ;;  %v4221_v41 = vmin.u32 %v1455_v28, %v5887_v11  ;;  %v802_v51 = vor.u32 %v801_v4, %v800_v3  ;;  %v1445_v26 = vadd.s32 %v5831_v36, %v5845_v42 }
 0x15b   :  { %4492 = vcosq.f32 %v756_v32  ;;  %vm803_vm2 = vcmp.lt.s32.totalorder %v784_v58, 1  ;;  %vm766_vm3 = vcmp.eq.s32.totalorder %v5874_v5, 2  ;;  %v1475_v21 = vsub.s32 4, %v5872_v1 }
 0x15c   :  { %4494 = vsinq.f32 %v756_v32  ;;  %v1457_v15 = vclz %v4221_v41  ;;  %vm804_vm4 = vcmp.lt.s32.totalorder %v784_v58, 2  ;;  %vm805_vm5 = vcmp.lt.s32.totalorder %v784_v58, 3 }
 0x15d   :  { %v1496_v27 = vshrl.u32 %v1495_v54, 23  ;;  %vm763_vm6 = vcmp.eq.s32.totalorder %v5874_v5, 0  ;;  %vm806_vm7 = vcmp.lt.s32.totalorder %v784_v58, 4  ;;  %v807_v56 = vsel %vm803_vm2, %v787_v52, %v790_v48 }
 0x15e   :  { %v4222_v22 = vadd.s32 4294967294, %v1457_v15  ;;  %v811_v8 = vsel %vm803_vm2, %v790_v48, %v793_v14  ;;  %vm762_vm8 = vcmp.lt.s32.totalorder %v5874_v5, 2  ;;  %v808_v19 = vsel %vm806_vm7, %v796_v38, 2102212464 }
 0x15f   :  { %v812_v6 = vsel %vm806_vm7, %v799_v30, 920167782  ;;  %v815_v36 = vsel %vm803_vm2, %v793_v14, %v796_v38  ;;  %v816_v42 = vsel %vm806_vm7, %v802_v51, 1326507024  ;;  %vm760_vm11 = vweird.f32 %v5603_v34 }
 0x160   :  { %vm4223_vm9 = vcmp.lt.s32.totalorder %v4222_v22, 0  ;;  %v809_v62 = vsel %vm805_vm5, %v793_v14, %v808_v19  ;;  %v813_v7 = vsel %vm805_vm5, %v796_v38, %v812_v6  ;;  %v817_v13 = vsel %vm805_vm5, %v799_v30, %v816_v42 }
 0x161   :  { %v1460_v43 = vsel %vm4223_vm9, 0, %v4222_v22  ;;  %v1476_v61 = vsel %vm1391_vm0, %v1475_v21, %v5872_v1  ;;  %v814_v40 = vsel %vm804_vm4, %v811_v8, %v813_v7  ;;  %v818_v53 = vsel %vm804_vm4, %v815_v36, %v817_v13 }
 0x162   :  { %v1461_v2 = vsub.s32 32, %v1460_v43  ;;  %v1462_v24 = vshll.u32 %v5887_v11, %v1460_v43  ;;  %v1465_v57 = vsub.s32 4294967266, %v1460_v43  ;;  %v810_v12 = vsel %vm804_vm4, %v807_v56, %v809_v62 }
 0x163   :  { %v5933_v17 = vmul.u32.u64.low %v5897_v23, %v818_v53  ;;  %v5934_v50 = vmul.u32.u64.high %v5897_v23, %v818_v53, %v5933_v17  ;;  %v5937_v44 = vmul.u32.u64.low %v5897_v23, %v814_v40  ;;  %v5938_v25 = vmul.u32.u64.high %v5897_v23, %v814_v40, %v5937_v44 }
 0x164   :  { %v1463_v1 = vshrl.u32 %v1445_v26, %v1461_v2  ;;  %v1466_v18 = vadd.s32 127, %v1465_v57  ;;  %vm2417_vm13 = vcmp.lt.s32.totalorder %v5877_v10, 2  ;;  %v4224_v49 = vadd.s32 4294967169, %v1496_v27 }
 0x165   :  { %v4493_v0 = vpop.eup %4492  ;;  %v1478_v11 = vsel %vm5911_vm1, 0, %v1476_v61  ;;  %vm2418_vm10 = vcmp.eq.s32.totalorder %v5877_v10, 0  ;;  %vm2421_vm12 = vcmp.eq.s32.totalorder %v5877_v10, 2  ;;  %v826_v9 = vmul.u32 %v5897_v23, %v810_v12 }
 0x166   :  { %v4495_v60 = vpop.eup %4494  ;;  %v767_v63 = vxor.u32 2147483648, %v4493_v0  ;;  %v1464_v28 = vor.u32 %v1463_v1, %v1462_v24  ;;  %v1467_v58 = vshll.u32 %v1466_v18, 23  ;;  %v1502_v54 = vadd.s32 1, %v4224_v49  ;;  %v5995_v49 = vld [vmem:[%s6436_s1 + $0x78] sm:$0xff] }
 0x167   :  { %v764_v16 = vxor.u32 2147483648, %v4495_v60  ;;  %v3143_v52 = vadd.s32 3, %v1478_v11  ;;  %vm828_vm14 = vc.u32 %v5934_v50, %v5937_v44  ;;  %v829_v3 = vadd.s32 1, %v5938_v25 }
 0x168   :  { %v768_v4 = vsel %vm766_vm3, %v767_v63, %v4495_v60  ;;  %v1468_v32 = vor.u32 4788187, %v1467_v58  ;;  %v1471_v41 = vcvt.s32.f32 %v1464_v28  ;;  %v2423_v23 = vsel %vm2421_vm12, %v767_v63, %v4495_v60 }
 0x169   :  { %v765_v48 = vsel %vm763_vm6, %v4493_v0, %v764_v16  ;;  %v2420_v14 = vsel %vm2418_vm10, %v4493_v0, %v764_v16  ;;  %v830_v38 = vsel %vm828_vm14, %v829_v3, %v5938_v25  ;;  %vm1503_vm15 = vcmp.gt.s32.totalorder %v1502_v54, 0 }
 0x16a   :  { %v769_v30 = vsel %vm762_vm8, %v765_v48, %v768_v4  ;;  %v1469_v51 = vand.u32 2147483647, %v1468_v32  ;;  %v2424_v26 = vsel %vm2417_vm13, %v2420_v14, %v2423_v23  ;;  %v831_v15 = vadd.s32 %v830_v38, %v826_v9 }
 0x16b   :  { %v770_v21 = vsel %vm760_vm11, nan, %v769_v30  ;;  %v1499_v27 = vand.u32 8388607, %v1492_v46  ;;  %v1504_v22 = vsel %vm1503_vm15, %v1502_v54, 0  ;;  %v5967_v6 = vand.u32 3, %v1478_v11 }
 0x16c   :  { %3411 = vperm.xlu0 %4446, %v770_v21   ;;  %v1472_v56 = vmul.f32 %v1471_v41, %v1469_v51  ;;  %v832_v8 = vadd.s32 536870912, %v831_v15  ;;  %v1506_v19 = vand.u32 31, %v1504_v22  ;;  %v2425_v5 = vsel %vm760_vm11, nan, %v2424_v26 }
 0x16d   :  { %v5971_v10 = vand.u32 3, %v3143_v52  ;;  %v1500_v7 = vor.u32 8388608, %v1499_v27  ;;  %v1505_v13 = vshrl.u32 %v1504_v22, 5  ;;  %v1598_v58 = vand.u32 2139095040, %v5995_v49 }
 0x16e   :  { %v1473_v36 = vxor.u32 2147483648, %v1472_v56  ;;  %v5973_v42 = vshrl.u32 %v832_v8, 30  ;;  %v1507_v62 = vsub.s32 32, %v1506_v19  ;;  %v1509_v43 = vshll.u32 %v4573_v29, %v1506_v19 }
 0x16f   :  { %v1512_v61 = vshll.u32 %v4574_v31, %v1506_v19  ;;  %v1515_v34 = vshll.u32 %v4575_v33, %v1506_v19  ;;  %v1518_v2 = vshll.u32 %v4576_v35, %v1506_v19  ;;  %v1521_v18 = vshll.u32 %v4577_v37, %v1506_v19 }
 0x170   :  { %v1474_v40 = vsel %vm1391_vm0, %v1473_v36, %v1472_v56  ;;  %3514 = vperm.xlu0 %4446, %v2425_v5   ;;  %v834_v53 = vshll.u32 %v5973_v42, 30  ;;  %v1510_v57 = vshrl.u32 %v4574_v31, %v1507_v62  ;;  %v1513_v12 = vshrl.u32 %v4575_v33, %v1507_v62 }
 0x171   :  { %v1477_v24 = vsel %vm5911_vm1, %v5681_v47, %v1474_v40  ;;  %v1516_v17 = vshrl.u32 %v4576_v35, %v1507_v62  ;;  %v1519_v1 = vshrl.u32 %v4577_v37, %v1507_v62  ;;  %v1508_v59 = vshrl.u32 %v4573_v29, %v1507_v62 }
 0x172   :  { %4496 = vcosq.f32 %v1477_v24  ;;  %v5988_v25 = vsub.s32 %v831_v15, %v834_v53  ;;  %v1511_v0 = vor.u32 %v1510_v57, %v1509_v43  ;;  %v1514_v11 = vor.u32 %v1513_v12, %v1512_v61 }
 0x173   :  { %4498 = vsinq.f32 %v1477_v24  ;;  %vm1487_vm0 = vcmp.eq.s32.totalorder %v5967_v6, 2  ;;  %v1517_v60 = vor.u32 %v1516_v17, %v1515_v34  ;;  %v1520_v63 = vor.u32 %v1519_v1, %v1518_v2 }
 0x174   :  { %v837_v9 = vsub.s32 0, %v5988_v25  ;;  %vm1484_vm1 = vcmp.eq.s32.totalorder %v5967_v6, 0  ;;  %vm3146_vm2 = vcmp.eq.s32.totalorder %v5971_v10, 0  ;;  %v1522_v28 = vshrl.u32 %v4578_v45, %v1507_v62 }
 0x175   :  { %vm1524_vm3 = vcmp.lt.s32.totalorder %v1505_v13, 1  ;;  %vm1483_vm4 = vcmp.lt.s32.totalorder %v5967_v6, 2  ;;  %vm3145_vm5 = vcmp.lt.s32.totalorder %v5971_v10, 2  ;;  %vm1525_vm6 = vcmp.lt.s32.totalorder %v1505_v13, 2 }
 0x176   :  { %v4197_v54 = vmin.u32 %v837_v9, %v5988_v25  ;;  %vm1526_vm7 = vcmp.lt.s32.totalorder %v1505_v13, 3  ;;  %v1540_v16 = vshll.u32 %v1500_v7, 8  ;;  %vm1481_vm8 = vweird.f32 %v5681_v47 }
 0x177   :  { %v1523_v52 = vor.u32 %v1522_v28, %v1521_v18  ;;  %vm1527_vm11 = vcmp.lt.s32.totalorder %v1505_v13, 4  ;;  %v1528_v3 = vsel %vm1524_vm3, %v1508_v59, %v1511_v0  ;;  %v1532_v4 = vsel %vm1524_vm3, %v1511_v0, %v1514_v11 }
 0x178   :  { %v839_v32 = vclz %v4197_v54  ;;  %v1529_v41 = vsel %vm1527_vm11, %v1517_v60, 2102212464  ;;  %v1533_v23 = vsel %vm1527_vm11, %v1520_v63, 920167782  ;;  %v1536_v48 = vsel %vm1524_vm3, %v1514_v11, %v1517_v60 }
 0x179   :  { %vm3149_vm9 = vcmp.eq.s32.totalorder %v5971_v10, 2  ;;  %vm773_vm13 = vcmp.lt.s32.totalorder %v5820_v55, 0  ;;  %v1530_v14 = vsel %vm1526_vm7, %v1514_v11, %v1529_v41  ;;  %v1534_v38 = vsel %vm1526_vm7, %v1517_v60, %v1533_v23 }
 0x17a   :  { %v1537_v30 = vsel %vm1527_vm11, %v1523_v52, 1326507024  ;;  %v4198_v51 = vadd.s32 4294967294, %v839_v32  ;;  %v1531_v26 = vsel %vm1525_vm6, %v1528_v3, %v1530_v14  ;;  %v1535_v15 = vsel %vm1525_vm6, %v1532_v4, %v1534_v38 }
 0x17b   :  { %v1538_v21 = vsel %vm1526_vm7, %v1520_v63, %v1537_v30  ;;  %v6019_v22 = vmul.u32.u64.low %v1540_v16, %v1535_v15  ;;  %v6020_v56 = vmul.u32.u64.high %v1540_v16, %v1535_v15, %v6019_v22  ;;  %v1599_v8 = vshrl.u32 %v1598_v58, 23 }
 0x17c   :  { %v1539_v27 = vsel %vm1525_vm6, %v1536_v48, %v1538_v21  ;;  %v4497_v19 = vpop.eup %4496  ;;  %v827_v5 = vadd.s32 %v5937_v44, %v5934_v50  ;;  %vm4199_vm10 = vcmp.lt.s32.totalorder %v4198_v51, 0  ;;  %v857_v40 = vsub.s32 4, %v5973_v42 }
 0x17d   :  { %v6025_v36 = vmul.u32.u64.low %v1540_v16, %v1539_v27  ;;  %v6026_v62 = vmul.u32.u64.high %v1540_v16, %v1539_v27, %v6025_v36  ;;  %v4499_v7 = vpop.eup %4498  ;;  %v1488_v43 = vxor.u32 2147483648, %v4497_v19  ;;  %v842_v61 = vsel %vm4199_vm10, 0, %v4198_v51 }
 0x17e   :  { %v1547_v13 = vmul.u32 %v1540_v16, %v1531_v26  ;;  %v1485_v53 = vxor.u32 2147483648, %v4499_v7  ;;  %v843_v34 = vsub.s32 32, %v842_v61  ;;  %v844_v2 = vshll.u32 %v5988_v25, %v842_v61 }
 0x17f   :  { %v847_v24 = vsub.s32 4294967266, %v842_v61  ;;  %v1489_v57 = vsel %vm1487_vm0, %v1488_v43, %v4499_v7  ;;  %v3151_v50 = vsel %vm3149_vm9, %v1488_v43, %v4499_v7  ;;  %v1550_v44 = vadd.s32 1, %v6020_v56 }
 0x180   :  { %v4228_v12 = vadd.s32 4294967169, %v1599_v8  ;;  %v1486_v17 = vsel %vm1484_vm1, %v4497_v19, %v1485_v53  ;;  %v3148_v1 = vsel %vm3146_vm2, %v4497_v19, %v1485_v53  ;;  %v845_v18 = vshrl.u32 %v827_v5, %v843_v34  ;;  %v6078_v5 = vld [vmem:[%s6440_s5] sm:$0x1] }
 0x181   :  { %v848_v59 = vadd.s32 127, %v847_v24  ;;  %v1490_v25 = vsel %vm1483_vm4, %v1486_v17, %v1489_v57  ;;  %v3152_v0 = vsel %vm3145_vm5, %v3148_v1, %v3151_v50  ;;  %vm1549_vm12 = vc.u32 %v6026_v62, %v6019_v22 }
 0x182   :  { %v1595_v11 = vand.u32 2147483647, %v5995_v49  ;;  %v1491_v9 = vsel %vm1481_vm8, nan, %v1490_v25  ;;  %v846_v60 = vor.u32 %v845_v18, %v844_v2  ;;  %v858_v28 = vsel %vm773_vm13, %v857_v40, %v5973_v42 }
 0x183   :  { %v849_v63 = vshll.u32 %v848_v59, 23  ;;  %3446 = vperm.xlu1 %4447, %v1491_v9   ;;  %vm6053_vm14 = vcmp.le.f32.partialorder %v771_v20, 0.7853982  ;;  %v1551_v10 = vsel %vm1549_vm12, %v1550_v44, %v6020_v56  ;;  %v1605_v58 = vadd.s32 1, %v4228_v12 }
 0x184   :  { %v3153_v54 = vsel %vm1481_vm8, nan, %v3152_v0  ;;  %v853_v52 = vcvt.s32.f32 %v846_v60  ;;  %v1552_v3 = vadd.s32 %v1551_v10, %v1547_v13  ;;  %v860_v4 = vsel %vm6053_vm14, 0, %v858_v28 }
 0x185   :  { %v850_v16 = vor.u32 4788187, %v849_v63  ;;  %v1602_v42 = vand.u32 8388607, %v1595_v11  ;;  %vm1606_vm15 = vcmp.gt.s32.totalorder %v1605_v58, 0  ;;  %v2519_v41 = vadd.s32 3, %v860_v4 }
 0x186   :  { %v1553_v32 = vadd.s32 536870912, %v1552_v3  ;;  %v1607_v23 = vsel %vm1606_vm15, %v1605_v58, 0  ;;  %v6066_v47 = vand.u32 3, %v860_v4  ;;  %v1548_v2 = vadd.s32 %v6019_v22, %v6026_v62 }
 0x187   :  { %v851_v20 = vand.u32 2147483647, %v850_v16  ;;  %3549 = vperm.xlu1 %4447, %v3153_v54   ;;  %v1609_v48 = vand.u32 31, %v1607_v23  ;;  %v6069_v15 = vand.u32 3, %v2519_v41  ;;  %v1603_v21 = vor.u32 8388608, %v1602_v42 }
 0x188   :  { %v6064_v38 = vshrl.u32 %v1553_v32, 30  ;;  %v1608_v13 = vshrl.u32 %v1607_v23, 5  ;;  %v3636_v57 = vand.u32 2139095040, %v6078_v5  ;;  %vm1494_vm0 = vcmp.lt.s32.totalorder %v5882_v39, 0 }
 0x189   :  { %v854_v14 = vmul.f32 %v853_v52, %v851_v20  ;;  %v1610_v30 = vsub.s32 32, %v1609_v48  ;;  %v1612_v27 = vshll.u32 %v4573_v29, %v1609_v48  ;;  %v1615_v8 = vshll.u32 %v4574_v31, %v1609_v48 }
 0x18a   :  { %v1555_v26 = vshll.u32 %v6064_v38, 30  ;;  %v1621_v19 = vshll.u32 %v4576_v35, %v1609_v48  ;;  %v1618_v53 = vshll.u32 %v4575_v33, %v1609_v48  ;;  %v1624_v44 = vshll.u32 %v4577_v37, %v1609_v48 }
 0x18b   :  { %v855_v51 = vxor.u32 2147483648, %v854_v14  ;;  %v1613_v56 = vshrl.u32 %v4574_v31, %v1610_v30  ;;  %v1616_v43 = vshrl.u32 %v4575_v33, %v1610_v30  ;;  %v1622_v61 = vshrl.u32 %v4577_v37, %v1610_v30 }
 0x18c   :  { %v6082_v7 = vsub.s32 %v1552_v3, %v1555_v26  ;;  %v1619_v34 = vshrl.u32 %v4576_v35, %v1610_v30  ;;  %v1611_v50 = vshrl.u32 %v4573_v29, %v1610_v30  ;;  %v6098_v12 = vshll.u32 %v1603_v21, 8 }
 0x18d   :  { %v856_v36 = vsel %vm773_vm13, %v855_v51, %v854_v14  ;;  %vm869_vm1 = vcmp.eq.s32.totalorder %v6066_v47, 2  ;;  %vm2525_vm2 = vcmp.eq.s32.totalorder %v6069_v15, 2  ;;  %v1614_v22 = vor.u32 %v1613_v56, %v1612_v27 }
 0x18e   :  { %v859_v40 = vsel %vm6053_vm14, %v5820_v55, %v856_v36  ;;  %v1558_v24 = vsub.s32 0, %v6082_v7  ;;  %v1617_v62 = vor.u32 %v1616_v43, %v1615_v8  ;;  %v1623_v1 = vor.u32 %v1622_v61, %v1621_v19 }
 0x18f   :  { %4500 = vcosq.f32 %v859_v40  ;;  %vm866_vm3 = vcmp.eq.s32.totalorder %v6066_v47, 0  ;;  %vm2522_vm4 = vcmp.eq.s32.totalorder %v6069_v15, 0  ;;  %v1620_v18 = vor.u32 %v1619_v34, %v1618_v53 }
 0x190   :  { %4502 = vsinq.f32 %v859_v40  ;;  %v4225_v17 = vmin.u32 %v1558_v24, %v6082_v7  ;;  %v1625_v59 = vshrl.u32 %v4578_v45, %v1610_v30  ;;  %vm1627_vm5 = vcmp.lt.s32.totalorder %v1608_v13, 1 }
 0x191   :  { %v3633_v25 = vand.u32 2147483647, %v6078_v5  ;;  %vm865_vm6 = vcmp.lt.s32.totalorder %v6066_v47, 2  ;;  %vm2521_vm7 = vcmp.lt.s32.totalorder %v6069_v15, 2  ;;  %vm1629_vm8 = vcmp.lt.s32.totalorder %v1608_v13, 3 }
 0x192   :  { %v1560_v0 = vclz %v4225_v17  ;;  %vm1630_vm11 = vcmp.lt.s32.totalorder %v1608_v13, 4  ;;  %v3637_v9 = vshrl.u32 %v3636_v57, 23  ;;  %vm863_vm9 = vweird.f32 %v5820_v55  ;;  %v6140_v17 = vpop.permute.xlu0 %3850 }
 0x193   :  { %v1578_v60 = vsub.s32 4, %v6064_v38  ;;  %v1626_v63 = vor.u32 %v1625_v59, %v1624_v44  ;;  %vm1628_vm13 = vcmp.lt.s32.totalorder %v1608_v13, 2  ;;  %v1631_v28 = vsel %vm1627_vm5, %v1611_v50, %v1614_v22 }
 0x194   :  { %v4226_v6 = vadd.s32 4294967294, %v1560_v0  ;;  %v1632_v10 = vsel %vm1630_vm11, %v1620_v18, 2102212464  ;;  %v1635_v58 = vsel %vm1627_vm5, %v1614_v22, %v1617_v62  ;;  %v1636_v54 = vsel %vm1630_vm11, %v1623_v1, 920167782 }
 0x195   :  { %v1633_v16 = vsel %vm1629_vm8, %v1617_v62, %v1632_v10  ;;  %v1637_v52 = vsel %vm1629_vm8, %v1620_v18, %v1636_v54  ;;  %v1639_v3 = vsel %vm1627_vm5, %v1617_v62, %v1620_v18  ;;  %v1640_v4 = vsel %vm1630_vm11, %v1626_v63, 1326507024 }
 0x196   :  { %vm4227_vm10 = vcmp.lt.s32.totalorder %v4226_v6, 0  ;;  %v1634_v42 = vsel %vm1628_vm13, %v1631_v28, %v1633_v16  ;;  %v1638_v20 = vsel %vm1628_vm13, %v1635_v58, %v1637_v52  ;;  %v1641_v32 = vsel %vm1629_vm8, %v1623_v1, %v1640_v4  ;;  %v6163_v54 = vpop.permute.xlu0 %3863 }
 0x197   :  { %v1563_v41 = vsel %vm4227_vm10, 0, %v4226_v6  ;;  %v1642_v23 = vsel %vm1628_vm13, %v1639_v3, %v1641_v32  ;;  %v6118_v48 = vmul.u32.u64.low %v6098_v12, %v1638_v20  ;;  %v6119_v14 = vmul.u32.u64.high %v6098_v12, %v1638_v20, %v6118_v48  ;;  %v3382_v3 = vpop.permute.xlu1 %3381 }
 0x198   :  { %v1564_v51 = vsub.s32 32, %v1563_v41  ;;  %v1565_v26 = vshll.u32 %v6082_v7, %v1563_v41  ;;  %v1568_v21 = vsub.s32 4294967266, %v1563_v41  ;;  %v1579_v27 = vsel %vm1494_vm0, %v1578_v60, %v6064_v38 }
 0x199   :  { %v4501_v30 = vpop.eup %4500  ;;  %v6127_v19 = vmul.u32.u64.low %v6098_v12, %v1642_v23  ;;  %v6128_v36 = vmul.u32.u64.high %v6098_v12, %v1642_v23, %v6127_v19  ;;  %v4298_v43 = vadd.s32 4294967169, %v3637_v9  ;;  %v1650_v53 = vmul.u32 %v6098_v12, %v1634_v42 }
 0x19a   :  { %v4503_v56 = vpop.eup %4502  ;;  %v870_v8 = vxor.u32 2147483648, %v4501_v30  ;;  %v1566_v40 = vshrl.u32 %v1548_v2, %v1564_v51  ;;  %v1569_v13 = vadd.s32 127, %v1568_v21  ;;  %v1653_v38 = vadd.s32 1, %v6119_v14 }
 0x19b   :  { %v867_v61 = vxor.u32 2147483648, %v4503_v56  ;;  %v3643_v24 = vadd.s32 1, %v4298_v43  ;;  %vm1652_vm12 = vc.u32 %v6128_v36, %v6118_v48  ;;  %vm6152_vm14 = vcmp.le.f32.partialorder %v1492_v46, 0.7853982 }
 0x19c   :  { %v871_v7 = vsel %vm869_vm1, %v870_v8, %v4503_v56  ;;  %v2527_v34 = vsel %vm2525_vm2, %v870_v8, %v4503_v56  ;;  %v1567_v50 = vor.u32 %v1566_v40, %v1565_v26  ;;  %v1570_v44 = vshll.u32 %v1569_v13, 23  ;;  %v3485_v40 = vpop.permute.xlu0 %3484 }
 0x19d   :  { %v868_v57 = vsel %vm866_vm3, %v4501_v30, %v867_v61  ;;  %v2524_v2 = vsel %vm2522_vm4, %v4501_v30, %v867_v61  ;;  %v1581_v47 = vsel %vm6152_vm14, 0, %v1579_v27  ;;  %v1654_v15 = vsel %vm1652_vm12, %v1653_v38, %v6119_v14 }
 0x19e   :  { %v872_v12 = vsel %vm865_vm6, %v868_v57, %v871_v7  ;;  %v2528_v22 = vsel %vm2521_vm7, %v2524_v2, %v2527_v34  ;;  %v1571_v18 = vor.u32 4788187, %v1570_v44  ;;  %v1574_v59 = vcvt.s32.f32 %v1567_v50  ;;  %v6200_v34 = vpop.permute.xlu1 %3421 }
 0x19f   :  { %v873_v62 = vsel %vm863_vm9, nan, %v872_v12  ;;  %v3640_v0 = vand.u32 8388607, %v3633_v25  ;;  %vm3644_vm15 = vcmp.gt.s32.totalorder %v3643_v24, 0  ;;  %v2529_v60 = vsel %vm863_vm9, nan, %v2528_v22 }
 0x1a0   :  { %3416 = vperm.xlu0 %4446, %v873_v62   ;;  %v1572_v9 = vand.u32 2147483647, %v1571_v18  ;;  %v1655_v46 = vadd.s32 %v1654_v15, %v1650_v53  ;;  %v3645_v63 = vsel %vm3644_vm15, %v3643_v24, 0  ;;  %v3247_v28 = vadd.s32 3, %v1581_v47 }
 0x1a1   :  { %v3647_v6 = vand.u32 31, %v3645_v63  ;;  %v3641_v16 = vor.u32 8388608, %v3640_v0  ;;  %v6165_v42 = vand.u32 3, %v1581_v47  ;;  %v3646_v26 = vshrl.u32 %v3645_v63, 5  ;;  %v6223_v0 = vpop.permute.xlu0 %3386 }
 0x1a2   :  { %v1575_v10 = vmul.f32 %v1574_v59, %v1572_v9  ;;  %v1656_v58 = vadd.s32 536870912, %v1655_v46  ;;  %v6170_v32 = vand.u32 3, %v3247_v28  ;;  %vm1584_vm6 = vweird.f32 %v5882_v39  ;;  %v3525_v9 = vpop.permute.xlu1 %3524 }
 0x1a3   :  { %v3648_v52 = vsub.s32 32, %v3647_v6  ;;  %v3650_v55 = vshll.u32 %v4573_v29, %v3647_v6  ;;  %v3653_v23 = vshll.u32 %v4574_v31, %v3647_v6  ;;  %v3656_v21 = vshll.u32 %v4575_v33, %v3647_v6 }
 0x1a4   :  { %3519 = vperm.xlu0 %4446, %v2529_v60   ;;  %v1576_v4 = vxor.u32 2147483648, %v1575_v10  ;;  %v6167_v20 = vshrl.u32 %v1656_v58, 30  ;;  %v6182_v56 = vshll.u32 %v3641_v16, 8  ;;  %v3659_v61 = vshll.u32 %v4576_v35, %v3647_v6 }
 0x1a5   :  { %v3651_v41 = vshrl.u32 %v4574_v31, %v3648_v52  ;;  %v3654_v14 = vshrl.u32 %v4575_v33, %v3648_v52  ;;  %v3649_v8 = vshrl.u32 %v4573_v29, %v3648_v52  ;;  %v3657_v31 = vshrl.u32 %v4576_v35, %v3648_v52  ;;  %v6192_v33 = vld [vmem:[%s6438_s3] ss:$0 sm:$0xff] }
 0x1a6   :  { %v1577_v30 = vsel %vm1494_vm0, %v1576_v4, %v1575_v10  ;;  %v1658_v51 = vshll.u32 %v6167_v20, 30  ;;  %v3660_v7 = vshrl.u32 %v4577_v37, %v3648_v52  ;;  %v6198_v29 = vld [vmem:[%s6437_s2] ss:$0 sm:$0xff]  ;;  %vm1590_vm0 = vcmp.eq.s32.totalorder %v6165_v42, 2 }
 0x1a7   :  { %v1580_v27 = vsel %vm6152_vm14, %v5882_v39, %v1577_v30  ;;  %v3652_v43 = vor.u32 %v3651_v41, %v3650_v55  ;;  %v3655_v13 = vor.u32 %v3654_v14, %v3653_v23  ;;  %v3658_v53 = vor.u32 %v3657_v31, %v3656_v21 }
 0x1a8   :  { %4504 = vcosq.f32 %v1580_v27  ;;  %v6186_v19 = vsub.s32 %v1655_v46, %v1658_v51  ;;  %vm3665_vm1 = vcmp.lt.s32.totalorder %v3646_v26, 1  ;;  %vm3668_vm2 = vcmp.lt.s32.totalorder %v3646_v26, 4 }
 0x1a9   :  { %4506 = vsinq.f32 %v1580_v27  ;;  %v3662_v38 = vshll.u32 %v4577_v37, %v3647_v6  ;;  %vm1587_vm3 = vcmp.eq.s32.totalorder %v6165_v42, 0  ;;  %v3661_v24 = vor.u32 %v3660_v7, %v3659_v61  ;;  %v6248_v61 = vpop.permute.xlu0 %3489 }
 0x1aa   :  { %v1661_v35 = vsub.s32 0, %v6186_v19  ;;  %v3663_v57 = vshrl.u32 %v4578_v45, %v3648_v52  ;;  %v3670_v50 = vsel %vm3668_vm2, %v3658_v53, 2102212464  ;;  %v3568_v44 = vmul.f32 %v6192_v33, %v3485_v40 }
 0x1ab   :  { %vm1586_vm4 = vcmp.lt.s32.totalorder %v6165_v42, 2  ;;  %vm3667_vm5 = vcmp.lt.s32.totalorder %v3646_v26, 3  ;;  %v3669_v12 = vsel %vm3665_vm1, %v3649_v8, %v3652_v43  ;;  %v3465_v22 = vmul.f32 %v6198_v29, %v3382_v3 }
 0x1ac   :  { %v4229_v2 = vmin.u32 %v1661_v35, %v6186_v19  ;;  %vm3666_vm7 = vcmp.lt.s32.totalorder %v3646_v26, 2  ;;  %v3664_v37 = vor.u32 %v3663_v57, %v3662_v38  ;;  %v3671_v62 = vsel %vm3667_vm5, %v3655_v13, %v3670_v50 }
 0x1ad   :  { %v3673_v45 = vsel %vm3665_vm1, %v3652_v43, %v3655_v13  ;;  %vm3249_vm8 = vcmp.lt.s32.totalorder %v6170_v32, 2  ;;  %vm3250_vm11 = vcmp.eq.s32.totalorder %v6170_v32, 0  ;;  %v3674_v18 = vsel %vm3668_vm2, %v3661_v24, 920167782 }
 0x1ae   :  { %v1663_v1 = vclz %v4229_v2  ;;  %vm3253_vm9 = vcmp.eq.s32.totalorder %v6170_v32, 2  ;;  %v3672_v59 = vsel %vm3666_vm7, %v3669_v12, %v3671_v62  ;;  %v3675_v47 = vsel %vm3667_vm5, %v3658_v53, %v3674_v18 }
 0x1af   :  { %v3677_v15 = vsel %vm3665_vm1, %v3655_v13, %v3658_v53  ;;  %v1651_v60 = vadd.s32 %v6118_v48, %v6128_v36  ;;  %v3676_v63 = vsel %vm3666_vm7, %v3673_v45, %v3675_v47  ;;  %v3678_v28 = vsel %vm3668_vm2, %v3664_v37, 1326507024  ;;  %v3362_v53 = vld [vmem:[%s6435_s0] sm:$0xff]  ;;  %v6274_v45 = vpop.permute.xlu0 %3391 }
 0x1b0   :  { %v4230_v46 = vadd.s32 4294967294, %v1663_v1  ;;  %v3679_v6 = vsel %vm3667_vm5, %v3661_v24, %v3678_v28  ;;  %v6231_v10 = vmul.u32.u64.low %v6182_v56, %v3676_v63  ;;  %v6232_v58 = vmul.u32.u64.high %v6182_v56, %v3676_v63, %v6231_v10 }
 0x1b1   :  { %v3584_v16 = vsub.f32 %v3465_v22, %v3568_v44  ;;  %v3680_v3 = vsel %vm3666_vm7, %v3677_v15, %v3679_v6  ;;  %v3688_v4 = vmul.u32 %v6182_v56, %v3672_v59  ;;  %v3576_v48 = vmul.f32 %v6192_v33, %v3525_v9 }
 0x1b2   :  { %v4505_v52 = vpop.eup %4504  ;;  %vm4231_vm13 = vcmp.lt.s32.totalorder %v4230_v46, 0  ;;  %v6239_v23 = vmul.u32.u64.low %v6182_v56, %v3680_v3  ;;  %v6240_v14 = vmul.u32.u64.high %v6182_v56, %v3680_v3, %v6239_v23  ;;  %v3691_v31 = vadd.s32 1, %v6232_v58 }
 0x1b3   :  { %v4507_v36 = vpop.eup %4506  ;;  %v1591_v55 = vxor.u32 2147483648, %v4505_v52  ;;  %v1666_v41 = vsel %vm4231_vm13, 0, %v4230_v46  ;;  %v3600_v43 = vand.u32 2147483647, %v3584_v16  ;;  %v3473_v38 = vmul.f32 %v6198_v29, %v6200_v34  ;;  %v3370_v34 = vld [vmem:[%s6435_s0 + $0x40] sm:$0xff]  ;;  %v6284_v46 = vpop.permute.xlu0 %3494 }
 0x1b4   :  { %v1588_v30 = vxor.u32 2147483648, %v4507_v36  ;;  %v1667_v51 = vsub.s32 32, %v1666_v41  ;;  %v1668_v21 = vshll.u32 %v6186_v19, %v1666_v41  ;;  %v1671_v27 = vsub.s32 4294967266, %v1666_v41  ;;  %v6288_v16 = vpop.permute.xlu1 %3426 }
 0x1b5   :  { %v1592_v26 = vsel %vm1590_vm0, %v1591_v55, %v4507_v36  ;;  %v3255_v8 = vsel %vm3253_vm9, %v1591_v55, %v4507_v36  ;;  %vm3690_vm10 = vc.u32 %v6240_v14, %v6231_v10  ;;  %v3592_v2 = vsub.f32 %v3473_v38, %v3576_v48 }
 0x1b6   :  { %v1589_v56 = vsel %vm1587_vm3, %v4505_v52, %v1588_v30  ;;  %v3252_v40 = vsel %vm3250_vm11, %v4505_v52, %v1588_v30  ;;  %v1669_v13 = vshrl.u32 %v1651_v60, %v1667_v51  ;;  %v1672_v19 = vadd.s32 127, %v1671_v27 }
 0x1b7   :  { %v1593_v7 = vsel %vm1586_vm4, %v1589_v56, %v1592_v26  ;;  %v3256_v35 = vsel %vm3249_vm8, %v3252_v40, %v3255_v8  ;;  %v3692_v42 = vsel %vm3690_vm10, %v3691_v31, %v6232_v58  ;;  %v3616_v32 = vsub.f32 %v3362_v53, %v3600_v43 }
 0x1b8   :  { %v1594_v24 = vsel %vm1584_vm6, nan, %v1593_v7  ;;  %v1670_v57 = vor.u32 %v1669_v13, %v1668_v21  ;;  %v1673_v50 = vshll.u32 %v1672_v19, 23  ;;  %v3257_v44 = vsel %vm1584_vm6, nan, %v3256_v35  ;;  %v6292_v41 = vpop.permute.xlu1 %3529 }
 0x1b9   :  { %3451 = vperm.xlu1 %4447, %v1594_v24   ;;  %v3693_v37 = vadd.s32 %v3692_v42, %v3688_v4  ;;  %vm3870_vm12 = vcmask 48128   ;;  %v3608_v62 = vand.u32 2147483647, %v3592_v2  ;;  %v1681_v47 = vsub.s32 4, %v6167_v20 }
 0x1ba   :  { %v1674_v12 = vor.u32 4788187, %v1673_v50  ;;  %v1677_v22 = vcvt.s32.f32 %v1670_v57  ;;  %4342 = vmatprep.mubr.msk.f32.mxu0 %vm3870_vm12, %v3616_v32  ;;  %vm1597_vm14 = vcmp.lt.s32.totalorder %v5995_v49, 0  ;;  %vm1596_vm15 = vcmp.le.f32.partialorder %v1595_v11, 0.7853982  ;;  %v6290_v11 = vpop.permute.xlu0 %3396 }
 0x1bb   :  { %v3694_v39 = vadd.s32 536870912, %v3693_v37  ;;  %v3624_v18 = vsub.f32 %v3370_v34, %v3608_v62  ;;  %v1682_v28 = vsel %vm1597_vm14, %v1681_v47, %v6167_v20  ;;  %v3689_v20 = vadd.s32 %v6231_v10, %v6240_v14 }
 0x1bc   :  { %v1675_v1 = vand.u32 2147483647, %v1674_v12  ;;  %v1684_v3 = vsel %vm1596_vm15, 0, %v1682_v28  ;;  %v6298_v40 = vpop.permute.xlu1 %3431  ;;  %vm1687_vm7 = vweird.f32 %v5995_v49  ;;  %vm3635_vm8 = vcmp.lt.s32.totalorder %v6078_v5, 0 }
 0x1bd   :  { %3554 = vperm.xlu1 %4447, %v3257_v44   ;;  %v6277_v15 = vshrl.u32 %v3694_v39, 30  ;;  %4354 = vmatprep.mubr.msk.f32.mxu1 %vm3870_vm12, %v3624_v18  ;;  %v3351_v4 = vadd.s32 3, %v1684_v3  ;;  %v1688_v55 = vand.u32 3, %v1684_v3  ;;  %vm3634_vm11 = vcmp.le.f32.partialorder %v3633_v25, 0.7853982 }
 0x1be   :  { %v1678_v59 = vmul.f32 %v1677_v22, %v1675_v1  ;;  %v6296_v21 = vpop.permute.xlu0 %3499  ;;  %vm3725_vm9 = vweird.f32 %v6078_v5  ;;  %v3569_v25 = vmul.f32 %v6192_v33, %v6248_v61  ;;  %v3577_v61 = vmul.f32 %v6192_v33, %v6292_v41 }
 0x1bf   :  { %v3696_v60 = vshll.u32 %v6277_v15, 30  ;;  %v3352_v23 = vand.u32 3, %v3351_v4  ;;  %vm1693_vm1 = vcmp.eq.s32.totalorder %v1688_v55, 2  ;;  %vm1689_vm3 = vcmp.lt.s32.totalorder %v1688_v55, 2 }
 0x1c0   :  { %v1679_v9 = vxor.u32 2147483648, %v1678_v59  ;;  %vm1690_vm4 = vcmp.eq.s32.totalorder %v1688_v55, 0  ;;  %v3535_v12 = vpop.permute.xlu1 %3534  ;;  %v3466_v55 = vmul.f32 %v6198_v29, %v6223_v0 }
 0x1c1   :  { %v3697_v6 = vsub.s32 %v3693_v37, %v3696_v60  ;;  %vm3357_vm2 = vcmp.eq.s32.totalorder %v3352_v23, 2  ;;  %vm3354_vm5 = vcmp.eq.s32.totalorder %v3352_v23, 0  ;;  %vm3353_vm6 = vcmp.lt.s32.totalorder %v3352_v23, 2 }
 0x1c2   :  { %v1680_v63 = vsel %vm1597_vm14, %v1679_v9, %v1678_v59  ;;  %v6304_v44 = vpop.permute.xlu0 %3401  ;;  %v3719_v37 = vsub.s32 4, %v6277_v15 }
 0x1c3   :  { %v1683_v58 = vsel %vm1596_vm15, %v5995_v49, %v1680_v63  ;;  %v3699_v52 = vsub.s32 0, %v3697_v6  ;;  %v3843_v63 = vlaneseq }
 0x1c4   :  { %4508 = vcosq.f32 %v1683_v58  ;;  %v3720_v39 = vsel %vm3635_vm8, %v3719_v37, %v6277_v15  ;;  %v3437_v18 = vpop.permute.xlu1 %3436 }
 0x1c5   :  { %4510 = vsinq.f32 %v1683_v58  ;;  %v4299_v48 = vmin.u32 %v3699_v52, %v3697_v6  ;;  %v3722_v9 = vsel %vm3634_vm11, 0, %v3720_v39  ;;  %v3844_v58 = vshrl.u32 %v3843_v63, 7 }
 0x1c6   :  { %v3505_v62 = vpop.permute.xlu0 %3504  ;;  %v3829_v28 = vadd.s32 3, %v3722_v9  ;;  %v3726_v52 = vand.u32 3, %v3722_v9 }
 0x1c7   :  { %v3701_v36 = vclz %v4299_v48 }
 0x1c8   :  { %v3830_v3 = vand.u32 3, %v3829_v28  ;;  %vm3731_vm13 = vcmp.eq.s32.totalorder %v3726_v52, 2  ;;  %vm3728_vm14 = vcmp.eq.s32.totalorder %v3726_v52, 0 }
 0x1c9   :  { %v4300_v30 = vadd.s32 4294967294, %v3701_v36  ;;  %v3845_v36 = vsub.s32 0, %v3844_v58  ;;  %v3372_v58 = vld [vmem:[%s6435_s0 + $0x50] sm:$0xff] }
 0x1ca   :  { %v6312_v60 = vpop.permute.xlu0 %3406  ;;  %vm3835_vm10 = vcmp.eq.s32.totalorder %v3830_v3, 2  ;;  %vm3832_vm15 = vcmp.eq.s32.totalorder %v3830_v3, 0 }
 0x1cb   :  { %vm4301_vm0 = vcmp.lt.s32.totalorder %v4300_v30, 0 }
 0x1cc   :  { %v3704_v51 = vsel %vm4301_vm0, 0, %v4300_v30  ;;  %vm3727_vm0 = vcmp.lt.s32.totalorder %v3726_v52, 2  ;;  %v3470_v52 = vmul.f32 %v6198_v29, %v6312_v60 }
 0x1cd   :  { %v3705_v26 = vsub.s32 32, %v3704_v51  ;;  %v3706_v8 = vshll.u32 %v3697_v6, %v3704_v51  ;;  %v3709_v31 = vsub.s32 4294967266, %v3704_v51  ;;  %v3540_v6 = vpop.permute.xlu1 %3539 }
 0x1ce   :  { %v4509_v27 = vpop.eup %4508  ;;  %v3510_v4 = vpop.permute.xlu0 %3509 }
 0x1cf   :  { %v4511_v43 = vpop.eup %4510  ;;  %v1694_v56 = vxor.u32 2147483648, %v4509_v27  ;;  %v3707_v10 = vshrl.u32 %v3689_v20, %v3705_v26  ;;  %v3710_v14 = vadd.s32 127, %v3709_v31  ;;  %v3570_v20 = vmul.f32 %v6192_v33, %v6284_v46 }
 0x1d0   :  { %v1691_v13 = vxor.u32 2147483648, %v4511_v43  ;;  %v3467_v31 = vmul.f32 %v6198_v29, %v6274_v45  ;;  %v3578_v46 = vmul.f32 %v6192_v33, %v3535_v12  ;;  %v3468_v12 = vmul.f32 %v6198_v29, %v6290_v11  ;;  %v3371_v11 = vld [vmem:[%s6435_s0 + $0x48] sm:$0xff] }
 0x1d1   :  { %v1695_v19 = vsel %vm1693_vm1, %v1694_v56, %v4511_v43  ;;  %v3359_v53 = vsel %vm3357_vm2, %v1694_v56, %v4511_v43  ;;  %v3708_v38 = vor.u32 %v3707_v10, %v3706_v8  ;;  %v3711_v24 = vshll.u32 %v3710_v14, 23  ;;  %v3442_v15 = vpop.permute.xlu1 %3441 }
 0x1d2   :  { %v1692_v7 = vsel %vm1690_vm4, %v4509_v27, %v1691_v13  ;;  %v3356_v35 = vsel %vm3354_vm5, %v4509_v27, %v1691_v13  ;;  %vm3831_vm1 = vcmp.lt.s32.totalorder %v3830_v3, 2  ;;  %v3585_v8 = vsub.f32 %v3466_v55, %v3569_v25 }
 0x1d3   :  { %v1696_v57 = vsel %vm1689_vm3, %v1692_v7, %v1695_v19  ;;  %v3360_v50 = vsel %vm3353_vm6, %v3356_v35, %v3359_v53  ;;  %v3712_v2 = vor.u32 4788187, %v3711_v24  ;;  %v3715_v32 = vcvt.s32.f32 %v3708_v38 }
 0x1d4   :  { %v1697_v42 = vsel %vm1687_vm7, nan, %v1696_v57  ;;  %v3361_v22 = vsel %vm1687_vm7, nan, %v3360_v50  ;;  %v3474_v13 = vmul.f32 %v6198_v29, %v6288_v16  ;;  %v3475_v19 = vmul.f32 %v6198_v29, %v6298_v40 }
 0x1d5   :  { %3456 = vperm.xlu1 %4447, %v1697_v42   ;;  %v3713_v49 = vand.u32 2147483647, %v3712_v2  ;;  %v3545_v41 = vpop.permute.xlu1 %3544  ;;  %v3586_v7 = vsub.f32 %v3467_v31, %v3570_v20  ;;  %v3571_v16 = vmul.f32 %v6192_v33, %v6296_v21  ;;  %v3579_v57 = vmul.f32 %v6192_v33, %v3540_v6 }
 0x1d6   :  { %v3593_v35 = vsub.f32 %v3474_v13, %v3577_v61  ;;  %v3601_v50 = vand.u32 2147483647, %v3585_v8  ;;  %v3594_v42 = vsub.f32 %v3475_v19, %v3578_v46  ;;  %v3572_v40 = vmul.f32 %v6192_v33, %v3505_v62  ;;  %v3373_v61 = vld [vmem:[%s6435_s0 + $0x58] sm:$0xff]  ;;  %v3374_v8 = vld [vmem:[%s6435_s0 + $0x60] sm:$0xff]  ;;  %v3367_v13 = vld [vmem:[%s6435_s0 + $0x28] sm:$0xff] }
 0x1d7   :  { %v3716_v34 = vmul.f32 %v3715_v32, %v3713_v49  ;;  %v3580_v2 = vmul.f32 %v6192_v33, %v3545_v41  ;;  %v3602_v37 = vand.u32 2147483647, %v3586_v7  ;;  %v3587_v39 = vsub.f32 %v3468_v12, %v3571_v16 }
 0x1d8   :  { %v3609_v21 = vand.u32 2147483647, %v3593_v35  ;;  %vm3919_vm2 = vcmask 1045504  }
 0x1d9   :  { %3559 = vperm.xlu1 %4447, %v3361_v22   ;;  %v3717_v1 = vxor.u32 2147483648, %v3716_v34  ;;  %v3476_v22 = vmul.f32 %v6198_v29, %v3437_v18 }
 0x1da   :  { %v3625_v25 = vsub.f32 %v3371_v11, %v3609_v21 }
 0x1db   :  { %v3718_v59 = vsel %vm3635_vm8, %v3717_v1, %v3716_v34  ;;  %v3469_v34 = vmul.f32 %v6198_v29, %v6304_v44  ;;  %v3477_v1 = vmul.f32 %v6198_v29, %v3442_v15  ;;  %v3595_v18 = vsub.f32 %v3476_v22, %v3579_v57  ;;  %v3840_v44 = vld [vmem:[%s6439_s4] sm:$0x3f] }
 0x1dc   :  { %v3721_v47 = vsel %vm3634_vm11, %v6078_v5, %v3718_v59  ;;  %v3573_v59 = vmul.f32 %v6192_v33, %v3510_v4 }
 0x1dd   :  { %4512 = vcosq.f32 %v3721_v47  ;;  %v3588_v9 = vsub.f32 %v3469_v34, %v3572_v40  ;;  %v3596_v63 = vsub.f32 %v3477_v1, %v3580_v2  ;;  %v3611_v55 = vand.u32 2147483647, %v3595_v18 }
 0x1de   :  { %4514 = vsinq.f32 %v3721_v47  ;;  %v3610_v47 = vand.u32 2147483647, %v3594_v42 }
 0x1df   :  { %v3612_v60 = vand.u32 2147483647, %v3596_v63 }
 0x1e0   :  { %v3626_v20 = vsub.f32 %v3372_v58, %v3610_v47  ;;  %v3377_v47 = vld [vmem:[%s6435_s0 + $0x78] sm:$0xff] }
 0x1e1   :  { %v3628_v46 = vsub.f32 %v3374_v8, %v3612_v60 }
 0x1e7   :  { %v4513_v48 = vpop.eup %4512 }
 0x1e8   :  { %v4515_v23 = vpop.eup %4514  ;;  %v3732_v30 = vxor.u32 2147483648, %v4513_v48 }
 0x1e9   :  { %v3729_v51 = vxor.u32 2147483648, %v4515_v23 }
 0x1ea   :  { %v3733_v27 = vsel %vm3731_vm13, %v3732_v30, %v4515_v23  ;;  %v3837_v26 = vsel %vm3835_vm10, %v3732_v30, %v4515_v23  ;;  %v3589_v23 = vsub.f32 %v3470_v52, %v3573_v59  ;;  %v3365_v30 = vld [vmem:[%s6435_s0 + $0x18] sm:$0xff] }
 0x1eb   :  { %v3412_v0 = vpop.permute.xlu0 %3411  ;;  %v3730_v43 = vsel %vm3728_vm14, %v4513_v48, %v3729_v51  ;;  %v3834_v56 = vsel %vm3832_vm15, %v4513_v48, %v3729_v51  ;;  %v3604_v51 = vand.u32 2147483647, %v3588_v9 }
 0x1ec   :  { %v3734_v10 = vsel %vm3727_vm0, %v3730_v43, %v3733_v27  ;;  %v3838_v14 = vsel %vm3831_vm1, %v3834_v56, %v3837_v26  ;;  %v3471_v15 = vmul.f32 %v6198_v29, %v3412_v0  ;;  %v3366_v26 = vld [vmem:[%s6435_s0 + $0x20] sm:$0xff]  ;;  %v3627_v0 = vsub.f32 %v3373_v61, %v3611_v55 }
 0x1ed   :  { %v3735_v53 = vsel %vm3725_vm9, nan, %v3734_v10  ;;  %v3839_v45 = vsel %vm3725_vm9, nan, %v3838_v14  ;;  %v3605_v43 = vand.u32 2147483647, %v3589_v23  ;;  %v3620_v56 = vsub.f32 %v3366_v26, %v3604_v51  ;;  %v3368_v14 = vld [vmem:[%s6435_s0 + $0x30] sm:$0xff] }
 0x1ee   :  { %v3846_v38 = vrot.slane %v3735_v53, %v3845_v36  ;;  %v3859_v24 = vrot.slane %v3839_v45, %v3845_v36  ;;  %v3603_v36 = vand.u32 2147483647, %v3587_v39 }
 0x1ef   :  { %v3515_v49 = vpop.permute.xlu0 %3514  ;;  %v3621_v19 = vsub.f32 %v3367_v13, %v3605_v43 }
 0x1f0   :  { %v3853_v32 = vmul.f32 %v6140_v17, %v3846_v38  ;;  %v3866_v5 = vmul.f32 %v6163_v54, %v3859_v24  ;;  %v3363_v17 = vld [vmem:[%s6435_s0 + $0x8] sm:$0xff]  ;;  %v3364_v54 = vld [vmem:[%s6435_s0 + $0x10] sm:$0xff]  ;;  %v3574_v28 = vmul.f32 %v6192_v33, %v3515_v49  ;;  %v3619_v31 = vsub.f32 %v3365_v30, %v3603_v36 }
 0x1f1   :  { %v3617_v3 = vsub.f32 %v3363_v17, %v3601_v50  ;;  %v3618_v4 = vsub.f32 %v3364_v54, %v3602_v37  ;;  %v3375_v24 = vld [vmem:[%s6435_s0 + $0x68] sm:$0xff] }
 0x1f2   :  { %v3867_v62 = vsub.f32 %v3853_v32, %v3866_v5  ;;  %v3590_v27 = vsub.f32 %v3471_v15, %v3574_v28  ;;  %v3369_v5 = vld [vmem:[%s6435_s0 + $0x38] sm:$0xff] }
 0x1f4   :  { %v3868_v6 = vand.u32 2147483647, %v3867_v62  ;;  %v3606_v10 = vand.u32 2147483647, %v3590_v27  ;;  %v3376_v62 = vld [vmem:[%s6435_s0 + $0x70] sm:$0xff]  ;;  %s4579_s0 = smov [#allocation2]  }
 0x1f5   :  { %s4157_s22 = sshll.u32 %s4579_s0, 4  ;;  %s4158_s22 = int_to_ptr.vmem [resolvable:$true] %s4157_s22 }
 0x1f6   :  { %v3869_v48 = vsub.f32 %v3840_v44, %v3868_v6  ;;  %v3622_v41 = vsub.f32 %v3368_v14, %v3606_v10  ;;  %s4548_s23 = scalar_lea.vmem %s4158_s22, 2048  ;;  %p4553_p1 = scmp.lt.s32.totalorder %s4158_s22, %s4158_s22 }
 0x1f7   :  { %p4549_p0 = scmp.ne.s32.totalorder %s4158_s22, %s4548_s23  ;;  %p4554_p2 = scmp.lt.s32.totalorder %s4548_s23, %s4548_s23 }
 0x1f8   :  { %4340 = vmatprep.subr.msk.mxu0 %vm3919_vm2, %v3869_v48  ;;  %4366 = vmatprep.subr.msk.mxu1 %vm3919_vm2, %v3869_v48 }
 0x1f9   :  { %4341 = vmatpush3.msk.msra.mxu0 %vm3919_vm2, %v3869_v48  ;;  %4367 = vmatpush3.msk.msra.mxu1 %vm3919_vm2, %v3869_v48  ;;  %p4555_p3 = por %p4554_p2, %p4553_p1 }
 0x1fa   :  { %4343 = vmatmul.mubr.msk.f32.vlgmr.msra.gmra.mrb[0].mxu0 %vm3870_vm12, %v3617_v3  ;;  %4355 = vmatmul.mubr.msk.f32.vlgmr.msra.gmra.mrb[0].mxu1 %vm3870_vm12, %v3625_v25 }
 0x1fb   :  { %4345 = vmatprep.mubr.msk.f32.mxu0 %vm3870_vm12, %v3618_v4  ;;  %4357 = vmatprep.mubr.msk.f32.mxu1 %vm3870_vm12, %v3626_v20  ;;  %p4556_p4 = pnand %p4555_p3, %p4549_p0 }
 0x1fe   :  { %4346 = vmatmul.mubr.msk.f32.gmra.mrb[2].mxu0 %vm3870_vm12, %v3619_v31  ;;  %4358 = vmatmul.mubr.msk.f32.gmra.mrb[2].mxu1 %vm3870_vm12, %v3627_v0 }
 0x1ff   :  { %4348 = vmatprep.mubr.msk.f32.mxu0 %vm3870_vm12, %v3620_v56  ;;  %4360 = vmatprep.mubr.msk.f32.mxu1 %vm3870_vm12, %v3628_v46 }
 0x202   :  { %v3447_v53 = vpop.permute.xlu1 %3446  ;;  %4349 = vmatmul.mubr.msk.f32.gmra.mrb[4].mxu0 %vm3870_vm12, %v3621_v19 }
 0x203   :  { %4351 = vmatprep.mubr.msk.f32.mxu0 %vm3870_vm12, %v3622_v41  ;;  %v3478_v7 = vmul.f32 %v6198_v29, %v3447_v53 }
 0x206   :  { %v3550_v45 = vpop.permute.xlu1 %3549 }
 0x207   :  { %v3581_v35 = vmul.f32 %v6192_v33, %v3550_v45 }
 0x209   :  { %v3597_v38 = vsub.f32 %v3478_v7, %v3581_v35 }
 0x20b   :  { %v3613_v16 = vand.u32 2147483647, %v3597_v38 }
 0x20d   :  { %v3629_v57 = vsub.f32 %v3375_v24, %v3613_v16 }
 0x20f   :  { %4361 = vmatmul.mubr.msk.f32.gmra.mrb[4].mxu1 %vm3870_vm12, %v3629_v57 }
 0x21f   :  { %v3417_v50 = vpop.permute.xlu0 %3416 }
 0x220   :  { %v3472_v40 = vmul.f32 %v6198_v29, %v3417_v50 }
 0x223   :  { %v3520_v42 = vpop.permute.xlu0 %3519 }
 0x224   :  { %v3575_v2 = vmul.f32 %v6192_v33, %v3520_v42 }
 0x226   :  { %v3591_v32 = vsub.f32 %v3472_v40, %v3575_v2 }
 0x228   :  { %v3607_v12 = vand.u32 2147483647, %v3591_v32 }
 0x22a   :  { %v3623_v22 = vsub.f32 %v3369_v5, %v3607_v12 }
 0x22c   :  { %4352 = vmatmul.mubr.msk.f32.gmra.mrb[6].mxu0 %vm3870_vm12, %v3623_v22 }
 0x238   :  { %v3452_v49 = vpop.permute.xlu1 %3451 }
 0x239   :  { %v3479_v21 = vmul.f32 %v6198_v29, %v3452_v49 }
 0x23c   :  { %v3555_v37 = vpop.permute.xlu1 %3554 }
 0x23d   :  { %v3582_v34 = vmul.f32 %v6192_v33, %v3555_v37 }
 0x23f   :  { %v3598_v1 = vsub.f32 %v3479_v21, %v3582_v34 }
 0x241   :  { %v3614_v17 = vand.u32 2147483647, %v3598_v1 }
 0x243   :  { %v3630_v54 = vsub.f32 %v3376_v62, %v3614_v17 }
 0x245   :  { %4363 = vmatprep.mubr.msk.f32.mxu1 %vm3870_vm12, %v3630_v54 }
 0x254   :  { %v3457_v11 = vpop.permute.xlu1 %3456 }
 0x255   :  { %v3480_v18 = vmul.f32 %v6198_v29, %v3457_v11 }
 0x258   :  { %v3560_v39 = vpop.permute.xlu1 %3559 }
 0x259   :  { %v3583_v59 = vmul.f32 %v6192_v33, %v3560_v39 }
 0x25b   :  { %v3599_v44 = vsub.f32 %v3480_v18, %v3583_v59 }
 0x25d   :  { %v3615_v9 = vand.u32 2147483647, %v3599_v44 }
 0x25f   :  { %v3631_v63 = vsub.f32 %v3377_v47, %v3615_v9 }
 0x261   :  { %4364 = vmatmul.mubr.msk.f32.gmra.mrb[6].mxu1 %vm3870_vm12, %v3631_v63 }
 0x2cd   :  { %v4344_v28 = vpop.f32.mrb[0].mxu0  ;;  %v4356_v6 = vpop.f32.mrb[0].mxu1 }
 0x2ce   :  { %v4069_v58 = vmul.f32 -0.5, %v4344_v28  ;;  %v3989_v52 = vpop.f32.mrb[1].mxu0  ;;  %v4077_v3 = vmul.f32 -0.5, %v4356_v6  ;;  %v4029_v4 = vpop.f32.mrb[1].mxu1 }
 0x2cf   :  { %v4068_v25 = vmul.f32 -0.5, %v3989_v52  ;;  %v4076_v15 = vmul.f32 -0.5, %v4029_v4 }
 0x2d0   :  { %v4086_v29 = vmul.f32 1.442695, %v4069_v58  ;;  %v4102_v48 = vmul.f32 1.442695, %v4077_v3 }
 0x2d1   :  { %v4084_v33 = vmul.f32 1.442695, %v4068_v25  ;;  %v4100_v36 = vmul.f32 1.442695, %v4076_v15  ;;  %v4347_v55 = vpop.f32.mrb[2].mxu0  ;;  %v4359_v23 = vpop.f32.mrb[2].mxu1 }
 0x2d2   :  { %4516 = vpow2.f32 %v4086_v29  ;;  %v4071_v30 = vmul.f32 -0.5, %v4347_v55  ;;  %v3999_v20 = vpop.f32.mrb[3].mxu0  ;;  %v4079_v51 = vmul.f32 -0.5, %v4359_v23  ;;  %v4039_v61 = vpop.f32.mrb[3].mxu1 }
 0x2d3   :  { %4518 = vpow2.f32 %v4084_v33  ;;  %v4070_v60 = vmul.f32 -0.5, %v3999_v20  ;;  %v4078_v27 = vmul.f32 -0.5, %v4039_v61 }
 0x2d4   :  { %4520 = vpow2.f32 %v4102_v48  ;;  %v4090_v26 = vmul.f32 1.442695, %v4071_v30  ;;  %v4106_v8 = vmul.f32 1.442695, %v4079_v51 }
 0x2d5   :  { %4522 = vpow2.f32 %v4100_v36  ;;  %v4088_v31 = vmul.f32 1.442695, %v4070_v60  ;;  %v4104_v0 = vmul.f32 1.442695, %v4078_v27  ;;  %v4350_v43 = vpop.f32.mrb[4].mxu0 }
 0x2d6   :  { %4524 = vpow2.f32 %v4090_v26  ;;  %v4073_v56 = vmul.f32 -0.5, %v4350_v43  ;;  %v4009_v13 = vpop.f32.mrb[5].mxu0 }
 0x2d7   :  { %4526 = vpow2.f32 %v4088_v31  ;;  %v4072_v46 = vmul.f32 -0.5, %v4009_v13 }
 0x2d8   :  { %4528 = vpow2.f32 %v4106_v8  ;;  %v4094_v10 = vmul.f32 1.442695, %v4073_v56 }
 0x2d9   :  { %4530 = vpow2.f32 %v4104_v0  ;;  %v4092_v14 = vmul.f32 1.442695, %v4072_v46 }
 0x2da   :  { %4532 = vpow2.f32 %v4094_v10 }
 0x2db   :  { %4534 = vpow2.f32 %v4092_v14 }
 0x2dc   :  { %v4517_v19 = vpop.eup %4516 }
 0x2dd   :  { %v4519_v41 = vpop.eup %4518  ;;  %4117 = vst [vmem:[#allocation2 + $0x8] sm:$0xff] %v4517_v19 }
 0x2de   :  { %v4521_v53 = vpop.eup %4520  ;;  %4116 = vst [vmem:[#allocation2] sm:$0xff] %v4519_v41 }
 0x2df   :  { %v4523_v45 = vpop.eup %4522  ;;  %4125 = vst [vmem:[#allocation2 + $0x48] sm:$0xff] %v4521_v53 }
 0x2e0   :  { %v4525_v7 = vpop.eup %4524  ;;  %4124 = vst [vmem:[#allocation2 + $0x40] sm:$0xff] %v4523_v45 }
 0x2e1   :  { %v4527_v35 = vpop.eup %4526  ;;  %4119 = vst [vmem:[#allocation2 + $0x18] sm:$0xff] %v4525_v7 }
 0x2e2   :  { %v4362_v38 = vpop.f32.mrb[4].mxu1  ;;  %v4529_v24 = vpop.eup %4528  ;;  %4118 = vst [vmem:[#allocation2 + $0x10] sm:$0xff] %v4527_v35 }
 0x2e3   :  { %v4081_v16 = vmul.f32 -0.5, %v4362_v38  ;;  %v4049_v57 = vpop.f32.mrb[5].mxu1  ;;  %v4531_v50 = vpop.eup %4530  ;;  %4127 = vst [vmem:[#allocation2 + $0x58] sm:$0xff] %v4529_v24 }
 0x2e4   :  { %v4080_v42 = vmul.f32 -0.5, %v4049_v57  ;;  %v4533_v40 = vpop.eup %4532  ;;  %4126 = vst [vmem:[#allocation2 + $0x50] sm:$0xff] %v4531_v50 }
 0x2e5   :  { %v4110_v2 = vmul.f32 1.442695, %v4081_v16  ;;  %v4535_v32 = vpop.eup %4534  ;;  %4121 = vst [vmem:[#allocation2 + $0x28] sm:$0xff] %v4533_v40 }
 0x2e6   :  { %v4108_v5 = vmul.f32 1.442695, %v4080_v42  ;;  %4120 = vst [vmem:[#allocation2 + $0x20] sm:$0xff] %v4535_v32 }
 0x2e7   :  { %4536 = vpow2.f32 %v4110_v2 }
 0x2e8   :  { %4538 = vpow2.f32 %v4108_v5 }
 0x2f1   :  { %v4537_v12 = vpop.eup %4536 }
 0x2f2   :  { %v4539_v22 = vpop.eup %4538  ;;  %4129 = vst [vmem:[#allocation2 + $0x68] sm:$0xff] %v4537_v12 }
 0x2f3   :  { %4128 = vst [vmem:[#allocation2 + $0x60] sm:$0xff] %v4539_v22 }
 0x2ff   :  { %v4353_v49 = vpop.f32.mrb[6].mxu0 }
 0x300   :  { %v4075_v37 = vmul.f32 -0.5, %v4353_v49  ;;  %v4019_v21 = vpop.f32.mrb[7].mxu0 }
 0x301   :  { %v4074_v34 = vmul.f32 -0.5, %v4019_v21 }
 0x302   :  { %v4098_v1 = vmul.f32 1.442695, %v4075_v37 }
 0x303   :  { %v4096_v62 = vmul.f32 1.442695, %v4074_v34 }
 0x304   :  { %4540 = vpow2.f32 %v4098_v1 }
 0x305   :  { %4542 = vpow2.f32 %v4096_v62 }
 0x30e   :  { %v4541_v17 = vpop.eup %4540 }
 0x30f   :  { %v4543_v54 = vpop.eup %4542  ;;  %4123 = vst [vmem:[#allocation2 + $0x38] sm:$0xff] %v4541_v17 }
 0x310   :  { %4122 = vst [vmem:[#allocation2 + $0x30] sm:$0xff] %v4543_v54 }
 0x334   :  { %v4365_v11 = vpop.f32.mrb[6].mxu1 }
 0x335   :  { %v4083_v39 = vmul.f32 -0.5, %v4365_v11  ;;  %v4059_v18 = vpop.f32.mrb[7].mxu1 }
 0x336   :  { %v4082_v59 = vmul.f32 -0.5, %v4059_v18 }
 0x337   :  { %v4114_v44 = vmul.f32 1.442695, %v4083_v39 }
 0x338   :  { %v4112_v47 = vmul.f32 1.442695, %v4082_v59 }
 0x339   :  { %4544 = vpow2.f32 %v4114_v44 }
 0x33a   :  { %4546 = vpow2.f32 %v4112_v47 }
 0x343   :  { %v4545_v9 = vpop.eup %4544 }
 0x344   :  { %v4547_v63 = vpop.eup %4546  ;;  %4131 = vst [vmem:[#allocation2 + $0x78] sm:$0xff] %v4545_v9 }
 0x345   :  { %4130 = vst [vmem:[#allocation2 + $0x70] sm:$0xff] %v4547_v63 }
 0x346   :  { %4559 = shalt.err (!%p4556_p4)
}
 0x347   :  { %s4560_s26 = scalar_lea.hbm %s6443_s8, 2048 }
 0x348   :  { %p4561_p5 = scmp.ne.s32.totalorder %s6443_s8, %s4560_s26  ;;  %p4564_p6 = scmp.lt.u32.totalorder %s4560_s26, %s6443_s8 }
 0x34a   :  { %p4566_p7 = pnand %p4564_p6, %p4561_p5 }
 0x34c   :  { %4569 = shalt.err (!%p4566_p7)
}
 0x34d   :  { %s4580_s4 = smov 128   ;;  %s4581_s9 = smov 8  }
 0x34e   :  { %4163 = dma.vmem_to_hbm [thread:$0]  %s4158_s22, 2048, %s6443_s8, [#allocation3], %s4580_s4, %s4580_s4, %s4581_s9  }
 0x34f   :  { %4570 = dma.done.wait [#allocation3], 2048  }
 0x350   :  { %4571 = vsyncadd [#allocation3], 4294965248 }
 0x351   :  { %4167 = vsyncpa [#allocation3], 1 }

</bundles_post_ra>
